<compile_context>
chip_gen: v6e
topology: v6e:2x2x1
jax: 0.10.0
libtpu: 0.0.40
codegen_flags: <defaults>
</compile_context>

<pallas_src>
import numpy as np

import jax
import jax.numpy as jnp
from jax import lax
from jax.experimental import pallas as pl
from jax.experimental.pallas import tpu as pltpu

K_SIZES = (5, 9, 13)             # SPP pool sizes
BASE_K = K_SIZES[0]              # cascaded pool kernel size (5)
# cascade equivalence requires k_i = BASE_K + i*(BASE_K-1)  -> 5, 9, 13
assert all(k == BASE_K + i * (BASE_K - 1) for i, k in enumerate(K_SIZES))
PAD = BASE_K // 2                # stride-1 "same" max-pool padding (2)
NUM_BRANCH = len(K_SIZES) + 1    # identity + 3 pools
COMPUTE_DTYPE = jnp.bfloat16     # MXU operand dtype (accumulation stays f32)


def _silu(z):
    # z * sigmoid(z); reciprocal goes to the EUP slot instead of a VALU divide.
    return z * pl.reciprocal(1.0 + jnp.exp(-z), approx=True)


def _spp_fused_kernel(x_ref, w1_ref, b1_ref, w2_ref, b2_ref, o_ref,
                      pad_ref, cat_ref):
    """One batch image: cv1 -> cascaded 5x5 max pools -> fused concat + cv2."""
    H, W, c2 = o_ref.shape[1], o_ref.shape[2], o_ref.shape[3]
    c1 = x_ref.shape[3]
    c_ = w1_ref.shape[1]
    HW = H * W
    pool_dt = pad_ref.dtype
    ninf32 = jnp.array(-jnp.inf, dtype=jnp.float32)

    # ---- cv1: 1x1 conv (+ folded BN) + SiLU as one pixel matmul -------------
    x2d = x_ref[0].reshape(HW, c1)                                    # bf16
    y = jnp.dot(x2d, w1_ref[...], preferred_element_type=jnp.float32)
    y = _silu(y + b1_ref[...])                                        # (HW, c_) f32

    # ---- branch 0 (identity) into the in-VMEM concat; pooling seed ----------
    y_p = y.astype(pool_dt)
    cat_ref[:, 0:c_] = y_p.astype(cat_ref.dtype)
    cur = y_p                                                         # (HW, c_)

    # ---- -inf halo rows of the flat row-padded scratch (interior is fully
    #      rewritten every branch, so only the halo is initialized) -----------
    halo = jnp.full((PAD * W, c_), -jnp.inf, dtype=pool_dt)
    pad_ref[0:PAD * W] = halo
    pad_ref[PAD * W + HW:PAD * W + HW + PAD * W] = halo

    # ---- column-tap masks, hoisted out of the branch loop.  The mask for a
    #      given roll is built by rolling the column-index vector with the
    #      *same* shift, so it is correct regardless of roll direction and
    #      rejects cross-row and wrap-around sources automatically. -----------
    col = lax.broadcasted_iota(jnp.int32, (H, W, 1), 1).reshape(HW, 1)
    w_shifts, w_masks = [], []
    for dw in range(1, PAD + 1):
        for s in (dw, HW - dw):
            w_shifts.append(s)
            w_masks.append(
                jnp.abs(pltpu.roll(col, shift=s, axis=0) - col) == dw)

    # ---- cascaded 5x5 max pools == maxpool 5 / 9 / 13 (stride 1, pad k//2) --
    for b in range(1, NUM_BRANCH):
        # row (H) pass: -inf padded flat buffer; every slice offset is a
        # multiple of W (8-aligned) -> unmasked stores/loads, no masks needed.
        pad_ref[PAD * W:PAD * W + HW] = cur
        hmax = pad_ref[0:HW]
        for dh in range(1, BASE_K):
            hmax = jnp.maximum(hmax, pad_ref[dh * W:dh * W + HW])
        # column (W) pass: +/-1, +/-2 sublane shifts via pltpu.roll (XLU) plus
        # the precomputed validity masks (VPU select); no misaligned slices.
        # Rolls are kept on f32 operands (32-bit rotate path).
        hmax32 = hmax.astype(jnp.float32)
        pooled = hmax32
        for s, ok in zip(w_shifts, w_masks):
            t = pltpu.roll(hmax32, shift=s, axis=0)
            pooled = jnp.maximum(pooled, jnp.where(ok, t, ninf32))
        cat_ref[:, b * c_:(b + 1) * c_] = pooled.astype(cat_ref.dtype)
        cur = pooled.astype(pool_dt)

    # ---- cv2: one fused matmul over the VMEM concat + bias + SiLU -----------
    z = jnp.dot(cat_ref[...], w2_ref[...], preferred_element_type=jnp.float32)
    z = _silu(z + b2_ref[...])
    o_ref[0] = z.reshape(H, W, c2).astype(o_ref.dtype)


# ------------------------------ parameters -----------------------------------
def fold_bn(w, gamma, beta, mean, var, eps=1e-5):
    """Fold eval-mode BatchNorm into a bias-free 1x1 conv.  w: (Cout, Cin)."""
    scale = gamma / jnp.sqrt(var + eps)
    w_eff = (w * scale[:, None]).T           # (Cin, Cout)
    b_eff = (beta - mean * scale)[None, :]   # (1, Cout)
    return w_eff.astype(jnp.float32), b_eff.astype(jnp.float32)


def init_spp_params(key, c1, c2):
    c_ = c1 // 2

    def make_conv_bn(k, cin, cout):
        kw, kg, kb, km, kv = jax.random.split(k, 5)
        w = 0.1 * jax.random.normal(kw, (cout, cin), jnp.float32)
        gamma = 1.0 + 0.1 * jax.random.normal(kg, (cout,), jnp.float32)
        beta = 0.1 * jax.random.normal(kb, (cout,), jnp.float32)
        mean = 0.1 * jax.random.normal(km, (cout,), jnp.float32)
        var = jnp.abs(jax.random.normal(kv, (cout,), jnp.float32)) + 0.5
        return fold_bn(w, gamma, beta, mean, var)

    k1, k2 = jax.random.split(key)
    w1, b1 = make_conv_bn(k1, c1, c_)
    w2, b2 = make_conv_bn(k2, c_ * NUM_BRANCH, c2)
    return {"w1": w1, "b1": b1, "w2": w2, "b2": b2}


def _pool_dtype():
    """bf16 pooling on chips with a native bf16 VPU (v6e/v7x), f32 otherwise."""
    try:
        kind = jax.devices()[0].device_kind.lower()
    except Exception:
        return jnp.float32
    if any(v in kind for v in ("v2", "v3", "v4", "v5")):
        return jnp.float32
    return jnp.bfloat16


# -------------------------------- forward -------------------------------------
def spp_forward(params, x_nchw, out_dtype=None):
    """SPP forward, NCHW in / NCHW out (PyTorch convention)."""
    N, c1, H, W = x_nchw.shape
    c_ = params["w1"].shape[1]
    c2 = params["w2"].shape[1]
    assert W % 8 == 0, "W must be a multiple of 8 (sublane tiling for in-kernel reshapes)"
    # TODO(synk): pad c1/c_/c2 up to multiples of 128 (256 on v6e/v7x) in the
    # wrapper for lane-dense stores / full MXU lanes when the model's channel
    # counts are not already aligned.
    # TODO(synk): for very large H*W*c_ on v7x (64 MiB VMEM, 2 TCs), add an
    # H-band grid axis with a 6-row halo per side instead of one image/step.

    out_dtype = x_nchw.dtype if out_dtype is None else out_dtype
    pool_dtype = _pool_dtype()

    # NOTE: in a channels-last model these transposes disappear entirely.
    x = jnp.transpose(x_nchw, (0, 2, 3, 1)).astype(COMPUTE_DTYPE)    # NHWC bf16
    w1 = params["w1"].astype(COMPUTE_DTYPE)                          # (c1, c_)
    w2 = params["w2"].astype(COMPUTE_DTYPE)                          # (4c_, c2)
    b1, b2 = params["b1"], params["b2"]                              # f32 (1, c)

    # Explicit VMEM budget: scratches + double-buffered in/out blocks + weights.
    isz = lambda dt: np.dtype(dt).itemsize
    HW = H * W
    bytes_pad = (HW + 2 * PAD * W) * c_ * isz(pool_dtype)
    bytes_cat = HW * NUM_BRANCH * c_ * isz(COMPUTE_DTYPE)
    bytes_io = 2 * (HW * c1 * isz(COMPUTE_DTYPE) + HW * c2 * isz(out_dtype))
    bytes_w = 2 * ((c1 * c_ + NUM_BRANCH * c_ * c2) * isz(COMPUTE_DTYPE)
                   + (c_ + c2) * 4)
    footprint = bytes_pad + bytes_cat + bytes_io + bytes_w
    vmem_limit = int(min(128 << 20, max(32 << 20, 2 * footprint + (4 << 20))))

    out = pl.pallas_call(
        _spp_fused_kernel,
        out_shape=jax.ShapeDtypeStruct((N, H, W, c2), out_dtype),
        grid=(N,),
        in_specs=[
            pl.BlockSpec((1, H, W, c1), lambda n: (n, 0, 0, 0)),
            pl.BlockSpec((c1, c_), lambda n: (0, 0)),
            pl.BlockSpec((1, c_), lambda n: (0, 0)),
            pl.BlockSpec((NUM_BRANCH * c_, c2), lambda n: (0, 0)),
            pl.BlockSpec((1, c2), lambda n: (0, 0)),
        ],
        out_specs=pl.BlockSpec((1, H, W, c2), lambda n: (n, 0, 0, 0)),
        scratch_shapes=[
            pltpu.VMEM((HW + 2 * PAD * W, c_), pool_dtype),     # row-padded pool buf
            pltpu.VMEM((HW, NUM_BRANCH * c_), COMPUTE_DTYPE),   # in-VMEM concat
        ],
        compiler_params=pltpu.CompilerParams(
            dimension_semantics=("parallel",),
            vmem_limit_bytes=vmem_limit),
    )(x, w1, b1, w2, b2)
    return jnp.transpose(out, (0, 3, 1, 2))                          # NCHW


# ----------------------------- pure-JAX reference ------------------------------
def spp_reference(params, x_nchw):
    """f32 XLA reference (exact sigmoid) for validation."""
    x = jnp.transpose(x_nchw, (0, 2, 3, 1))

    def conv_bn_silu(v, w, b):
        z = jnp.matmul(v, w) + b[0]
        return z * jax.nn.sigmoid(z)

    def maxpool(v, k):
        p = k // 2
        vp = jnp.pad(v, ((0, 0), (p, p), (p, p), (0, 0)),
                     constant_values=-jnp.inf)
        return lax.reduce_window(vp, -jnp.inf, lax.max,
                                 (1, k, k, 1), (1, 1, 1, 1), "VALID")

    y = conv_bn_silu(x, params["w1"], params["b1"])
    cat = jnp.concatenate([y] + [maxpool(y, k) for k in K_SIZES], axis=-1)
    z = conv_bn_silu(cat, params["w2"], params["b2"])
    return jnp.transpose(z, (0, 3, 1, 2))


if __name__ == "__main__":
    key = jax.random.PRNGKey(0)
    kx, kp = jax.random.split(key)
    c1, c2 = 8, 8
    x = jax.random.normal(kx, (2, c1, 16, 16), jnp.float32)  # NCHW like PyTorch
    params = init_spp_params(kp, c1, c2)

    out = jax.jit(spp_forward)(params, x)
    jax.block_until_ready(out)
    assert out.shape == (2, c2, 16, 16)

    ref = spp_reference(params, x)
    err = float(jnp.max(jnp.abs(out - ref)))
    # bf16 MXU operands + approx-reciprocal sigmoid give ~1e-2-level deviation
    # from the exact f32 reference (inference-grade accuracy, documented).
    assert err < 5e-2, f"max abs err {err}"
    print("KERNEL_OK")
</pallas_src>

<mosaic_0001>
module attributes {stable_mosaic.version = 11 : i64} {
  func.func @_spp_fused_kernel(%arg0: i32, %arg1: memref<1x16x16x8xbf16, #tpu.memory_space<vmem>>, %arg2: memref<8x4xbf16, #tpu.memory_space<vmem>>, %arg3: memref<1x4xf32, #tpu.memory_space<vmem>>, %arg4: memref<16x8xbf16, #tpu.memory_space<vmem>>, %arg5: memref<1x8xf32, #tpu.memory_space<vmem>>, %arg6: memref<1x16x16x8xf32, #tpu.memory_space<vmem>>, %arg7: memref<320x4xbf16, #tpu.memory_space<vmem>>, %arg8: memref<256x16xbf16, #tpu.memory_space<vmem>>) attributes {dimension_semantics = [#tpu.dimension_semantics<parallel>], iteration_bounds = array<i64: 2>, scalar_prefetch = 0 : i64, scratch_operands = 2 : i64, tpu.core_type = #tpu.core_type<tc>, window_params = [{transform_indices = @transform_0, window_bounds = array<i64: 1, 16, 16, 8>}, {pipeline_mode = #tpu.pipeline_mode<synchronous>, transform_indices = @transform_1, window_bounds = array<i64: 8, 4>}, {pipeline_mode = #tpu.pipeline_mode<synchronous>, transform_indices = @transform_2, window_bounds = array<i64: 1, 4>}, {pipeline_mode = #tpu.pipeline_mode<synchronous>, transform_indices = @transform_3, window_bounds = array<i64: 16, 8>}, {pipeline_mode = #tpu.pipeline_mode<synchronous>, transform_indices = @transform_4, window_bounds = array<i64: 1, 8>}, {transform_indices = @transform_5, window_bounds = array<i64: 1, 16, 16, 8>}]} {
    %c0 = arith.constant 0 : index
    %c0_0 = arith.constant 0 : index
    %c0_1 = arith.constant 0 : index
    %c0_2 = arith.constant 0 : index
    %0 = vector.load %arg1[%c0, %c0_0, %c0_1, %c0_2] : memref<1x16x16x8xbf16, #tpu.memory_space<vmem>>, vector<1x16x16x8xbf16>
    %1 = vector.shape_cast %0 : vector<1x16x16x8xbf16> to vector<16x16x8xbf16>
    %2 = vector.shape_cast %1 : vector<16x16x8xbf16> to vector<256x8xbf16>
    %c0_3 = arith.constant 0 : index
    %c0_4 = arith.constant 0 : index
    %3 = vector.load %arg2[%c0_3, %c0_4] : memref<8x4xbf16, #tpu.memory_space<vmem>>, vector<8x4xbf16>
    %cst = arith.constant dense<0.000000e+00> : vector<256x4xf32>
    %4 = tpu.matmul %2, %3, %cst {dimension_numbers = #tpu.dot_dimension_numbers<[1], [0], [0], [1], [0, 0, 1, 1], [], []>} : vector<256x8xbf16>, vector<8x4xbf16>, vector<256x4xf32> -> vector<256x4xf32>
    %c0_5 = arith.constant 0 : index
    %c0_6 = arith.constant 0 : index
    %5 = vector.load %arg3[%c0_5, %c0_6] : memref<1x4xf32, #tpu.memory_space<vmem>>, vector<1x4xf32>
    %6 = vector.broadcast %5 : vector<1x4xf32> to vector<256x4xf32>
    %7 = arith.addf %4, %6 : vector<256x4xf32>
    %cst_7 = arith.constant 0.000000e+00 : f32
    %8 = vector.broadcast %cst_7 : f32 to vector<256x4xf32>
    %9 = arith.subf %8, %7 : vector<256x4xf32>
    %10 = math.exp %9 : vector<256x4xf32>
    %cst_8 = arith.constant 1.000000e+00 : f32
    %11 = vector.broadcast %cst_8 : f32 to vector<256x4xf32>
    %12 = arith.addf %11, %10 : vector<256x4xf32>
    %13 = tpu.reciprocal %12 {approx = true} : vector<256x4xf32> -> vector<256x4xf32>
    %14 = arith.mulf %7, %13 : vector<256x4xf32>
    %15 = arith.truncf %14 : vector<256x4xf32> to vector<256x4xbf16>
    %c0_9 = arith.constant 0 : index
    %c0_10 = arith.constant 0 : index
    %16 = vector.load %arg8[%c0_9, %c0_10] : memref<256x16xbf16, #tpu.memory_space<vmem>>, vector<256x4xbf16>
    tpu.vector_store %arg8[%c0_9, %c0_10], %15 {strides = array<i32>} : memref<256x16xbf16, #tpu.memory_space<vmem>>, vector<256x4xbf16>,
    %cst_11 = arith.constant 0xFF80 : bf16
    %17 = vector.broadcast %cst_11 : bf16 to vector<32x4xbf16>
    %c0_12 = arith.constant 0 : index
    %c0_13 = arith.constant 0 : index
    %18 = vector.load %arg7[%c0_12, %c0_13] : memref<320x4xbf16, #tpu.memory_space<vmem>>, vector<32x4xbf16>
    tpu.vector_store %arg7[%c0_12, %c0_13], %17 {strides = array<i32>} : memref<320x4xbf16, #tpu.memory_space<vmem>>, vector<32x4xbf16>,
    %c288 = arith.constant 288 : index
    %c0_14 = arith.constant 0 : index
    %19 = vector.load %arg7[%c288, %c0_14] : memref<320x4xbf16, #tpu.memory_space<vmem>>, vector<32x4xbf16>
    tpu.vector_store %arg7[%c288, %c0_14], %17 {strides = array<i32>} : memref<320x4xbf16, #tpu.memory_space<vmem>>, vector<32x4xbf16>,
    %20 = tpu.iota {dimensions = array<i32: 1>} : vector<16x16x1xi32>
    %21 = vector.shape_cast %20 : vector<16x16x1xi32> to vector<256x1xi32>
    %c1_i32 = arith.constant 1 : i32
    %22 = tpu.dynamic_rotate %21 by %c1_i32 dim 0 : vector<256x1xi32>, i32 -> vector<256x1xi32>
    %23 = arith.subi %22, %21 : vector<256x1xi32>
    %24 = math.absi %23 : vector<256x1xi32>
    %c1_i32_15 = arith.constant 1 : i32
    %25 = vector.broadcast %c1_i32_15 : i32 to vector<256x1xi32>
    %26 = arith.cmpi eq, %24, %25 : vector<256x1xi32>
    %c255_i32 = arith.constant 255 : i32
    %27 = tpu.dynamic_rotate %21 by %c255_i32 dim 0 : vector<256x1xi32>, i32 -> vector<256x1xi32>
    %28 = arith.subi %27, %21 : vector<256x1xi32>
    %29 = math.absi %28 : vector<256x1xi32>
    %c1_i32_16 = arith.constant 1 : i32
    %30 = vector.broadcast %c1_i32_16 : i32 to vector<256x1xi32>
    %31 = arith.cmpi eq, %29, %30 : vector<256x1xi32>
    %c2_i32 = arith.constant 2 : i32
    %32 = tpu.dynamic_rotate %21 by %c2_i32 dim 0 : vector<256x1xi32>, i32 -> vector<256x1xi32>
    %33 = arith.subi %32, %21 : vector<256x1xi32>
    %34 = math.absi %33 : vector<256x1xi32>
    %c2_i32_17 = arith.constant 2 : i32
    %35 = vector.broadcast %c2_i32_17 : i32 to vector<256x1xi32>
    %36 = arith.cmpi eq, %34, %35 : vector<256x1xi32>
    %c254_i32 = arith.constant 254 : i32
    %37 = tpu.dynamic_rotate %21 by %c254_i32 dim 0 : vector<256x1xi32>, i32 -> vector<256x1xi32>
    %38 = arith.subi %37, %21 : vector<256x1xi32>
    %39 = math.absi %38 : vector<256x1xi32>
    %c2_i32_18 = arith.constant 2 : i32
    %40 = vector.broadcast %c2_i32_18 : i32 to vector<256x1xi32>
    %41 = arith.cmpi eq, %39, %40 : vector<256x1xi32>
    %c32 = arith.constant 32 : index
    %c0_19 = arith.constant 0 : index
    %42 = vector.load %arg7[%c32, %c0_19] : memref<320x4xbf16, #tpu.memory_space<vmem>>, vector<256x4xbf16>
    tpu.vector_store %arg7[%c32, %c0_19], %15 {strides = array<i32>} : memref<320x4xbf16, #tpu.memory_space<vmem>>, vector<256x4xbf16>,
    %c0_20 = arith.constant 0 : index
    %c0_21 = arith.constant 0 : index
    %43 = vector.load %arg7[%c0_20, %c0_21] : memref<320x4xbf16, #tpu.memory_space<vmem>>, vector<256x4xbf16>
    %c16 = arith.constant 16 : index
    %c0_22 = arith.constant 0 : index
    %44 = vector.load %arg7[%c16, %c0_22] : memref<320x4xbf16, #tpu.memory_space<vmem>>, vector<256x4xbf16>
    %45 = arith.maximumf %43, %44 : vector<256x4xbf16>
    %c32_23 = arith.constant 32 : index
    %c0_24 = arith.constant 0 : index
    %46 = vector.load %arg7[%c32_23, %c0_24] : memref<320x4xbf16, #tpu.memory_space<vmem>>, vector<256x4xbf16>
    %47 = arith.maximumf %45, %46 : vector<256x4xbf16>
    %c48 = arith.constant 48 : index
    %c0_25 = arith.constant 0 : index
    %48 = vector.load %arg7[%c48, %c0_25] : memref<320x4xbf16, #tpu.memory_space<vmem>>, vector<256x4xbf16>
    %49 = arith.maximumf %47, %48 : vector<256x4xbf16>
    %c64 = arith.constant 64 : index
    %c0_26 = arith.constant 0 : index
    %50 = vector.load %arg7[%c64, %c0_26] : memref<320x4xbf16, #tpu.memory_space<vmem>>, vector<256x4xbf16>
    %51 = arith.maximumf %49, %50 : vector<256x4xbf16>
    %52 = arith.extf %51 : vector<256x4xbf16> to vector<256x4xf32>
    %c1_i32_27 = arith.constant 1 : i32
    %53 = tpu.dynamic_rotate %52 by %c1_i32_27 dim 0 : vector<256x4xf32>, i32 -> vector<256x4xf32>
    %cst_28 = arith.constant 0xFF800000 : f32
    %54 = vector.shape_cast %26 : vector<256x1xi1> to vector<256x1xi1>
    %55 = vector.broadcast %54 : vector<256x1xi1> to vector<256x4xi1>
    %56 = vector.broadcast %cst_28 : f32 to vector<256x4xf32>
    %57 = arith.select %55, %53, %56 : vector<256x4xi1>, vector<256x4xf32>
    %58 = arith.maximumf %52, %57 : vector<256x4xf32>
    %c255_i32_29 = arith.constant 255 : i32
    %59 = tpu.dynamic_rotate %52 by %c255_i32_29 dim 0 : vector<256x4xf32>, i32 -> vector<256x4xf32>
    %cst_30 = arith.constant 0xFF800000 : f32
    %60 = vector.shape_cast %31 : vector<256x1xi1> to vector<256x1xi1>
    %61 = vector.broadcast %60 : vector<256x1xi1> to vector<256x4xi1>
    %62 = vector.broadcast %cst_30 : f32 to vector<256x4xf32>
    %63 = arith.select %61, %59, %62 : vector<256x4xi1>, vector<256x4xf32>
    %64 = arith.maximumf %58, %63 : vector<256x4xf32>
    %c2_i32_31 = arith.constant 2 : i32
    %65 = tpu.dynamic_rotate %52 by %c2_i32_31 dim 0 : vector<256x4xf32>, i32 -> vector<256x4xf32>
    %cst_32 = arith.constant 0xFF800000 : f32
    %66 = vector.shape_cast %36 : vector<256x1xi1> to vector<256x1xi1>
    %67 = vector.broadcast %66 : vector<256x1xi1> to vector<256x4xi1>
    %68 = vector.broadcast %cst_32 : f32 to vector<256x4xf32>
    %69 = arith.select %67, %65, %68 : vector<256x4xi1>, vector<256x4xf32>
    %70 = arith.maximumf %64, %69 : vector<256x4xf32>
    %c254_i32_33 = arith.constant 254 : i32
    %71 = tpu.dynamic_rotate %52 by %c254_i32_33 dim 0 : vector<256x4xf32>, i32 -> vector<256x4xf32>
    %cst_34 = arith.constant 0xFF800000 : f32
    %72 = vector.shape_cast %41 : vector<256x1xi1> to vector<256x1xi1>
    %73 = vector.broadcast %72 : vector<256x1xi1> to vector<256x4xi1>
    %74 = vector.broadcast %cst_34 : f32 to vector<256x4xf32>
    %75 = arith.select %73, %71, %74 : vector<256x4xi1>, vector<256x4xf32>
    %76 = arith.maximumf %70, %75 : vector<256x4xf32>
    %77 = arith.truncf %76 : vector<256x4xf32> to vector<256x4xbf16>
    %c0_35 = arith.constant 0 : index
    %c4 = arith.constant 4 : index
    %78 = vector.load %arg8[%c0_35, %c4] : memref<256x16xbf16, #tpu.memory_space<vmem>>, vector<256x4xbf16>
    tpu.vector_store %arg8[%c0_35, %c4], %77 {strides = array<i32>} : memref<256x16xbf16, #tpu.memory_space<vmem>>, vector<256x4xbf16>,
    %79 = arith.truncf %76 : vector<256x4xf32> to vector<256x4xbf16>
    %c32_36 = arith.constant 32 : index
    %c0_37 = arith.constant 0 : index
    %80 = vector.load %arg7[%c32_36, %c0_37] : memref<320x4xbf16, #tpu.memory_space<vmem>>, vector<256x4xbf16>
    tpu.vector_store %arg7[%c32_36, %c0_37], %79 {strides = array<i32>} : memref<320x4xbf16, #tpu.memory_space<vmem>>, vector<256x4xbf16>,
    %c0_38 = arith.constant 0 : index
    %c0_39 = arith.constant 0 : index
    %81 = vector.load %arg7[%c0_38, %c0_39] : memref<320x4xbf16, #tpu.memory_space<vmem>>, vector<256x4xbf16>
    %c16_40 = arith.constant 16 : index
    %c0_41 = arith.constant 0 : index
    %82 = vector.load %arg7[%c16_40, %c0_41] : memref<320x4xbf16, #tpu.memory_space<vmem>>, vector<256x4xbf16>
    %83 = arith.maximumf %81, %82 : vector<256x4xbf16>
    %c32_42 = arith.constant 32 : index
    %c0_43 = arith.constant 0 : index
    %84 = vector.load %arg7[%c32_42, %c0_43] : memref<320x4xbf16, #tpu.memory_space<vmem>>, vector<256x4xbf16>
    %85 = arith.maximumf %83, %84 : vector<256x4xbf16>
    %c48_44 = arith.constant 48 : index
    %c0_45 = arith.constant 0 : index
    %86 = vector.load %arg7[%c48_44, %c0_45] : memref<320x4xbf16, #tpu.memory_space<vmem>>, vector<256x4xbf16>
    %87 = arith.maximumf %85, %86 : vector<256x4xbf16>
    %c64_46 = arith.constant 64 : index
    %c0_47 = arith.constant 0 : index
    %88 = vector.load %arg7[%c64_46, %c0_47] : memref<320x4xbf16, #tpu.memory_space<vmem>>, vector<256x4xbf16>
    %89 = arith.maximumf %87, %88 : vector<256x4xbf16>
    %90 = arith.extf %89 : vector<256x4xbf16> to vector<256x4xf32>
    %c1_i32_48 = arith.constant 1 : i32
    %91 = tpu.dynamic_rotate %90 by %c1_i32_48 dim 0 : vector<256x4xf32>, i32 -> vector<256x4xf32>
    %cst_49 = arith.constant 0xFF800000 : f32
    %92 = vector.shape_cast %26 : vector<256x1xi1> to vector<256x1xi1>
    %93 = vector.broadcast %92 : vector<256x1xi1> to vector<256x4xi1>
    %94 = vector.broadcast %cst_49 : f32 to vector<256x4xf32>
    %95 = arith.select %93, %91, %94 : vector<256x4xi1>, vector<256x4xf32>
    %96 = arith.maximumf %90, %95 : vector<256x4xf32>
    %c255_i32_50 = arith.constant 255 : i32
    %97 = tpu.dynamic_rotate %90 by %c255_i32_50 dim 0 : vector<256x4xf32>, i32 -> vector<256x4xf32>
    %cst_51 = arith.constant 0xFF800000 : f32
    %98 = vector.shape_cast %31 : vector<256x1xi1> to vector<256x1xi1>
    %99 = vector.broadcast %98 : vector<256x1xi1> to vector<256x4xi1>
    %100 = vector.broadcast %cst_51 : f32 to vector<256x4xf32>
    %101 = arith.select %99, %97, %100 : vector<256x4xi1>, vector<256x4xf32>
    %102 = arith.maximumf %96, %101 : vector<256x4xf32>
    %c2_i32_52 = arith.constant 2 : i32
    %103 = tpu.dynamic_rotate %90 by %c2_i32_52 dim 0 : vector<256x4xf32>, i32 -> vector<256x4xf32>
    %cst_53 = arith.constant 0xFF800000 : f32
    %104 = vector.shape_cast %36 : vector<256x1xi1> to vector<256x1xi1>
    %105 = vector.broadcast %104 : vector<256x1xi1> to vector<256x4xi1>
    %106 = vector.broadcast %cst_53 : f32 to vector<256x4xf32>
    %107 = arith.select %105, %103, %106 : vector<256x4xi1>, vector<256x4xf32>
    %108 = arith.maximumf %102, %107 : vector<256x4xf32>
    %c254_i32_54 = arith.constant 254 : i32
    %109 = tpu.dynamic_rotate %90 by %c254_i32_54 dim 0 : vector<256x4xf32>, i32 -> vector<256x4xf32>
    %cst_55 = arith.constant 0xFF800000 : f32
    %110 = vector.shape_cast %41 : vector<256x1xi1> to vector<256x1xi1>
    %111 = vector.broadcast %110 : vector<256x1xi1> to vector<256x4xi1>
    %112 = vector.broadcast %cst_55 : f32 to vector<256x4xf32>
    %113 = arith.select %111, %109, %112 : vector<256x4xi1>, vector<256x4xf32>
    %114 = arith.maximumf %108, %113 : vector<256x4xf32>
    %115 = arith.truncf %114 : vector<256x4xf32> to vector<256x4xbf16>
    %c0_56 = arith.constant 0 : index
    %c8 = arith.constant 8 : index
    %116 = vector.load %arg8[%c0_56, %c8] : memref<256x16xbf16, #tpu.memory_space<vmem>>, vector<256x4xbf16>
    tpu.vector_store %arg8[%c0_56, %c8], %115 {strides = array<i32>} : memref<256x16xbf16, #tpu.memory_space<vmem>>, vector<256x4xbf16>,
    %117 = arith.truncf %114 : vector<256x4xf32> to vector<256x4xbf16>
    %c32_57 = arith.constant 32 : index
    %c0_58 = arith.constant 0 : index
    %118 = vector.load %arg7[%c32_57, %c0_58] : memref<320x4xbf16, #tpu.memory_space<vmem>>, vector<256x4xbf16>
    tpu.vector_store %arg7[%c32_57, %c0_58], %117 {strides = array<i32>} : memref<320x4xbf16, #tpu.memory_space<vmem>>, vector<256x4xbf16>,
    %c0_59 = arith.constant 0 : index
    %c0_60 = arith.constant 0 : index
    %119 = vector.load %arg7[%c0_59, %c0_60] : memref<320x4xbf16, #tpu.memory_space<vmem>>, vector<256x4xbf16>
    %c16_61 = arith.constant 16 : index
    %c0_62 = arith.constant 0 : index
    %120 = vector.load %arg7[%c16_61, %c0_62] : memref<320x4xbf16, #tpu.memory_space<vmem>>, vector<256x4xbf16>
    %121 = arith.maximumf %119, %120 : vector<256x4xbf16>
    %c32_63 = arith.constant 32 : index
    %c0_64 = arith.constant 0 : index
    %122 = vector.load %arg7[%c32_63, %c0_64] : memref<320x4xbf16, #tpu.memory_space<vmem>>, vector<256x4xbf16>
    %123 = arith.maximumf %121, %122 : vector<256x4xbf16>
    %c48_65 = arith.constant 48 : index
    %c0_66 = arith.constant 0 : index
    %124 = vector.load %arg7[%c48_65, %c0_66] : memref<320x4xbf16, #tpu.memory_space<vmem>>, vector<256x4xbf16>
    %125 = arith.maximumf %123, %124 : vector<256x4xbf16>
    %c64_67 = arith.constant 64 : index
    %c0_68 = arith.constant 0 : index
    %126 = vector.load %arg7[%c64_67, %c0_68] : memref<320x4xbf16, #tpu.memory_space<vmem>>, vector<256x4xbf16>
    %127 = arith.maximumf %125, %126 : vector<256x4xbf16>
    %128 = arith.extf %127 : vector<256x4xbf16> to vector<256x4xf32>
    %c1_i32_69 = arith.constant 1 : i32
    %129 = tpu.dynamic_rotate %128 by %c1_i32_69 dim 0 : vector<256x4xf32>, i32 -> vector<256x4xf32>
    %cst_70 = arith.constant 0xFF800000 : f32
    %130 = vector.shape_cast %26 : vector<256x1xi1> to vector<256x1xi1>
    %131 = vector.broadcast %130 : vector<256x1xi1> to vector<256x4xi1>
    %132 = vector.broadcast %cst_70 : f32 to vector<256x4xf32>
    %133 = arith.select %131, %129, %132 : vector<256x4xi1>, vector<256x4xf32>
    %134 = arith.maximumf %128, %133 : vector<256x4xf32>
    %c255_i32_71 = arith.constant 255 : i32
    %135 = tpu.dynamic_rotate %128 by %c255_i32_71 dim 0 : vector<256x4xf32>, i32 -> vector<256x4xf32>
    %cst_72 = arith.constant 0xFF800000 : f32
    %136 = vector.shape_cast %31 : vector<256x1xi1> to vector<256x1xi1>
    %137 = vector.broadcast %136 : vector<256x1xi1> to vector<256x4xi1>
    %138 = vector.broadcast %cst_72 : f32 to vector<256x4xf32>
    %139 = arith.select %137, %135, %138 : vector<256x4xi1>, vector<256x4xf32>
    %140 = arith.maximumf %134, %139 : vector<256x4xf32>
    %c2_i32_73 = arith.constant 2 : i32
    %141 = tpu.dynamic_rotate %128 by %c2_i32_73 dim 0 : vector<256x4xf32>, i32 -> vector<256x4xf32>
    %cst_74 = arith.constant 0xFF800000 : f32
    %142 = vector.shape_cast %36 : vector<256x1xi1> to vector<256x1xi1>
    %143 = vector.broadcast %142 : vector<256x1xi1> to vector<256x4xi1>
    %144 = vector.broadcast %cst_74 : f32 to vector<256x4xf32>
    %145 = arith.select %143, %141, %144 : vector<256x4xi1>, vector<256x4xf32>
    %146 = arith.maximumf %140, %145 : vector<256x4xf32>
    %c254_i32_75 = arith.constant 254 : i32
    %147 = tpu.dynamic_rotate %128 by %c254_i32_75 dim 0 : vector<256x4xf32>, i32 -> vector<256x4xf32>
    %cst_76 = arith.constant 0xFF800000 : f32
    %148 = vector.shape_cast %41 : vector<256x1xi1> to vector<256x1xi1>
    %149 = vector.broadcast %148 : vector<256x1xi1> to vector<256x4xi1>
    %150 = vector.broadcast %cst_76 : f32 to vector<256x4xf32>
    %151 = arith.select %149, %147, %150 : vector<256x4xi1>, vector<256x4xf32>
    %152 = arith.maximumf %146, %151 : vector<256x4xf32>
    %153 = arith.truncf %152 : vector<256x4xf32> to vector<256x4xbf16>
    %c0_77 = arith.constant 0 : index
    %c12 = arith.constant 12 : index
    %154 = vector.load %arg8[%c0_77, %c12] : memref<256x16xbf16, #tpu.memory_space<vmem>>, vector<256x4xbf16>
    tpu.vector_store %arg8[%c0_77, %c12], %153 {strides = array<i32>} : memref<256x16xbf16, #tpu.memory_space<vmem>>, vector<256x4xbf16>,
    %c0_78 = arith.constant 0 : index
    %c0_79 = arith.constant 0 : index
    %155 = vector.load %arg8[%c0_78, %c0_79] : memref<256x16xbf16, #tpu.memory_space<vmem>>, vector<256x16xbf16>
    %c0_80 = arith.constant 0 : index
    %c0_81 = arith.constant 0 : index
    %156 = vector.load %arg4[%c0_80, %c0_81] : memref<16x8xbf16, #tpu.memory_space<vmem>>, vector<16x8xbf16>
    %cst_82 = arith.constant dense<0.000000e+00> : vector<256x8xf32>
    %157 = tpu.matmul %155, %156, %cst_82 {dimension_numbers = #tpu.dot_dimension_numbers<[1], [0], [0], [1], [0, 0, 1, 1], [], []>} : vector<256x16xbf16>, vector<16x8xbf16>, vector<256x8xf32> -> vector<256x8xf32>
    %c0_83 = arith.constant 0 : index
    %c0_84 = arith.constant 0 : index
    %158 = vector.load %arg5[%c0_83, %c0_84] : memref<1x8xf32, #tpu.memory_space<vmem>>, vector<1x8xf32>
    %159 = vector.broadcast %158 : vector<1x8xf32> to vector<256x8xf32>
    %160 = arith.addf %157, %159 : vector<256x8xf32>
    %cst_85 = arith.constant 0.000000e+00 : f32
    %161 = vector.broadcast %cst_85 : f32 to vector<256x8xf32>
    %162 = arith.subf %161, %160 : vector<256x8xf32>
    %163 = math.exp %162 : vector<256x8xf32>
    %cst_86 = arith.constant 1.000000e+00 : f32
    %164 = vector.broadcast %cst_86 : f32 to vector<256x8xf32>
    %165 = arith.addf %164, %163 : vector<256x8xf32>
    %166 = tpu.reciprocal %165 {approx = true} : vector<256x8xf32> -> vector<256x8xf32>
    %167 = arith.mulf %160, %166 : vector<256x8xf32>
    %168 = vector.shape_cast %167 : vector<256x8xf32> to vector<16x16x8xf32>
    %c0_87 = arith.constant 0 : index
    %c0_88 = arith.constant 0 : index
    %c0_89 = arith.constant 0 : index
    %c0_90 = arith.constant 0 : index
    %169 = vector.load %arg6[%c0_87, %c0_88, %c0_89, %c0_90] : memref<1x16x16x8xf32, #tpu.memory_space<vmem>>, vector<1x16x16x8xf32>
    %170 = vector.shape_cast %169 : vector<1x16x16x8xf32> to vector<16x16x8xf32>
    %171 = vector.shape_cast %168 : vector<16x16x8xf32> to vector<1x16x16x8xf32>
    tpu.vector_store %arg6[%c0_87, %c0_88, %c0_89, %c0_90], %171 {strides = array<i32>} : memref<1x16x16x8xf32, #tpu.memory_space<vmem>>, vector<1x16x16x8xf32>,
    return
  }
  func.func @transform_0(%arg0: i32) -> (i32, i32, i32, i32) {
    %c0_i32 = arith.constant 0 : i32
    %c0_i32_0 = arith.constant 0 : i32
    %c0_i32_1 = arith.constant 0 : i32
    %c0_i32_2 = arith.constant 0 : i32
    return %arg0, %c0_i32, %c0_i32_0, %c0_i32_1 : i32, i32, i32, i32
  }
  func.func @transform_1(%arg0: i32) -> (i32, i32) {
    %c0_i32 = arith.constant 0 : i32
    %c0_i32_0 = arith.constant 0 : i32
    %c0_i32_1 = arith.constant 0 : i32
    return %c0_i32, %c0_i32_0 : i32, i32
  }
  func.func @transform_2(%arg0: i32) -> (i32, i32) {
    %c0_i32 = arith.constant 0 : i32
    %c0_i32_0 = arith.constant 0 : i32
    %c0_i32_1 = arith.constant 0 : i32
    return %c0_i32, %c0_i32_0 : i32, i32
  }
  func.func @transform_3(%arg0: i32) -> (i32, i32) {
    %c0_i32 = arith.constant 0 : i32
    %c0_i32_0 = arith.constant 0 : i32
    %c0_i32_1 = arith.constant 0 : i32
    return %c0_i32, %c0_i32_0 : i32, i32
  }
  func.func @transform_4(%arg0: i32) -> (i32, i32) {
    %c0_i32 = arith.constant 0 : i32
    %c0_i32_0 = arith.constant 0 : i32
    %c0_i32_1 = arith.constant 0 : i32
    return %c0_i32, %c0_i32_0 : i32, i32
  }
  func.func @transform_5(%arg0: i32) -> (i32, i32, i32, i32) {
    %c0_i32 = arith.constant 0 : i32
    %c0_i32_0 = arith.constant 0 : i32
    %c0_i32_1 = arith.constant 0 : i32
    %c0_i32_2 = arith.constant 0 : i32
    return %arg0, %c0_i32, %c0_i32_0, %c0_i32_1 : i32, i32, i32, i32
  }
}

</mosaic_0001>

<bundles_post_ra>
// kernel: spp_forward.1
= control target key start
LH: loop header
LB: loop body
LE: loop exit
PB: predicated region body
PF: predicated region fallthrough
CT: control target
= control target key end

     0   :  { %s5429_s18 = smov 0   ;;  %s9746_s0 = inlined_call_operand.vmem [shape: bf16[2,16,16,8], index: 0, kind: input, shape index: {}]   ;;  %s9747_s1 = inlined_call_operand.vmem [shape: bf16[8,4], index: 1, kind: input, shape index: {}]   ;;  %s9748_s2 = inlined_call_operand.vmem [shape: f32[1,4], index: 2, kind: input, shape index: {}]   ;;  %s9749_s3 = inlined_call_operand.vmem [shape: bf16[16,8], index: 3, kind: input, shape index: {}]   ;;  %s9750_s4 = inlined_call_operand.vmem [shape: f32[1,8], index: 4, kind: input, shape index: {}]   ;;  %s9751_s5 = inlined_call_operand.vmem [shape: f32[2,16,16,8], index: 5, kind: output, shape index: {}]  }
   0x1 LB: > { %s4612_s19 = sadd.s32 4294967295, %s5392_s18   ;;  %p4616_p0 = scmp.ge.s32.totalorder %s5392_s18, 1  ;;  %s5392_s18 = sphi %s5429_s18, %s15_s18  }
   0x2   : > { %p187_p1 = scmp.lt.s32.totalorder %s5392_s18, 3 }
   0x4   : > { %p188_p2 = pnand %p4616_p0, %p187_p1 }
   0x6   : > { %191 = sbr.rel (%p188_p2) target bundleno = 1216 (0x4c0), region = 40 }
   0xb   : > { %v259_v0 = vld [vmem:[%s9747_s1] sm:$0xf]  ;;  %vm396_vm0 = vcmask 1043456   ;;  %p215_p3 = scmp.lt.s32.totalorder %s4612_s19, 1  ;;  %v922_v1 = vlaneseq  ;;  %v5394_v3 = vmov 0   ;;  %vm347_vm1 = vcmask 64512  }
   0xc   : > { %5058 = vmatprep.subr.msk.bf16.mxu0 %vm396_vm0, %v259_v0  ;;  %v398_v2 = vsel %vm396_vm0, %v259_v0, 0  ;;  %5073 = vset.pattern.permute.xlu1 %v5394_v3  ;;  %vm881_vm14 = vcmask 27648   ;;  %s5396_s28 = smov 4   ;;  %s5397_s29 = smov 8  }
   0xd   : > { %4991 = vmatpush3.bf16.msra.mxu0 %v398_v2  ;;  %s9976_s19 = smov (!%p215_p3, %s4612_s19), 1  ;;  %5072 = vset.pattern.permute.xlu0 %v5394_v3  ;;  %v5444_v4 = vshrl.u32 %v922_v1, 7  ;;  %s5398_s30 = smov 12  }
   0xe   : > { %s4826_s22 = sshll.u32 %s9976_s19, 7  ;;  %s4827_s10 = sshll.u32 %s9976_s19, 8 }
   0xf   : > { %v5448_v5 = vadd.s32 8, %v5444_v4  ;;  %v940_v6 = vrot.slane %v5444_v4, 1  ;;  %s5454_s25 = scalar_lea.vmem %s9746_s0, %s4826_s22  ;;  %vm927_vm2 = vcmp.lt.s32.totalorder %v5444_v4, 1  ;;  %vm942_vm3 = vcmp.lt.s32.totalorder %v5444_v4, 7  ;;  %s9553_s13 = scalar_lea.vmem %s9751_s5, %s4827_s10 }
  0x10   : > { %v925_v7 = vrot.slane %v5444_v4, 7  ;;  %v5074_v8 = vld [vmem:[%s5454_s25] sm:$0xff]   ;;  %v5075_v10 = vld [vmem:[%s5454_s25 + $0x8] sm:$0xff]   ;;  %v5076_v12 = vld [vmem:[%s5454_s25 + $0x10] sm:$0xff]   ;;  %v955_v21 = vrot.slane %v5444_v4, 6  ;;  %vm957_vm4 = vcmp.lt.s32.totalorder %v5444_v4, 2 }
  0x11   : > { %v941_v9 = vrot.slane %v5448_v5, 1  ;;  %v926_v11 = vrot.slane %v5448_v5, 7  ;;  %4992 = vmatprep.mubr.msk.bf16.mxu0 %vm347_vm1, %v5074_v8  ;;  %v956_v23 = vrot.slane %v5448_v5, 6  ;;  %v5077_v25 = vld [vmem:[%s5454_s25 + $0x18] sm:$0xff]   ;;  %v5078_v28 = vld [vmem:[%s5454_s25 + $0x20] sm:$0xff]   ;;  %vm972_vm8 = vcmp.lt.s32.totalorder %v5444_v4, 6 }
  0x12   : > { %4993 = vmatmul.mubr.msk.bf16.vlgmr.msra.gmra.mxu0 %vm347_vm1, %v5075_v10  ;;  %v5079_v40 = vld [vmem:[%s5454_s25 + $0x28] sm:$0xff]   ;;  %v5080_v41 = vld [vmem:[%s5454_s25 + $0x30] sm:$0xff]   ;;  %v970_v45 = vrot.slane %v5444_v4, 2  ;;  %v971_v46 = vrot.slane %v5448_v5, 2  ;;  %v5081_v57 = vld [vmem:[%s5454_s25 + $0x38] sm:$0xff]  }
  0x13   : > { %v943_v13 = vsel %vm942_vm3, %v940_v6, %v941_v9  ;;  %v944_v14 = vsel %vm942_vm3, %v941_v9, %v940_v6  ;;  %v929_v16 = vsel %vm927_vm2, %v926_v11, %v925_v7  ;;  %v928_v18 = vsel %vm927_vm2, %v925_v7, %v926_v11  ;;  %4996 = vmatprep.mubr.msk.bf16.mxu0 %vm347_vm1, %v5076_v12  ;;  %v5082_v58 = vld [vmem:[%s5454_s25 + $0x40] sm:$0xff]   ;;  %v5083_v63 = vld [vmem:[%s5454_s25 + $0x48] sm:$0xff]   ;;  %v5084_v0 = vld [vmem:[%s5454_s25 + $0x50] sm:$0xff]  }
  0x14   : > { %v945_v15 = vsub.s32 %v943_v13, %v5444_v4  ;;  %v946_v17 = vsub.s32 %v944_v14, %v5448_v5  ;;  %v930_v19 = vsub.s32 %v929_v16, %v5444_v4  ;;  %v931_v20 = vsub.s32 %v928_v18, %v5448_v5  ;;  %v5085_v1 = vld [vmem:[%s5454_s25 + $0x58] sm:$0xff]   ;;  %v5086_v2 = vld [vmem:[%s5454_s25 + $0x60] sm:$0xff]   ;;  %v5088_v6 = vld [vmem:[%s5454_s25 + $0x70] sm:$0xff]  }
  0x15   : > { %v958_v32 = vsel %vm957_vm4, %v955_v21, %v956_v23  ;;  %v959_v33 = vsel %vm957_vm4, %v956_v23, %v955_v21  ;;  %v974_v49 = vsel %vm972_vm8, %v971_v46, %v970_v45  ;;  %v973_v50 = vsel %vm972_vm8, %v970_v45, %v971_v46  ;;  %v5542_v8 = vld [vmem:[%s9748_s2] ss:$0 sm:$0xff] }
  0x16   : > { %v948_v22 = vsub.s32 0, %v945_v15  ;;  %v933_v24 = vsub.s32 0, %v930_v19  ;;  %v951_v27 = vsub.s32 0, %v946_v17  ;;  %v936_v30 = vsub.s32 0, %v931_v20 }
  0x17   : > { %v961_v37 = vsub.s32 %v958_v32, %v5448_v5  ;;  %v960_v38 = vsub.s32 %v959_v33, %v5444_v4  ;;  %v976_v51 = vsub.s32 %v974_v49, %v5448_v5  ;;  %v975_v52 = vsub.s32 %v973_v50, %v5444_v4  ;;  %v5087_v5 = vld [vmem:[%s5454_s25 + $0x68] sm:$0xff]  }
  0x18   : > { %v4688_v26 = vmin.u32 %v948_v22, %v945_v15  ;;  %v4686_v29 = vmin.u32 %v933_v24, %v930_v19  ;;  %v4689_v31 = vmin.u32 %v951_v27, %v946_v17  ;;  %v4687_v35 = vmin.u32 %v936_v30, %v931_v20 }
  0x19   : > { %v966_v43 = vsub.s32 0, %v961_v37  ;;  %v963_v44 = vsub.s32 0, %v960_v38  ;;  %v981_v55 = vsub.s32 0, %v976_v51  ;;  %v978_v56 = vsub.s32 0, %v975_v52 }
  0x1a   : > { %vm953_vm5 = vcmp.eq.s32.totalorder %v4688_v26, 1  ;;  %4997 = vmatmul.mubr.msk.bf16.gmra.mxu0 %vm347_vm1, %v5077_v25  ;;  %vm938_vm6 = vcmp.eq.s32.totalorder %v4686_v29, 1  ;;  %vm954_vm7 = vcmp.eq.s32.totalorder %v4689_v31, 1  ;;  %vm939_vm9 = vcmp.eq.s32.totalorder %v4687_v35, 1 }
  0x1b   : > { %v1419_v34 = vsel %vm953_vm5, 1, %v5394_v3  ;;  %5000 = vmatprep.mubr.msk.bf16.mxu0 %vm347_vm1, %v5078_v28  ;;  %v1281_v36 = vsel %vm938_vm6, 1, %v5394_v3  ;;  %v1420_v39 = vsel %vm954_vm7, 1, %v5394_v3  ;;  %v1282_v42 = vsel %vm939_vm9, 1, %v5394_v3 }
  0x1c   : > { %1422 = vperm.xlu1 %5073, %v1419_v34   ;;  %1284 = vperm.xlu0 %5072, %v1281_v36   ;;  %v4691_v47 = vmin.u32 %v966_v43, %v961_v37  ;;  %v4690_v48 = vmin.u32 %v963_v44, %v960_v38  ;;  %v4693_v59 = vmin.u32 %v981_v55, %v976_v51  ;;  %v5395_v7 = vmov 4286644096  }
  0x1d   : > { %v4692_v60 = vmin.u32 %v978_v56, %v975_v52  ;;  %918 = vst.msk [vmem:[#allocation2 + $0x90] sm:$0xf] %vm881_vm14, %v5395_v7  ;;  %919 = vst.msk [vmem:[#allocation2 + $0x94] sm:$0xf] %vm881_vm14, %v5395_v7 }
  0x1e   : > { %vm969_vm10 = vcmp.eq.s32.totalorder %v4691_v47, 2  ;;  %vm968_vm11 = vcmp.eq.s32.totalorder %v4690_v48, 2  ;;  %vm984_vm12 = vcmp.eq.s32.totalorder %v4693_v59, 2  ;;  %920 = vst.msk [vmem:[#allocation2 + $0x98] sm:$0xf] %vm881_vm14, %v5395_v7 }
  0x1f   : > { %v1558_v53 = vsel %vm969_vm10, 1, %v5394_v3  ;;  %v1557_v54 = vsel %vm968_vm11, 1, %v5394_v3  ;;  %vm983_vm13 = vcmp.eq.s32.totalorder %v4692_v60, 2  ;;  %v1696_v61 = vsel %vm984_vm12, 1, %v5394_v3  ;;  %914 = vst.msk [vmem:[#allocation2] sm:$0xf] %vm881_vm14, %v5395_v7 }
  0x20   : > { %1425 = vperm.xlu1 %5073, %v1420_v39   ;;  %1287 = vperm.xlu0 %5072, %v1282_v42   ;;  %v1695_v62 = vsel %vm983_vm13, 1, %v5394_v3  ;;  %v5089_v3 = vld [vmem:[%s5454_s25 + $0x78] sm:$0xff]   ;;  %915 = vst.msk [vmem:[#allocation2 + $0x4] sm:$0xf] %vm881_vm14, %v5395_v7  ;;  %916 = vst.msk [vmem:[#allocation2 + $0x8] sm:$0xf] %vm881_vm14, %v5395_v7 }
  0x21   : > { %917 = vst.msk [vmem:[#allocation2 + $0xc] sm:$0xf] %vm881_vm14, %v5395_v7  ;;  %921 = vst.msk [vmem:[#allocation2 + $0x9c] sm:$0xf] %vm881_vm14, %v5395_v7  ;;  %vm1961_vm12 = vcmask 60448   ;;  %vm2962_vm13 = vcmask 93248  }
  0x22   : > { %5001 = vmatmul.mubr.msk.bf16.gmra.mxu0 %vm347_vm1, %v5079_v40 }
  0x23   : > { %5004 = vmatprep.mubr.msk.bf16.mxu0 %vm347_vm1, %v5080_v41 }
  0x24   : > { %1563 = vperm.xlu1 %5073, %v1558_v53   ;;  %1560 = vperm.xlu0 %5072, %v1557_v54  }
  0x28   : > { %1701 = vperm.xlu1 %5073, %v1696_v61   ;;  %1698 = vperm.xlu0 %5072, %v1695_v62  }
  0x2a   : > { %5005 = vmatmul.mubr.msk.bf16.gmra.mxu0 %vm347_vm1, %v5081_v57 }
  0x2b   : > { %5008 = vmatprep.mubr.msk.bf16.mxu0 %vm347_vm1, %v5082_v58 }
  0x32   : > { %5009 = vmatmul.mubr.msk.bf16.gmra.mxu0 %vm347_vm1, %v5083_v63 }
  0x33   : > { %5012 = vmatprep.mubr.msk.bf16.mxu0 %vm347_vm1, %v5084_v0 }
  0x3a   : > { %5013 = vmatmul.mubr.msk.bf16.gmra.mxu0 %vm347_vm1, %v5085_v1 }
  0x3b   : > { %5016 = vmatprep.mubr.msk.bf16.mxu0 %vm347_vm1, %v5086_v2 }
  0x42   : > { %5017 = vmatmul.mubr.msk.bf16.gmra.mxu0 %vm347_vm1, %v5087_v5 }
  0x43   : > { %5020 = vmatprep.mubr.msk.bf16.mxu0 %vm347_vm1, %v5088_v6 }
  0x4a   : > { %5021 = vmatmul.mubr.msk.bf16.gmra.mxu0 %vm347_vm1, %v5089_v3 }
  0xd2   : > { %v4994_v9 = vpop.f32.mrf.mxu0 }
  0xd3   : > { %v5545_v10 = vadd.f32 %v4994_v9, %v5542_v8 }
  0xd4   : > { %v434_v11 = vpop.f32.mrf.mxu0 }
  0xd5   : > { %v563_v12 = vsub.f32 0.0, %v5545_v10  ;;  %v5549_v13 = vadd.f32 %v5542_v8, %v434_v11 }
  0xd6   : > { %v4995_v14 = vpop.f32.mrf.mxu0 }
  0xd7   : > { %v597_v15 = vmul.f32 1.442695, %v563_v12  ;;  %v561_v16 = vsub.f32 0.0, %v5549_v13  ;;  %v5553_v17 = vadd.f32 %v4995_v14, %v5542_v8 }
  0xd8   : > { %v437_v18 = vpop.f32.mrf.mxu0 }
  0xd9   : > { %5107 = vpow2.f32 %v597_v15  ;;  %v593_v19 = vmul.f32 1.442695, %v561_v16  ;;  %v564_v20 = vsub.f32 0.0, %v5553_v17  ;;  %v5557_v21 = vadd.f32 %v5542_v8, %v437_v18 }
  0xda   : > { %v4998_v22 = vpop.f32.mrf.mxu0 }
  0xdb   : > { %5109 = vpow2.f32 %v593_v19  ;;  %v599_v23 = vmul.f32 1.442695, %v564_v20  ;;  %v562_v24 = vsub.f32 0.0, %v5557_v21  ;;  %v5561_v25 = vadd.f32 %v4998_v22, %v5542_v8 }
  0xdc   : > { %v450_v26 = vpop.f32.mrf.mxu0 }
  0xdd   : > { %5111 = vpow2.f32 %v599_v23  ;;  %v595_v27 = vmul.f32 1.442695, %v562_v24  ;;  %v567_v28 = vsub.f32 0.0, %v5561_v25  ;;  %v5565_v29 = vadd.f32 %v5542_v8, %v450_v26 }
  0xde   : > { %v4999_v30 = vpop.f32.mrf.mxu0 }
  0xdf   : > { %5113 = vpow2.f32 %v595_v27  ;;  %v605_v31 = vmul.f32 1.442695, %v567_v28  ;;  %v565_v32 = vsub.f32 0.0, %v5565_v29  ;;  %v5569_v33 = vadd.f32 %v4999_v30, %v5542_v8 }
  0xe0   : > { %v453_v34 = vpop.f32.mrf.mxu0 }
  0xe1   : > { %5115 = vpow2.f32 %v605_v31  ;;  %v601_v35 = vmul.f32 1.442695, %v565_v32  ;;  %v568_v36 = vsub.f32 0.0, %v5569_v33  ;;  %v5573_v37 = vadd.f32 %v5542_v8, %v453_v34 }
  0xe2   : > { %v5002_v38 = vpop.f32.mrf.mxu0 }
  0xe3   : > { %5117 = vpow2.f32 %v601_v35  ;;  %v607_v39 = vmul.f32 1.442695, %v568_v36  ;;  %v566_v40 = vsub.f32 0.0, %v5573_v37  ;;  %v5577_v41 = vadd.f32 %v5002_v38, %v5542_v8  ;;  %v5611_v35 = vld [vmem:[#allocation2] sm:$0xf] }
  0xe4   : > { %v466_v42 = vpop.f32.mrf.mxu0 }
  0xe5   : > { %5119 = vpow2.f32 %v607_v39  ;;  %v603_v43 = vmul.f32 1.442695, %v566_v40  ;;  %v571_v44 = vsub.f32 0.0, %v5577_v41  ;;  %v5581_v45 = vadd.f32 %v5542_v8, %v466_v42  ;;  %v5616_v40 = vld [vmem:[#allocation2 + $0x8] sm:$0xf] }
  0xe6   : > { %v5108_v46 = vpop.eup %5107  ;;  %v5003_v47 = vpop.f32.mrf.mxu0 }
  0xe7   : > { %v659_v48 = vadd.f32 1.0, %v5108_v46  ;;  %5121 = vpow2.f32 %v603_v43  ;;  %v613_v49 = vmul.f32 1.442695, %v571_v44  ;;  %v569_v50 = vsub.f32 0.0, %v5581_v45 }
  0xe8   : > { %v5110_v51 = vpop.eup %5109  ;;  %v5585_v52 = vadd.f32 %v5003_v47, %v5542_v8  ;;  %v469_v53 = vpop.f32.mrf.mxu0 }
  0xe9   : > { %5123 = vrcp.f32 %v659_v48  ;;  %v657_v54 = vadd.f32 1.0, %v5110_v51  ;;  %v609_v55 = vmul.f32 1.442695, %v569_v50  ;;  %v5588_v56 = vadd.f32 %v5542_v8, %v469_v53  ;;  %v5624_v50 = vld [vmem:[#allocation2 + $0x4] sm:$0xf] }
  0xea   : > { %v5112_v57 = vpop.eup %5111  ;;  %5125 = vpow2.f32 %v613_v49  ;;  %v572_v58 = vsub.f32 0.0, %v5585_v52  ;;  %v5006_v59 = vpop.f32.mrf.mxu0  ;;  %v5626_v51 = vld [vmem:[#allocation2 + $0xc] sm:$0xf] }
  0xeb   : > { %5127 = vrcp.f32 %v657_v54  ;;  %v660_v60 = vadd.f32 1.0, %v5112_v57  ;;  %v570_v61 = vsub.f32 0.0, %v5588_v56  ;;  %v5593_v62 = vadd.f32 %v5006_v59, %v5542_v8 }
  0xec   : > { %v5114_v63 = vpop.eup %5113  ;;  %5129 = vpow2.f32 %v609_v55  ;;  %v615_v0 = vmul.f32 1.442695, %v572_v58  ;;  %v482_v1 = vpop.f32.mrf.mxu0  ;;  %v1051_v58 = vmax.bf16 %v5616_v40, %v5611_v35 }
  0xed   : > { %5131 = vrcp.f32 %v660_v60  ;;  %v658_v2 = vadd.f32 1.0, %v5114_v63  ;;  %v611_v5 = vmul.f32 1.442695, %v570_v61  ;;  %v575_v6 = vsub.f32 0.0, %v5593_v62 }
  0xee   : > { %v5116_v3 = vpop.eup %5115  ;;  %5133 = vpow2.f32 %v615_v0  ;;  %v5597_v7 = vadd.f32 %v5542_v8, %v482_v1  ;;  %v5007_v9 = vpop.f32.mrf.mxu0 }
  0xef   : > { %5135 = vrcp.f32 %v658_v2  ;;  %v663_v11 = vadd.f32 1.0, %v5116_v3  ;;  %v621_v12 = vmul.f32 1.442695, %v575_v6  ;;  %v5600_v14 = vadd.f32 %v5007_v9, %v5542_v8 }
  0xf0   : > { %v5118_v15 = vpop.eup %5117  ;;  %5137 = vpow2.f32 %v611_v5  ;;  %v573_v16 = vsub.f32 0.0, %v5597_v7  ;;  %v485_v18 = vpop.f32.mrf.mxu0  ;;  %v1052_v6 = vmax.bf16 %v5626_v51, %v5624_v50 }
  0xf1   : > { %5139 = vrcp.f32 %v663_v11  ;;  %v661_v19 = vadd.f32 1.0, %v5118_v15  ;;  %v576_v20 = vsub.f32 0.0, %v5600_v14  ;;  %v5605_v22 = vadd.f32 %v5542_v8, %v485_v18 }
  0xf2   : > { %v5120_v23 = vpop.eup %5119  ;;  %5141 = vpow2.f32 %v621_v12  ;;  %v617_v24 = vmul.f32 1.442695, %v573_v16  ;;  %v5010_v26 = vpop.f32.mrf.mxu0 }
  0xf3   : > { %5143 = vrcp.f32 %v661_v19  ;;  %v664_v27 = vadd.f32 1.0, %v5120_v23  ;;  %v623_v28 = vmul.f32 1.442695, %v576_v20  ;;  %v574_v30 = vsub.f32 0.0, %v5605_v22 }
  0xf4   : > { %v5122_v31 = vpop.eup %5121  ;;  %5145 = vpow2.f32 %v617_v24  ;;  %v5609_v32 = vadd.f32 %v5010_v26, %v5542_v8  ;;  %v498_v34 = vpop.f32.mrf.mxu0 }
  0xf5   : > { %5147 = vrcp.f32 %v664_v27  ;;  %v662_v36 = vadd.f32 1.0, %v5122_v31  ;;  %v619_v38 = vmul.f32 1.442695, %v574_v30  ;;  %v5614_v39 = vadd.f32 %v5542_v8, %v498_v34 }
  0xf6   : > { %v5124_v42 = vpop.eup %5123  ;;  %5149 = vpow2.f32 %v623_v28  ;;  %v579_v43 = vsub.f32 0.0, %v5609_v32  ;;  %v5011_v44 = vpop.f32.mrf.mxu0 }
  0xf7   : > { %v5126_v46 = vpop.eup %5125  ;;  %v723_v47 = vmul.f32 %v5124_v42, %v5545_v10  ;;  %5151 = vrcp.f32 %v662_v36  ;;  %v577_v48 = vsub.f32 0.0, %v5614_v39  ;;  %v5622_v49 = vadd.f32 %v5011_v44, %v5542_v8 }
  0xf8   : > { %v5128_v53 = vpop.eup %5127  ;;  %v667_v54 = vadd.f32 1.0, %v5126_v46  ;;  %5153 = vpow2.f32 %v619_v38  ;;  %v629_v55 = vmul.f32 1.442695, %v579_v43  ;;  %v501_v57 = vpop.f32.mrf.mxu0 }
  0xf9   : > { %v5130_v59 = vpop.eup %5129  ;;  %v4830_v10 = vpack.c.bf16 %v723_v47, %v723_v47  ;;  %v721_v60 = vmul.f32 %v5128_v53, %v5549_v13  ;;  %v625_v61 = vmul.f32 1.442695, %v577_v48  ;;  %v580_v63 = vsub.f32 0.0, %v5622_v49 }
  0xfa   : > { %v5132_v0 = vpop.eup %5131  ;;  %5155 = vrcp.f32 %v667_v54  ;;  %v665_v1 = vadd.f32 1.0, %v5130_v59  ;;  %v5633_v2 = vadd.f32 %v5542_v8, %v501_v57  ;;  %v5014_v5 = vpop.f32.mrf.mxu0 }
  0xfb   : > { %v5134_v3 = vpop.eup %5133  ;;  %987 = vst.msk [vmem:[#allocation2 + $0x18] sm:$0xf] %vm881_vm14, %v4830_v10  ;;  %884 = vst.msk [vmem:[#allocation3 + $0x8] sm:$0xf] %vm881_vm14, %v4830_v10  ;;  %v4828_v9 = vpack.c.bf16 %v721_v60, %v721_v60  ;;  %v724_v13 = vmul.f32 %v5132_v0, %v5553_v17  ;;  %5157 = vpow2.f32 %v629_v55  ;;  %v631_v11 = vmul.f32 1.442695, %v580_v63 }
  0xfc   : > { %v5136_v12 = vpop.eup %5135  ;;  %5159 = vrcp.f32 %v665_v1  ;;  %v668_v15 = vadd.f32 1.0, %v5134_v3  ;;  %v578_v16 = vsub.f32 0.0, %v5633_v2  ;;  %v5642_v18 = vadd.f32 %v5014_v5, %v5542_v8  ;;  %v514_v19 = vpop.f32.mrf.mxu0 }
  0xfd   : > { %v5138_v20 = vpop.eup %5137  ;;  %985 = vst.msk [vmem:[#allocation2 + $0x10] sm:$0xf] %vm881_vm14, %v4828_v9  ;;  %882 = vst.msk [vmem:[#allocation3] sm:$0xf] %vm881_vm14, %v4828_v9  ;;  %v4831_v23 = vpack.c.bf16 %v724_v13, %v724_v13  ;;  %v722_v24 = vmul.f32 %v5136_v12, %v5557_v21  ;;  %5161 = vpow2.f32 %v625_v61  ;;  %v5648_v17 = vadd.f32 %v5542_v8, %v514_v19 }
  0xfe   : > { %v5140_v26 = vpop.eup %5139  ;;  %5163 = vrcp.f32 %v668_v15  ;;  %v666_v27 = vadd.f32 1.0, %v5138_v20  ;;  %v627_v28 = vmul.f32 1.442695, %v578_v16  ;;  %v583_v30 = vsub.f32 0.0, %v5642_v18  ;;  %v5015_v31 = vpop.f32.mrf.mxu0 }
  0xff   : > { %v5142_v34 = vpop.eup %5141  ;;  %988 = vst.msk [vmem:[#allocation2 + $0x1c] sm:$0xf] %vm881_vm14, %v4831_v23  ;;  %885 = vst.msk [vmem:[#allocation3 + $0xc] sm:$0xf] %vm881_vm14, %v4831_v23  ;;  %v4829_v36 = vpack.c.bf16 %v722_v24, %v722_v24  ;;  %v727_v38 = vmul.f32 %v5140_v26, %v5561_v25  ;;  %5165 = vpow2.f32 %v631_v11  ;;  %v581_v21 = vsub.f32 0.0, %v5648_v17 }
 0x100   : > { %v5144_v42 = vpop.eup %5143  ;;  %5167 = vrcp.f32 %v666_v27  ;;  %v671_v43 = vadd.f32 1.0, %v5142_v34  ;;  %v637_v44 = vmul.f32 1.442695, %v583_v30  ;;  %v5656_v46 = vadd.f32 %v5015_v31, %v5542_v8  ;;  %v517_v47 = vpop.f32.mrf.mxu0 }
 0x101   : > { %v5146_v48 = vpop.eup %5145  ;;  %986 = vst.msk [vmem:[#allocation2 + $0x14] sm:$0xf] %vm881_vm14, %v4829_v36  ;;  %883 = vst.msk [vmem:[#allocation3 + $0x4] sm:$0xf] %vm881_vm14, %v4829_v36  ;;  %v4834_v53 = vpack.c.bf16 %v727_v38, %v727_v38  ;;  %v725_v54 = vmul.f32 %v5144_v42, %v5565_v29  ;;  %5169 = vpow2.f32 %v627_v28  ;;  %v633_v25 = vmul.f32 1.442695, %v581_v21 }
 0x102   : > { %v5148_v55 = vpop.eup %5147  ;;  %5171 = vrcp.f32 %v671_v43  ;;  %v669_v57 = vadd.f32 1.0, %v5146_v48  ;;  %v584_v59 = vsub.f32 0.0, %v5656_v46  ;;  %v5663_v10 = vadd.f32 %v5542_v8, %v517_v47  ;;  %v5018_v60 = vpop.f32.mrf.mxu0 }
 0x103   : > { %v5150_v61 = vpop.eup %5149  ;;  %991 = vst.msk [vmem:[#allocation2 + $0x28] sm:$0xf] %vm881_vm14, %v4834_v53  ;;  %888 = vst.msk [vmem:[#allocation3 + $0x18] sm:$0xf] %vm881_vm14, %v4834_v53  ;;  %v4832_v63 = vpack.c.bf16 %v725_v54, %v725_v54  ;;  %v728_v0 = vmul.f32 %v5148_v55, %v5569_v33  ;;  %5173 = vpow2.f32 %v637_v44  ;;  %v5669_v29 = vadd.f32 %v5018_v60, %v5542_v8  ;;  %v5697_v54 = vpop.permute.xlu1 %1422 }
 0x104   : > { %v5152_v1 = vpop.eup %5151  ;;  %5175 = vrcp.f32 %v669_v57  ;;  %v672_v5 = vadd.f32 1.0, %v5150_v61  ;;  %v639_v3 = vmul.f32 1.442695, %v584_v59  ;;  %v582_v9 = vsub.f32 0.0, %v5663_v10  ;;  %v530_v13 = vpop.f32.mrf.mxu0  ;;  %v5676_v16 = vld [vmem:[#allocation2 + $0x10] sm:$0xf] }
 0x105   : > { %v5154_v11 = vpop.eup %5153  ;;  %989 = vst.msk [vmem:[#allocation2 + $0x20] sm:$0xf] %vm881_vm14, %v4832_v63  ;;  %886 = vst.msk [vmem:[#allocation3 + $0x10] sm:$0xf] %vm881_vm14, %v4832_v63  ;;  %v4835_v12 = vpack.c.bf16 %v728_v0, %v728_v0  ;;  %v726_v15 = vmul.f32 %v5152_v1, %v5573_v37  ;;  %5177 = vpow2.f32 %v633_v25  ;;  %v587_v33 = vsub.f32 0.0, %v5669_v29 }
 0x106   : > { %5179 = vrcp.f32 %v672_v5  ;;  %v670_v19 = vadd.f32 1.0, %v5154_v11  ;;  %v635_v20 = vmul.f32 1.442695, %v582_v9  ;;  %v5679_v23 = vadd.f32 %v5542_v8, %v530_v13  ;;  %v5019_v24 = vpop.f32.mrf.mxu0 }
 0x107   : > { %v5156_v26 = vpop.eup %5155  ;;  %992 = vst.msk [vmem:[#allocation2 + $0x2c] sm:$0xf] %vm881_vm14, %v4835_v12  ;;  %889 = vst.msk [vmem:[#allocation3 + $0x1c] sm:$0xf] %vm881_vm14, %v4835_v12  ;;  %v4833_v27 = vpack.c.bf16 %v726_v15, %v726_v15  ;;  %5181 = vpow2.f32 %v639_v3  ;;  %v645_v37 = vmul.f32 1.442695, %v587_v33  ;;  %v5684_v28 = vadd.f32 %v5019_v24, %v5542_v8  ;;  %v5713_v24 = vpop.permute.xlu0 %1284 }
 0x108   : > { %v5158_v30 = vpop.eup %5157  ;;  %v731_v31 = vmul.f32 %v5156_v26, %v5577_v41  ;;  %5183 = vrcp.f32 %v670_v19  ;;  %v585_v34 = vsub.f32 0.0, %v5679_v23  ;;  %v533_v36 = vpop.f32.mrf.mxu0  ;;  %v1053_v38 = vmax.bf16 %v5676_v16, %v5616_v40 }
 0x109   : > { %v5160_v21 = vpop.eup %5159  ;;  %990 = vst.msk [vmem:[#allocation2 + $0x24] sm:$0xf] %vm881_vm14, %v4833_v27  ;;  %887 = vst.msk [vmem:[#allocation3 + $0x14] sm:$0xf] %vm881_vm14, %v4833_v27  ;;  %v675_v42 = vadd.f32 1.0, %v5158_v30  ;;  %5185 = vpow2.f32 %v635_v20  ;;  %v588_v43 = vsub.f32 0.0, %v5684_v28  ;;  %v5694_v44 = vadd.f32 %v5542_v8, %v533_v36 }
 0x10a   : > { %v5162_v41 = vpop.eup %5161  ;;  %v4838_v47 = vpack.c.bf16 %v731_v31, %v731_v31  ;;  %v729_v48 = vmul.f32 %v5160_v21, %v5581_v45  ;;  %5187 = vpow2.f32 %v645_v37  ;;  %v641_v53 = vmul.f32 1.442695, %v585_v34  ;;  %v5022_v25 = vpop.f32.mrf.mxu0  ;;  %v1022_v21 = vld [vmem:[#allocation2 + $0x14] sm:$0xf] }
 0x10b   : > { %v5164_v55 = vpop.eup %5163  ;;  %5189 = vrcp.f32 %v675_v42  ;;  %v673_v57 = vadd.f32 1.0, %v5162_v41  ;;  %v647_v59 = vmul.f32 1.442695, %v588_v43  ;;  %v586_v60 = vsub.f32 0.0, %v5694_v44  ;;  %v5722_v31 = vpop.permute.xlu1 %1425 }
 0x10c   : > { %v5166_v61 = vpop.eup %5165  ;;  %995 = vst.msk [vmem:[#allocation2 + $0x38] sm:$0xf] %vm881_vm14, %v4838_v47  ;;  %892 = vst.msk [vmem:[#allocation3 + $0x28] sm:$0xf] %vm881_vm14, %v4838_v47  ;;  %v4836_v63 = vpack.c.bf16 %v729_v48, %v729_v48  ;;  %v732_v0 = vmul.f32 %v5164_v55, %v5585_v52  ;;  %5191 = vpow2.f32 %v641_v53  ;;  %v5704_v45 = vadd.f32 %v5022_v25, %v5542_v8  ;;  %v546_v1 = vpop.f32.mrf.mxu0 }
 0x10d   : > { %v5168_v5 = vpop.eup %5167  ;;  %5193 = vrcp.f32 %v673_v57  ;;  %v676_v3 = vadd.f32 1.0, %v5166_v61  ;;  %v643_v9 = vmul.f32 1.442695, %v586_v60  ;;  %v5707_v13 = vadd.f32 %v5542_v8, %v546_v1  ;;  %v5736_v1 = vld [vmem:[#allocation2 + $0x1c] sm:$0xf] }
 0x10e   : > { %v5170_v11 = vpop.eup %5169  ;;  %993 = vst.msk [vmem:[#allocation2 + $0x30] sm:$0xf] %vm881_vm14, %v4836_v63  ;;  %890 = vst.msk [vmem:[#allocation3 + $0x20] sm:$0xf] %vm881_vm14, %v4836_v63  ;;  %v4839_v12 = vpack.c.bf16 %v732_v0, %v732_v0  ;;  %v730_v52 = vmul.f32 %v5168_v5, %v5588_v56  ;;  %5195 = vpow2.f32 %v647_v59  ;;  %v591_v15 = vsub.f32 0.0, %v5704_v45  ;;  %v5023_v33 = vpop.f32.mrf.mxu0 }
 0x10f   : > { %v5172_v19 = vpop.eup %5171  ;;  %5197 = vrcp.f32 %v676_v3  ;;  %v674_v20 = vadd.f32 1.0, %v5170_v11  ;;  %v589_v26 = vsub.f32 0.0, %v5707_v13  ;;  %v5717_v27 = vadd.f32 %v5023_v33, %v5542_v8 }
 0x110   : > { %v5174_v37 = vpop.eup %5173  ;;  %996 = vst.msk [vmem:[#allocation2 + $0x3c] sm:$0xf] %vm881_vm14, %v4839_v12  ;;  %893 = vst.msk [vmem:[#allocation3 + $0x2c] sm:$0xf] %vm881_vm14, %v4839_v12  ;;  %v4837_v56 = vpack.c.bf16 %v730_v52, %v730_v52  ;;  %v735_v30 = vmul.f32 %v5172_v19, %v5593_v62  ;;  %5199 = vpow2.f32 %v643_v9  ;;  %v653_v34 = vmul.f32 1.442695, %v591_v15  ;;  %v549_v36 = vpop.f32.mrf.mxu0 }
 0x111   : > { %v5176_v42 = vpop.eup %5175  ;;  %5201 = vrcp.f32 %v674_v20  ;;  %v679_v43 = vadd.f32 1.0, %v5174_v37  ;;  %v649_v41 = vmul.f32 1.442695, %v589_v26  ;;  %v592_v47 = vsub.f32 0.0, %v5717_v27  ;;  %v5746_v52 = vpop.permute.xlu0 %1287  ;;  %v5750_v19 = vld [vmem:[#allocation2 + $0x18] sm:$0xf] }
 0x112   : > { %v5178_v48 = vpop.eup %5177  ;;  %994 = vst.msk [vmem:[#allocation2 + $0x34] sm:$0xf] %vm881_vm14, %v4837_v56  ;;  %891 = vst.msk [vmem:[#allocation3 + $0x24] sm:$0xf] %vm881_vm14, %v4837_v56  ;;  %v4842_v53 = vpack.c.bf16 %v735_v30, %v735_v30  ;;  %v733_v62 = vmul.f32 %v5176_v42, %v5597_v7  ;;  %5203 = vpow2.f32 %v653_v34  ;;  %v5729_v25 = vadd.f32 %v5542_v8, %v549_v36  ;;  %v5748_v15 = vpop.permute.xlu1 %1563  ;;  %v5752_v20 = vld [vmem:[#allocation2 + $0x24] sm:$0xf] }
 0x113   : > { %v5180_v55 = vpop.eup %5179  ;;  %5205 = vrcp.f32 %v679_v43  ;;  %v677_v57 = vadd.f32 1.0, %v5178_v48  ;;  %v655_v59 = vmul.f32 1.442695, %v592_v47  ;;  %v1054_v60 = vmax.bf16 %v1022_v21, %v5626_v51  ;;  %v5778_v48 = vld [vmem:[#allocation2 + $0x28] sm:$0xf] }
 0x114   : > { %v5182_v61 = vpop.eup %5181  ;;  %999 = vst.msk [vmem:[#allocation2 + $0x48] sm:$0xf] %vm881_vm14, %v4842_v53  ;;  %896 = vst.msk [vmem:[#allocation3 + $0x38] sm:$0xf] %vm881_vm14, %v4842_v53  ;;  %v4840_v63 = vpack.c.bf16 %v733_v62, %v733_v62  ;;  %v736_v0 = vmul.f32 %v5180_v55, %v5600_v14  ;;  %5207 = vpow2.f32 %v649_v41  ;;  %v590_v7 = vsub.f32 0.0, %v5729_v25 }
 0x115   : > { %v5184_v8 = vpop.eup %5183  ;;  %5209 = vrcp.f32 %v677_v57  ;;  %v680_v5 = vadd.f32 1.0, %v5182_v61  ;;  %v1056_v3 = vmax.bf16 %v5736_v1, %v1022_v21  ;;  %v1085_v9 = vmax.bf16 %v1051_v58, %v5676_v16  ;;  %v5754_v58 = vld [vmem:[#allocation2 + $0x20] sm:$0xf] }
 0x116   : > { %v5186_v11 = vpop.eup %5185  ;;  %997 = vst.msk [vmem:[#allocation2 + $0x40] sm:$0xf] %vm881_vm14, %v4840_v63  ;;  %894 = vst.msk [vmem:[#allocation3 + $0x30] sm:$0xf] %vm881_vm14, %v4840_v63  ;;  %v4843_v14 = vpack.c.bf16 %v736_v0, %v736_v0  ;;  %v734_v12 = vmul.f32 %v5184_v8, %v5605_v22  ;;  %5211 = vpow2.f32 %v655_v59  ;;  %v651_v33 = vmul.f32 1.442695, %v590_v7  ;;  %v5782_v59 = vpop.permute.xlu0 %1560 }
 0x117   : > { %v5188_v35 = vpop.eup %5187  ;;  %5213 = vrcp.f32 %v680_v5  ;;  %v678_v26 = vadd.f32 1.0, %v5186_v11  ;;  %v1086_v37 = vmax.bf16 %v1052_v6, %v1022_v21  ;;  %v1087_v22 = vmax.bf16 %v1053_v38, %v5750_v19 }
 0x118   : > { %v5190_v56 = vpop.eup %5189  ;;  %1000 = vst.msk [vmem:[#allocation2 + $0x4c] sm:$0xf] %vm881_vm14, %v4843_v14  ;;  %897 = vst.msk [vmem:[#allocation3 + $0x3c] sm:$0xf] %vm881_vm14, %v4843_v14  ;;  %v4841_v30 = vpack.c.bf16 %v734_v12, %v734_v12  ;;  %v683_v34 = vadd.f32 1.0, %v5188_v35  ;;  %5215 = vpow2.f32 %v651_v33  ;;  %v1088_v36 = vmax.bf16 %v1054_v60, %v5736_v1  ;;  %v5784_v60 = vpop.permute.xlu1 %1701 }
 0x119   : > { %v5192_v42 = vpop.eup %5191  ;;  %v739_v43 = vmul.f32 %v5190_v56, %v5609_v32  ;;  %5217 = vrcp.f32 %v678_v26  ;;  %v5768_v50 = vmax.bf16 %v1056_v3, %v5752_v20  ;;  %v1119_v40 = vmax.bf16 %v1085_v9, %v5750_v19 }
 0x11a   : > { %v5194_v51 = vpop.eup %5193  ;;  %998 = vst.msk [vmem:[#allocation2 + $0x44] sm:$0xf] %vm881_vm14, %v4841_v30  ;;  %895 = vst.msk [vmem:[#allocation3 + $0x34] sm:$0xf] %vm881_vm14, %v4841_v30  ;;  %5219 = vrcp.f32 %v683_v34  ;;  %v681_v6 = vadd.f32 1.0, %v5192_v42  ;;  %vm1290_vm15 = vcmp.eq.s32.totalorder %v5746_v52, 1  ;;  %v1120_v38 = vmax.bf16 %v1086_v37, %v5736_v1 }
 0x11b   : > { %v1121_v21 = vmax.bf16 %v1087_v22, %v5754_v58  ;;  %v5196_v32 = vpop.eup %5195  ;;  %v4846_v41 = vpack.c.bf16 %v739_v43, %v739_v43  ;;  %v737_v47 = vmul.f32 %v5194_v51, %v5614_v39  ;;  %vm1428_vm0 = vcmp.eq.s32.totalorder %v5722_v31, 1  ;;  %v5788_v39 = vld [vmem:[#allocation2 + $0x2c] sm:$0xf] }
 0x11c   : > { %v1153_v53 = vmax.bf16 %v1119_v40, %v5754_v58  ;;  %v1122_v62 = vmax.bf16 %v1088_v36, %v5752_v20  ;;  %v5198_v55 = vpop.eup %5197  ;;  %5221 = vrcp.f32 %v681_v6  ;;  %v684_v57 = vadd.f32 1.0, %v5196_v32 }
 0x11d   : > { %v1154_v61 = vmax.bf16 %v1120_v38, %v5752_v20  ;;  %v1155_v63 = vmax.bf16 %v1121_v21, %v5778_v48  ;;  %v5200_v0 = vpop.eup %5199  ;;  %1003 = vst.msk [vmem:[#allocation2 + $0x58] sm:$0xf] %vm881_vm14, %v4846_v41  ;;  %900 = vst.msk [vmem:[#allocation3 + $0x48] sm:$0xf] %vm881_vm14, %v4846_v41  ;;  %v4844_v7 = vpack.c.bf16 %v737_v47, %v737_v47  ;;  %vm1566_vm5 = vcmp.eq.s32.totalorder %v5748_v15, 1  ;;  %v5816_v38 = vpop.permute.xlu0 %1698 }
 0x11e   : > { %v740_v8 = vmul.f32 %v5198_v55, %v5622_v49  ;;  %v5794_v5 = vunpack.c.l.bf16 %v1153_v53  ;;  %v5797_v3 = vmax.bf16 %v1122_v62, %v5788_v39  ;;  %v5202_v9 = vpop.eup %5201  ;;  %5223 = vrcp.f32 %v684_v57 }
 0x11f   : > { %v682_v11 = vadd.f32 1.0, %v5200_v0  ;;  %v5799_v14 = vunpack.c.l.bf16 %v1154_v61  ;;  %v5801_v12 = vunpack.c.l.bf16 %v1155_v63  ;;  %v5204_v33 = vpop.eup %5203  ;;  %1001 = vst.msk [vmem:[#allocation2 + $0x50] sm:$0xf] %vm881_vm14, %v4844_v7  ;;  %898 = vst.msk [vmem:[#allocation3 + $0x40] sm:$0xf] %vm881_vm14, %v4844_v7  ;;  %v738_v35 = vmul.f32 %v5202_v9, %v5633_v2 }
 0x120   : > { %v4847_v49 = vpack.c.bf16 %v740_v8, %v740_v8  ;;  %vm1704_vm6 = vcmp.eq.s32.totalorder %v5784_v60, 1  ;;  %v9761_v26 = vrot.slane %v5794_v5, 7  ;;  %v9754_v37 = vrot.slane %v5794_v5, 6  ;;  %v5206_v22 = vpop.eup %5205 }
 0x121   : > { %5225 = vrcp.f32 %v682_v11  ;;  %v687_v56 = vadd.f32 1.0, %v5204_v33  ;;  %v1218_v30 = vrot.slane %v5799_v14, 7  ;;  %v9759_v34 = vrot.slane %v5799_v14, 1  ;;  %v5208_v36 = vpop.eup %5207 }
 0x122   : > { %1004 = vst.msk [vmem:[#allocation2 + $0x5c] sm:$0xf] %vm881_vm14, %v4847_v49  ;;  %901 = vst.msk [vmem:[#allocation3 + $0x4c] sm:$0xf] %vm881_vm14, %v4847_v49  ;;  %v4845_v42 = vpack.c.bf16 %v738_v35, %v738_v35  ;;  %v743_v2 = vmul.f32 %v5206_v22, %v5642_v18  ;;  %v1357_v43 = vrot.slane %v5801_v12, 1  ;;  %v1494_v40 = vrot.slane %v5799_v14, 6  ;;  %v5210_v51 = vpop.eup %5209 }
 0x123   : > { %5227 = vrcp.f32 %v687_v56  ;;  %v685_v6 = vadd.f32 1.0, %v5208_v36  ;;  %v1279_v21 = vsel %vm927_vm2, %v9761_v26, %v1218_v30  ;;  %v9753_v32 = vrot.slane %v5799_v14, 2  ;;  %v5212_v41 = vpop.eup %5211 }
 0x124   : > { %1002 = vst.msk [vmem:[#allocation2 + $0x54] sm:$0xf] %vm881_vm14, %v4845_v42  ;;  %899 = vst.msk [vmem:[#allocation3 + $0x44] sm:$0xf] %vm881_vm14, %v4845_v42  ;;  %v4850_v18 = vpack.c.bf16 %v743_v2, %v743_v2  ;;  %v741_v47 = vmul.f32 %v5210_v51, %v5648_v17  ;;  %vm1289_vm7 = vcmp.eq.s32.totalorder %v5713_v24, 1  ;;  %v1292_v53 = vsel %vm1290_vm15, %v1279_v21, -inf  ;;  %v5214_v55 = vpop.eup %5213 }
 0x125   : > { %v1416_v62 = vsel %vm942_vm3, %v9759_v34, %v1357_v43  ;;  %vm1427_vm9 = vcmp.eq.s32.totalorder %v5697_v54, 1  ;;  %5229 = vrcp.f32 %v685_v6  ;;  %vm1565_vm10 = vcmp.eq.s32.totalorder %v5782_v59, 1  ;;  %v5216_v63 = vpop.eup %5215 }
 0x126   : > { %v688_v57 = vadd.f32 1.0, %v5212_v41  ;;  %v1324_v17 = vmax.f32 %v5799_v14, %v1292_v53  ;;  %v1430_v61 = vsel %vm1428_vm0, %v1416_v62, -inf  ;;  %1007 = vst.msk [vmem:[#allocation2 + $0x68] sm:$0xf] %vm881_vm14, %v4850_v18  ;;  %904 = vst.msk [vmem:[#allocation3 + $0x58] sm:$0xf] %vm881_vm14, %v4850_v18  ;;  %v4848_v0 = vpack.c.bf16 %v741_v47, %v741_v47  ;;  %v5218_v11 = vpop.eup %5217 }
 0x127   : > { %v744_v7 = vmul.f32 %v5214_v55, %v5656_v46  ;;  %vm1703_vm11 = vcmp.eq.s32.totalorder %v5816_v38, 1  ;;  %v1555_v8 = vsel %vm957_vm4, %v9754_v37, %v1494_v40  ;;  %v1633_v9 = vrot.slane %v5801_v12, 2  ;;  %v5220_v22 = vpop.eup %5219 }
 0x128   : > { %5231 = vrcp.f32 %v688_v57  ;;  %v686_v33 = vadd.f32 1.0, %v5216_v63  ;;  %v1462_v49 = vmax.f32 %v1324_v17, %v1430_v61  ;;  %v1568_v35 = vsel %vm1566_vm5, %v1555_v8, -inf  ;;  %1005 = vst.msk [vmem:[#allocation2 + $0x60] sm:$0xf] %vm881_vm14, %v4848_v0  ;;  %902 = vst.msk [vmem:[#allocation3 + $0x50] sm:$0xf] %vm881_vm14, %v4848_v0 }
 0x129   : > { %v4851_v46 = vpack.c.bf16 %v744_v7, %v744_v7  ;;  %v742_v56 = vmul.f32 %v5218_v11, %v5663_v10  ;;  %v1692_v36 = vsel %vm972_vm8, %v9753_v32, %v1633_v9  ;;  %v5863_v42 = vunpack.c.l.bf16 %v5797_v3  ;;  %v5222_v21 = vpop.eup %5221 }
 0x12a   : > { %v747_v2 = vmul.f32 %v5220_v22, %v5669_v29  ;;  %5233 = vrcp.f32 %v686_v33  ;;  %v1600_v51 = vmax.f32 %v1462_v49, %v1568_v35  ;;  %v1706_v6 = vsel %vm1704_vm6, %v1692_v36, -inf  ;;  %v5915_v35 = vld [vmem:[#allocation2 + $0x34] sm:$0xf] }
 0x12b   : > { %1008 = vst.msk [vmem:[#allocation2 + $0x6c] sm:$0xf] %vm881_vm14, %v4851_v46  ;;  %905 = vst.msk [vmem:[#allocation3 + $0x5c] sm:$0xf] %vm881_vm14, %v4851_v46  ;;  %v4849_v10 = vpack.c.bf16 %v742_v56, %v742_v56  ;;  %v1219_v41 = vrot.slane %v5801_v12, 7  ;;  %v1358_v18 = vrot.slane %v5863_v42, 1  ;;  %v745_v29 = vmul.f32 %v5222_v21, %v5679_v23  ;;  %v5224_v55 = vpop.eup %5223 }
 0x12c   : > { %v1495_v3 = vrot.slane %v5801_v12, 6  ;;  %v4854_v47 = vpack.c.bf16 %v747_v2, %v747_v2  ;;  %v1738_v53 = vmax.f32 %v1600_v51, %v1706_v6  ;;  %v1634_v62 = vrot.slane %v5863_v42, 2  ;;  %v5917_v46 = vld [vmem:[#allocation2 + $0x30] sm:$0xf] }
 0x12d   : > { %1006 = vst.msk [vmem:[#allocation2 + $0x64] sm:$0xf] %vm881_vm14, %v4849_v10  ;;  %903 = vst.msk [vmem:[#allocation3 + $0x54] sm:$0xf] %vm881_vm14, %v4849_v10  ;;  %v1278_v57 = vsel %vm927_vm2, %v1218_v30, %v1219_v41  ;;  %v1415_v23 = vsel %vm942_vm3, %v1357_v43, %v1358_v18  ;;  %v1055_v61 = vmax.bf16 %v5750_v19, %v5676_v16  ;;  %v1220_v56 = vrot.slane %v5863_v42, 7 }
 0x12e   : > { %v1554_v17 = vsel %vm957_vm4, %v1494_v40, %v1495_v3  ;;  %1011 = vst.msk [vmem:[#allocation2 + $0x78] sm:$0xf] %vm881_vm14, %v4854_v47  ;;  %908 = vst.msk [vmem:[#allocation3 + $0x68] sm:$0xf] %vm881_vm14, %v4854_v47  ;;  %v4852_v30 = vpack.c.bf16 %v745_v29, %v745_v29  ;;  %v748_v63 = vmul.f32 %v5224_v55, %v5684_v28  ;;  %v1293_v7 = vsel %vm1289_vm7, %v1278_v57, -inf  ;;  %v5226_v43 = vpop.eup %5225 }
 0x12f   : > { %v4861_v0 = vpack.c.bf16 %v1738_v53, %v1738_v53  ;;  %v1325_v8 = vmax.f32 %v5801_v12, %v1293_v7  ;;  %v1431_v40 = vsel %vm1427_vm9, %v1415_v23, -inf  ;;  %v1569_v16 = vsel %vm1565_vm10, %v1554_v17, -inf }
 0x130   : > { %v1691_v11 = vsel %vm972_vm8, %v1633_v9, %v1634_v62  ;;  %1009 = vst.msk [vmem:[#allocation2 + $0x70] sm:$0xf] %vm881_vm14, %v4852_v30  ;;  %906 = vst.msk [vmem:[#allocation3 + $0x60] sm:$0xf] %vm881_vm14, %v4852_v30  ;;  %v4855_v28 = vpack.c.bf16 %v748_v63, %v748_v63  ;;  %v746_v33 = vmul.f32 %v5226_v43, %v5694_v44  ;;  %v5228_v9 = vpop.eup %5227  ;;  %v1496_v44 = vrot.slane %v5863_v42, 6 }
 0x131   : > { %1867 = vrot.lane.b32.xlu1 %v4861_v0, %s5396_s28  ;;  %2027 = vst.msk [vmem:[#allocation2 + $0x14] sm:$0xf] %vm881_vm14, %v4861_v0  ;;  %v1707_v12 = vsel %vm1703_vm11, %v1691_v11, -inf  ;;  %v1089_v49 = vmax.bf16 %v1055_v61, %v5754_v58  ;;  %v1463_v22 = vmax.f32 %v1325_v8, %v1431_v40  ;;  %v1124_v36 = vmax.bf16 %v5768_v50, %v5788_v39 }
 0x132   : > { %1012 = vst.msk [vmem:[#allocation2 + $0x7c] sm:$0xf] %vm881_vm14, %v4855_v28  ;;  %909 = vst.msk [vmem:[#allocation3 + $0x6c] sm:$0xf] %vm881_vm14, %v4855_v28  ;;  %v4853_v2 = vpack.c.bf16 %v746_v33, %v746_v33  ;;  %v751_v51 = vmul.f32 %v5228_v9, %v5704_v45  ;;  %v1057_v21 = vmax.bf16 %v5754_v58, %v5750_v19  ;;  %v5230_v10 = vpop.eup %5229 }
 0x133   : > { %v1123_v6 = vmax.bf16 %v1089_v49, %v5778_v48  ;;  %v1601_v47 = vmax.f32 %v1463_v22, %v1569_v16  ;;  %v1277_v29 = vsel %vm927_vm2, %v1219_v41, %v1220_v56  ;;  %v1553_v50 = vsel %vm957_vm4, %v1495_v3, %v1496_v44 }
 0x134   : > { %v1158_v53 = vmax.bf16 %v1124_v36, %v5915_v35  ;;  %1010 = vst.msk [vmem:[#allocation2 + $0x74] sm:$0xf] %vm881_vm14, %v4853_v2  ;;  %907 = vst.msk [vmem:[#allocation3 + $0x64] sm:$0xf] %vm881_vm14, %v4853_v2  ;;  %v4858_v45 = vpack.c.bf16 %v751_v51, %v751_v51  ;;  %v749_v55 = vmul.f32 %v5230_v10, %v5707_v13  ;;  %v1294_v57 = vsel %vm1290_vm15, %v1277_v29, -inf }
 0x135   : > { %v1157_v19 = vmax.bf16 %v1123_v6, %v5917_v46  ;;  %v5232_v41 = vpop.eup %5231  ;;  %v1739_v23 = vmax.f32 %v1601_v47, %v1707_v12  ;;  %v1326_v17 = vmax.f32 %v5863_v42, %v1294_v57  ;;  %v5945_v3 = vsel %vm1566_vm5, %v1553_v50, -inf  ;;  %v5949_v30 = vld [vmem:[#allocation2 + $0x78] sm:$0xf] }
 0x136   : > { %v5947_v61 = vunpack.c.l.bf16 %v1158_v53  ;;  %1015 = vst.msk [vmem:[#allocation2 + $0x88] sm:$0xf] %vm881_vm14, %v4858_v45  ;;  %912 = vst.msk [vmem:[#allocation3 + $0x78] sm:$0xf] %vm881_vm14, %v4858_v45  ;;  %v4856_v13 = vpack.c.bf16 %v749_v55, %v749_v55  ;;  %v752_v63 = vmul.f32 %v5232_v41, %v5717_v27  ;;  %v1091_v7 = vmax.bf16 %v1057_v21, %v5778_v48  ;;  %v6001_v57 = vld [vmem:[#allocation2 + $0x38] sm:$0xf] }
 0x137   : > { %v1189_v0 = vunpack.c.l.bf16 %v1157_v19  ;;  %v5234_v43 = vpop.eup %5233  ;;  %v5955_v8 = vld [vmem:[#allocation2 + $0x70] sm:$0xf]  ;;  %v4862_v40 = vpack.c.bf16 %v1739_v23, %v1739_v23  ;;  %v1060_v32 = vmax.bf16 %v5788_v39, %v5752_v20 }
 0x138   : > { %v1360_v16 = vrot.slane %v5947_v61, 1  ;;  %v1636_v11 = vrot.slane %v5947_v61, 2  ;;  %v1222_v28 = vrot.slane %v5947_v61, 7  ;;  %1013 = vst.msk [vmem:[#allocation2 + $0x80] sm:$0xf] %vm881_vm14, %v4856_v13  ;;  %v4859_v33 = vpack.c.bf16 %v752_v63, %v752_v63 }
 0x139   : > { %910 = vst.msk [vmem:[#allocation3 + $0x70] sm:$0xf] %vm881_vm14, %v4856_v13  ;;  %v750_v27 = vmul.f32 %v5234_v43, %v5729_v25  ;;  %v1079_v12 = vmax.bf16 %v5949_v30, %v5955_v8  ;;  %v1359_v49 = vrot.slane %v1189_v0, 1  ;;  %1869 = vrot.lane.b32.xlu0 %v4862_v40, %s5396_s28  ;;  %2028 = vst.msk [vmem:[#allocation2 + $0x18] sm:$0xf] %vm881_vm14, %v4862_v40  ;;  %v1635_v9 = vrot.slane %v1189_v0, 2 }
 0x13a   : > { %v1221_v22 = vrot.slane %v1189_v0, 7  ;;  %v1497_v36 = vrot.slane %v1189_v0, 6  ;;  %v1125_v2 = vmax.bf16 %v1091_v7, %v5917_v46  ;;  %1016 = vst.msk [vmem:[#allocation2 + $0x8c] sm:$0xf] %vm881_vm14, %v4859_v33  ;;  %913 = vst.msk [vmem:[#allocation3 + $0x7c] sm:$0xf] %vm881_vm14, %v4859_v33 }
 0x13b   : > { %v4857_v51 = vpack.c.bf16 %v750_v27, %v750_v27  ;;  %v1414_v25 = vsel %vm942_vm3, %v1358_v18, %v1359_v49  ;;  %v1413_v6 = vsel %vm942_vm3, %v1359_v49, %v1360_v16  ;;  %v1498_v21 = vrot.slane %v5947_v61, 6  ;;  %v5979_v10 = vld [vmem:[#allocation2 + $0x7c] sm:$0xf]  ;;  %v5981_v47 = vld [vmem:[#allocation2 + $0x74] sm:$0xf] }
 0x13c   : > { %v1432_v29 = vsel %vm1428_vm0, %v1414_v25, -inf  ;;  %v1690_v50 = vsel %vm972_vm8, %v1634_v62, %v1635_v9  ;;  %v1276_v18 = vsel %vm927_vm2, %v1220_v56, %v1221_v22  ;;  %v1433_v53 = vsel %vm1427_vm9, %v1413_v6, -inf  ;;  %v1117_v49 = vld [vmem:[#allocation2 + $0x90] sm:$0xf] }
 0x13d   : > { %1014 = vst.msk [vmem:[#allocation2 + $0x84] sm:$0xf] %vm881_vm14, %v4857_v51  ;;  %v1080_v45 = vmax.bf16 %v5979_v10, %v5981_v47  ;;  %911 = vst.msk [vmem:[#allocation3 + $0x74] sm:$0xf] %vm881_vm14, %v4857_v51  ;;  %v1464_v55 = vmax.f32 %v1326_v17, %v1432_v29  ;;  %v1708_v19 = vsel %vm1704_vm6, %v1690_v50, -inf  ;;  %v1295_v62 = vsel %vm1289_vm7, %v1276_v18, -inf }
 0x13e   : > { %v1327_v56 = vmax.f32 %v1189_v0, %v1295_v62  ;;  %v1552_v41 = vsel %vm957_vm4, %v1496_v44, %v1497_v36  ;;  %v1689_v23 = vsel %vm972_vm8, %v1635_v9, %v1636_v11  ;;  %v1159_v17 = vmax.bf16 %v1125_v2, %v6001_v57  ;;  %v1083_v2 = vld [vmem:[#allocation2 + $0x88] sm:$0xf] }
 0x13f   : > { %v1602_v13 = vmax.f32 %v1464_v55, %v5945_v3  ;;  %v1571_v63 = vsel %vm1565_vm10, %v1552_v41, -inf  ;;  %v1709_v0 = vsel %vm1703_vm11, %v1689_v23, -inf  ;;  %v1275_v42 = vsel %vm927_vm2, %v1221_v22, %v1222_v28  ;;  %v6021_v44 = vld [vmem:[#allocation2 + $0x80] sm:$0xf]  ;;  %v1151_v55 = vld [vmem:[#allocation2 + $0x98] sm:$0xf] }
 0x140   : > { %v1465_v7 = vmax.f32 %v1327_v56, %v1433_v53  ;;  %v6023_v43 = vunpack.c.l.bf16 %v1159_v17  ;;  %v1296_v40 = vsel %vm1290_vm15, %v1275_v42, -inf  ;;  %v1551_v3 = vsel %vm957_vm4, %v1497_v36, %v1498_v21 }
 0x141   : > { %v1081_v33 = vmax.bf16 %v6021_v44, %v5949_v30  ;;  %v1113_v27 = vmax.bf16 %v1079_v12, %v6021_v44  ;;  %v1740_v9 = vmax.f32 %v1602_v13, %v1708_v19  ;;  %v1328_v22 = vmax.f32 %v5947_v61, %v1296_v40 }
 0x142   : > { %v1603_v51 = vmax.f32 %v1465_v7, %v1571_v63  ;;  %v1361_v25 = vrot.slane %v6023_v43, 1  ;;  %v1572_v6 = vsel %vm1566_vm5, %v1551_v3, -inf  ;;  %v1637_v29 = vrot.slane %v6023_v43, 2  ;;  %v1118_v63 = vld [vmem:[#allocation2 + $0x94] sm:$0xf] }
 0x143   : > { %v1115_v50 = vmax.bf16 %v1083_v2, %v1081_v33  ;;  %v1147_v36 = vmax.bf16 %v1113_v27, %v1083_v2  ;;  %v4863_v18 = vpack.c.bf16 %v1740_v9, %v1740_v9  ;;  %v1058_v53 = vmax.bf16 %v5752_v20, %v5736_v1 }
 0x144   : > { %v6041_v12 = vld [vmem:[#allocation2 + $0x84] sm:$0xf]  ;;  %v1741_v19 = vmax.f32 %v1603_v51, %v1709_v0  ;;  %v1412_v62 = vsel %vm942_vm3, %v1360_v16, %v1361_v25  ;;  %v1688_v56 = vsel %vm972_vm8, %v1636_v11, %v1637_v29  ;;  %v1223_v1 = vrot.slane %v6023_v43, 7  ;;  %v1084_v16 = vld [vmem:[#allocation2 + $0x8c] sm:$0xf] }
 0x145   : > { %v1082_v41 = vmax.bf16 %v6041_v12, %v5979_v10  ;;  %v1114_v23 = vmax.bf16 %v1080_v45, %v6041_v12  ;;  %v1149_v17 = vmax.bf16 %v1117_v49, %v1115_v50  ;;  %v1181_v13 = vmax.bf16 %v1147_v36, %v1117_v49  ;;  %1871 = vrot.lane.b32.xlu1 %v4863_v18, %s5396_s28 }
 0x146   : > { %2029 = vst.msk [vmem:[#allocation2 + $0x1c] sm:$0xf] %vm881_vm14, %v4863_v18  ;;  %v4864_v0 = vpack.c.bf16 %v1741_v19, %v1741_v19  ;;  %v1434_v42 = vsel %vm1428_vm0, %v1412_v62, -inf  ;;  %v1710_v11 = vsel %vm1704_vm6, %v1688_v56, -inf  ;;  %v1092_v7 = vmax.bf16 %v1058_v53, %v5788_v39  ;;  %v6084_v53 = vld [vmem:[#allocation2 + $0x3c] sm:$0xf] }
 0x147   : > { %v6066_v40 = vmax.bf16 %v1084_v16, %v1082_v41  ;;  %v1148_v45 = vmax.bf16 %v1114_v23, %v1084_v16  ;;  %v1183_v3 = vmax.bf16 %v1151_v55, %v1149_v17  ;;  %v6068_v33 = vunpack.c.l.bf16 %v1181_v13 }
 0x148   : > { %2030 = vst.msk [vmem:[#allocation2 + $0x20] sm:$0xf] %vm881_vm14, %v4864_v0  ;;  %1873 = vrot.lane.b32.xlu0 %v4864_v0, %s5396_s28  ;;  %v1466_v27 = vmax.f32 %v1328_v22, %v1434_v42  ;;  %v1126_v49 = vmax.bf16 %v1092_v7, %v5915_v35  ;;  %v1274_v9 = vsel %vm927_vm2, %v1222_v28, %v1223_v1  ;;  %v1499_v2 = vrot.slane %v6023_v43, 6 }
 0x149   : > { %v1182_v51 = vmax.bf16 %v1148_v45, %v1118_v63  ;;  %v6080_v50 = vunpack.c.l.bf16 %v1183_v3  ;;  %v9766_v36 = vrot.slane %v6068_v33, 7  ;;  %v9765_v18 = vrot.slane %v6068_v33, 6 }
 0x14a   : > { %v1604_v22 = vmax.f32 %v1466_v27, %v1572_v6  ;;  %v1160_v55 = vmax.bf16 %v1126_v49, %v6084_v53  ;;  %v1297_v19 = vsel %vm1289_vm7, %v1274_v9, -inf  ;;  %v1550_v28 = vsel %vm957_vm4, %v1498_v21, %v1499_v2 }
 0x14b   : > { %v6093_v62 = vunpack.c.l.bf16 %v1182_v51  ;;  %v9755_v56 = vrot.slane %v6080_v50, 1  ;;  %v9752_v41 = vrot.slane %v6080_v50, 2  ;;  %v1329_v23 = vmax.f32 %v6023_v43, %v1297_v19  ;;  %v6145_v19 = vld [vmem:[#allocation2 + $0x40] sm:$0xf] }
 0x14c   : > { %v1742_v17 = vmax.f32 %v1604_v22, %v1710_v11  ;;  %v6098_v6 = vunpack.c.l.bf16 %v1160_v55  ;;  %v1573_v13 = vsel %vm1565_vm10, %v1550_v28, -inf  ;;  %v1059_v61 = vmax.bf16 %v5778_v48, %v5754_v58 }
 0x14d   : > { %v9763_v16 = vrot.slane %v6093_v62, 7  ;;  %v9767_v21 = vrot.slane %v6093_v62, 1  ;;  %v9757_v63 = vrot.slane %v6093_v62, 6  ;;  %v9764_v0 = vrot.slane %v6093_v62, 2 }
 0x14e   : > { %v4865_v42 = vpack.c.bf16 %v1742_v17, %v1742_v17  ;;  %v1362_v7 = vrot.slane %v6098_v6, 1  ;;  %v1638_v11 = vrot.slane %v6098_v6, 2  ;;  %v1093_v45 = vmax.bf16 %v1059_v61, %v5917_v46 }
 0x14f   : > { %v1251_v58 = vsel %vm927_vm2, %v9766_v36, %v9763_v16  ;;  %v1388_v3 = vsel %vm942_vm3, %v9767_v21, %v9755_v56  ;;  %v1527_v27 = vsel %vm957_vm4, %v9765_v18, %v9757_v63  ;;  %v1664_v49 = vsel %vm972_vm8, %v9764_v0, %v9752_v41  ;;  %v5366_v36 = vld [vmem:[#allocation2 + $0x70] sm:$0xf] }
 0x150   : > { %v1320_v9 = vsel %vm1290_vm15, %v1251_v58, -inf  ;;  %v1458_v51 = vsel %vm1428_vm0, %v1388_v3, -inf  ;;  %v1596_v22 = vsel %vm1566_vm5, %v1527_v27, -inf  ;;  %v1734_v55 = vsel %vm1704_vm6, %v1664_v49, -inf  ;;  %2031 = vst.msk [vmem:[#allocation2 + $0x24] sm:$0xf] %vm881_vm14, %v4865_v42  ;;  %1875 = vrot.lane.b32.xlu1 %v4865_v42, %s5396_s28 }
 0x151   : > { %v1352_v28 = vmax.f32 %v6093_v62, %v1320_v9  ;;  %v1411_v17 = vsel %vm942_vm3, %v1361_v25, %v1362_v7  ;;  %v1687_v61 = vsel %vm972_vm8, %v1637_v29, %v1638_v11  ;;  %v1127_v58 = vmax.bf16 %v1093_v45, %v6001_v57 }
 0x152   : > { %v1435_v3 = vsel %vm1427_vm9, %v1411_v17, -inf  ;;  %v1711_v42 = vsel %vm1703_vm11, %v1687_v61, -inf  ;;  %v1224_v27 = vrot.slane %v6098_v6, 7  ;;  %v1500_v49 = vrot.slane %v6098_v6, 6 }
 0x153   : > { %v1490_v9 = vmax.f32 %v1352_v28, %v1458_v51  ;;  %v1467_v41 = vmax.f32 %v1329_v23, %v1435_v3  ;;  %v1161_v25 = vmax.bf16 %v1127_v58, %v6145_v19  ;;  %v1061_v17 = vmax.bf16 %v5917_v46, %v5778_v48 }
 0x154   : > { %v1273_v29 = vsel %vm927_vm2, %v1223_v1, %v1224_v27  ;;  %v1549_v45 = vsel %vm957_vm4, %v1499_v2, %v1500_v49  ;;  %v1062_v51 = vmax.bf16 %v5915_v35, %v5788_v39  ;;  %v1094_v58 = vmax.bf16 %v1060_v32, %v5915_v35  ;;  %v6183_v39 = vld [vmem:[#allocation2 + $0x44] sm:$0xf] }
 0x155   : > { %v1628_v23 = vmax.f32 %v1490_v9, %v1596_v22  ;;  %v1605_v28 = vmax.f32 %v1467_v41, %v1573_v13  ;;  %v1193_v61 = vunpack.c.l.bf16 %v1161_v25  ;;  %v1298_v20 = vsel %vm1290_vm15, %v1273_v29, -inf }
 0x156   : > { %v1330_v43 = vmax.f32 %v6098_v6, %v1298_v20  ;;  %v1574_v1 = vsel %vm1566_vm5, %v1549_v45, -inf  ;;  %v1095_v2 = vmax.bf16 %v1061_v17, %v6001_v57  ;;  %v1128_v41 = vmax.bf16 %v1094_v58, %v6084_v53 }
 0x157   : > { %v1766_v3 = vmax.f32 %v1628_v23, %v1734_v55  ;;  %v1743_v48 = vmax.f32 %v1605_v28, %v1711_v42  ;;  %v1363_v37 = vrot.slane %v1193_v61, 1  ;;  %v1639_v56 = vrot.slane %v1193_v61, 2  ;;  %v6200_v23 = vld [vmem:[#allocation2 + $0x48] sm:$0xf] }
 0x158   : > { %v1225_v13 = vrot.slane %v1193_v61, 7  ;;  %v1501_v22 = vrot.slane %v1193_v61, 6  ;;  %v1129_v9 = vmax.bf16 %v1095_v2, %v6145_v19  ;;  %v1162_v45 = vmax.bf16 %v1128_v41, %v6183_v39 }
 0x159   : > { %v6187_v6 = vpack.c.bf16 %v1766_v3, %v1766_v3  ;;  %v4866_v25 = vpack.c.bf16 %v1743_v48, %v1743_v48  ;;  %v1410_v32 = vsel %vm942_vm3, %v1362_v7, %v1363_v37  ;;  %v1686_v55 = vsel %vm972_vm8, %v1638_v11, %v1639_v56 }
 0x15a   : > { %v1436_v42 = vsel %vm1428_vm0, %v1410_v32, -inf  ;;  %v1712_v29 = vsel %vm1704_vm6, %v1686_v55, -inf  ;;  %v1272_v17 = vsel %vm927_vm2, %v1224_v27, %v1225_v13  ;;  %v1548_v28 = vsel %vm957_vm4, %v1500_v49, %v1501_v22 }
 0x15b   : > { %9853 = vst [vmem:[#allocation4_spill] sm:$0xff] %v6187_v6  ;;  %2055 = vst.msk [vmem:[#allocation2 + $0x84] sm:$0xf] %vm881_vm14, %v6187_v6  ;;  %1877 = vrot.lane.b32.xlu0 %v4866_v25, %s5396_s28  ;;  %v1468_v7 = vmax.f32 %v1330_v43, %v1436_v42  ;;  %v1299_v11 = vsel %vm1289_vm7, %v1272_v17, -inf  ;;  %v1163_v20 = vmax.bf16 %v1129_v9, %v6200_v23  ;;  %v1194_v58 = vunpack.c.l.bf16 %v1162_v45 }
 0x15c   : > { %2032 = vst.msk [vmem:[#allocation2 + $0x28] sm:$0xf] %vm881_vm14, %v4866_v25  ;;  %v1331_v27 = vmax.f32 %v1193_v61, %v1299_v11  ;;  %v1575_v2 = vsel %vm1565_vm10, %v1548_v28, -inf  ;;  %v1096_v3 = vmax.bf16 %v1062_v51, %v6084_v53  ;;  %v1063_v43 = vmax.bf16 %v6001_v57, %v5917_v46 }
 0x15d   : > { %v1606_v48 = vmax.f32 %v1468_v7, %v1574_v1  ;;  %v6214_v41 = vunpack.c.l.bf16 %v1163_v20  ;;  %v1064_v25 = vmax.bf16 %v6084_v53, %v5915_v35  ;;  %v1364_v32 = vrot.slane %v1194_v58, 1 }
 0x15e   : > { %v1640_v49 = vrot.slane %v1194_v58, 2  ;;  %v1226_v55 = vrot.slane %v1194_v58, 7  ;;  %v1502_v9 = vrot.slane %v1194_v58, 6  ;;  %v1130_v51 = vmax.bf16 %v1096_v3, %v6183_v39  ;;  %v6241_v3 = vld [vmem:[#allocation2 + $0x4c] sm:$0xf] }
 0x15f   : > { %v1744_v42 = vmax.f32 %v1606_v48, %v1712_v29  ;;  %v1365_v61 = vrot.slane %v6214_v41, 1  ;;  %v1641_v45 = vrot.slane %v6214_v41, 2  ;;  %v1409_v1 = vsel %vm942_vm3, %v1363_v37, %v1364_v32 }
 0x160   : > { %v1685_v46 = vsel %vm972_vm8, %v1639_v56, %v1640_v49  ;;  %v1271_v35 = vsel %vm927_vm2, %v1225_v13, %v1226_v55  ;;  %v1547_v17 = vsel %vm957_vm4, %v1501_v22, %v1502_v9  ;;  %v1437_v29 = vsel %vm1427_vm9, %v1409_v1, -inf }
 0x161   : > { %v4867_v7 = vpack.c.bf16 %v1744_v42, %v1744_v42  ;;  %v1713_v11 = vsel %vm1703_vm11, %v1685_v46, -inf  ;;  %v1300_v28 = vsel %vm1290_vm15, %v1271_v35, -inf  ;;  %v1469_v37 = vmax.f32 %v1331_v27, %v1437_v29 }
 0x162   : > { %v1332_v20 = vmax.f32 %v1194_v58, %v1300_v28  ;;  %v1408_v56 = vsel %vm942_vm3, %v1364_v32, %v1365_v61  ;;  %v1576_v13 = vsel %vm1566_vm5, %v1547_v17, -inf  ;;  %v1684_v48 = vsel %vm972_vm8, %v1640_v49, %v1641_v45 }
 0x163   : > { %2033 = vst.msk [vmem:[#allocation2 + $0x2c] sm:$0xf] %vm881_vm14, %v4867_v7  ;;  %1879 = vrot.lane.b32.xlu1 %v4867_v7, %s5396_s28  ;;  %v1438_v22 = vsel %vm1428_vm0, %v1408_v56, -inf  ;;  %v1164_v58 = vmax.bf16 %v1130_v51, %v6241_v3  ;;  %v1227_v27 = vrot.slane %v6214_v41, 7  ;;  %v1607_v32 = vmax.f32 %v1469_v37, %v1575_v2 }
 0x164   : > { %v1470_v42 = vmax.f32 %v1332_v20, %v1438_v22  ;;  %v1714_v1 = vsel %vm1704_vm6, %v1684_v48, -inf  ;;  %v1503_v46 = vrot.slane %v6214_v41, 6  ;;  %v1097_v7 = vmax.bf16 %v1063_v43, %v6145_v19 }
 0x165   : > { %v1196_v35 = vunpack.c.l.bf16 %v1164_v58  ;;  %v1270_v17 = vsel %vm927_vm2, %v1226_v55, %v1227_v27  ;;  %v1098_v29 = vmax.bf16 %v1064_v25, %v6183_v39  ;;  %v1745_v49 = vmax.f32 %v1607_v32, %v1713_v11  ;;  %v6265_v55 = vld [vmem:[#allocation2 + $0x50] sm:$0xf] }
 0x166   : > { %v1608_v28 = vmax.f32 %v1470_v42, %v1576_v13  ;;  %v1301_v51 = vsel %vm1289_vm7, %v1270_v17, -inf  ;;  %v1546_v2 = vsel %vm957_vm4, %v1502_v9, %v1503_v46  ;;  %v1131_v25 = vmax.bf16 %v1097_v7, %v6200_v23  ;;  %v6268_v13 = vld [vmem:[#allocation2 + $0x54] sm:$0xf] }
 0x167   : > { %v1333_v37 = vmax.f32 %v6214_v41, %v1301_v51  ;;  %v1366_v20 = vrot.slane %v1196_v35, 1  ;;  %v1577_v56 = vsel %vm1565_vm10, %v1546_v2, -inf  ;;  %v1642_v22 = vrot.slane %v1196_v35, 2 }
 0x168   : > { %v4868_v43 = vpack.c.bf16 %v1745_v49, %v1745_v49  ;;  %v1746_v48 = vmax.f32 %v1608_v28, %v1714_v1  ;;  %v1228_v11 = vrot.slane %v1196_v35, 7  ;;  %v1504_v9 = vrot.slane %v1196_v35, 6 }
 0x169   : > { %v1407_v58 = vsel %vm942_vm3, %v1365_v61, %v1366_v20  ;;  %v1683_v41 = vsel %vm972_vm8, %v1641_v45, %v1642_v22  ;;  %v1132_v32 = vmax.bf16 %v1098_v29, %v6241_v3  ;;  %v1165_v7 = vmax.bf16 %v1131_v25, %v6265_v55 }
 0x16a   : > { %2034 = vst.msk [vmem:[#allocation2 + $0x30] sm:$0xf] %vm881_vm14, %v4868_v43  ;;  %1881 = vrot.lane.b32.xlu0 %v4868_v43, %s5396_s28  ;;  %v4869_v42 = vpack.c.bf16 %v1746_v48, %v1746_v48  ;;  %v1439_v1 = vsel %vm1427_vm9, %v1407_v58, -inf  ;;  %v1715_v17 = vsel %vm1703_vm11, %v1683_v41, -inf  ;;  %v1269_v45 = vsel %vm927_vm2, %v1227_v27, %v1228_v11 }
 0x16b   : > { %v1471_v61 = vmax.f32 %v1333_v37, %v1439_v1  ;;  %v1545_v29 = vsel %vm957_vm4, %v1503_v46, %v1504_v9  ;;  %v1166_v49 = vmax.bf16 %v1132_v32, %v6268_v13  ;;  %v1197_v28 = vunpack.c.l.bf16 %v1165_v7 }
 0x16c   : > { %2035 = vst.msk [vmem:[#allocation2 + $0x34] sm:$0xf] %vm881_vm14, %v4869_v42  ;;  %1883 = vrot.lane.b32.xlu1 %v4869_v42, %s5396_s28  ;;  %v1302_v51 = vsel %vm1290_vm15, %v1269_v45, -inf  ;;  %v1578_v2 = vsel %vm1566_vm5, %v1545_v29, -inf  ;;  %v1065_v37 = vmax.bf16 %v6145_v19, %v6001_v57  ;;  %v1066_v46 = vmax.bf16 %v6183_v39, %v6084_v53 }
 0x16d   : > { %v1609_v27 = vmax.f32 %v1471_v61, %v1577_v56  ;;  %v1334_v43 = vmax.f32 %v1196_v35, %v1302_v51  ;;  %v6295_v48 = vunpack.c.l.bf16 %v1166_v49  ;;  %v1367_v25 = vrot.slane %v1197_v28, 1 }
 0x16e   : > { %v1643_v58 = vrot.slane %v1197_v28, 2  ;;  %v1229_v41 = vrot.slane %v1197_v28, 7  ;;  %v1505_v32 = vrot.slane %v1197_v28, 6  ;;  %v1099_v45 = vmax.bf16 %v1065_v37, %v6200_v23 }
 0x16f   : > { %v1747_v42 = vmax.f32 %v1609_v27, %v1715_v17  ;;  %v1368_v1 = vrot.slane %v6295_v48, 1  ;;  %v1644_v7 = vrot.slane %v6295_v48, 2  ;;  %v1406_v57 = vsel %vm942_vm3, %v1366_v20, %v1367_v25 }
 0x170   : > { %v1682_v35 = vsel %vm972_vm8, %v1642_v22, %v1643_v58  ;;  %v1268_v53 = vsel %vm927_vm2, %v1228_v11, %v1229_v41  ;;  %v1544_v56 = vsel %vm957_vm4, %v1504_v9, %v1505_v32  ;;  %v1440_v17 = vsel %vm1428_vm0, %v1406_v57, -inf  ;;  %v6330_v57 = vld [vmem:[#allocation2 + $0x58] sm:$0xf] }
 0x171   : > { %v4870_v61 = vpack.c.bf16 %v1747_v42, %v1747_v42  ;;  %v1716_v29 = vsel %vm1704_vm6, %v1682_v35, -inf  ;;  %v1303_v49 = vsel %vm1289_vm7, %v1268_v53, -inf  ;;  %v1472_v20 = vmax.f32 %v1334_v43, %v1440_v17 }
 0x172   : > { %v1335_v51 = vmax.f32 %v1197_v28, %v1303_v49  ;;  %v1405_v22 = vsel %vm942_vm3, %v1367_v25, %v1368_v1  ;;  %v1579_v11 = vsel %vm1565_vm10, %v1544_v56, -inf  ;;  %v1681_v37 = vsel %vm972_vm8, %v1643_v58, %v1644_v7 }
 0x173   : > { %2036 = vst.msk [vmem:[#allocation2 + $0x38] sm:$0xf] %vm881_vm14, %v4870_v61  ;;  %1885 = vrot.lane.b32.xlu0 %v4870_v61, %s5396_s28  ;;  %v1441_v9 = vsel %vm1427_vm9, %v1405_v22, -inf  ;;  %v1133_v27 = vmax.bf16 %v1099_v45, %v6265_v55  ;;  %v1230_v28 = vrot.slane %v6295_v48, 7  ;;  %v1610_v43 = vmax.f32 %v1472_v20, %v1578_v2 }
 0x174   : > { %v1473_v42 = vmax.f32 %v1335_v51, %v1441_v9  ;;  %v1717_v25 = vsel %vm1703_vm11, %v1681_v37, -inf  ;;  %v1506_v35 = vrot.slane %v6295_v48, 6  ;;  %v1100_v58 = vmax.bf16 %v1066_v46, %v6241_v3  ;;  %v6347_v37 = vld [vmem:[#allocation2 + $0x5c] sm:$0xf] }
 0x175   : > { %v1167_v53 = vmax.bf16 %v1133_v27, %v6330_v57  ;;  %v1267_v56 = vsel %vm927_vm2, %v1229_v41, %v1230_v28  ;;  %v1067_v45 = vmax.bf16 %v6200_v23, %v6145_v19  ;;  %v1748_v61 = vmax.f32 %v1610_v43, %v1716_v29 }
 0x176   : > { %v1611_v2 = vmax.f32 %v1473_v42, %v1579_v11  ;;  %v1304_v17 = vsel %vm1290_vm15, %v1267_v56, -inf  ;;  %v1543_v49 = vsel %vm957_vm4, %v1505_v32, %v1506_v35  ;;  %v1134_v41 = vmax.bf16 %v1100_v58, %v6268_v13 }
 0x177   : > { %v1199_v20 = vunpack.c.l.bf16 %v1167_v53  ;;  %v1336_v51 = vmax.f32 %v6295_v48, %v1304_v17  ;;  %v1580_v22 = vsel %vm1566_vm5, %v1543_v49, -inf  ;;  %v4871_v46 = vpack.c.bf16 %v1748_v61, %v1748_v61  ;;  %v6363_v61 = vld [vmem:[#allocation2 + $0x60] sm:$0xf] }
 0x178   : > { %v1749_v9 = vmax.f32 %v1611_v2, %v1717_v25  ;;  %v1101_v19 = vmax.bf16 %v1067_v45, %v6265_v55  ;;  %v1068_v29 = vmax.bf16 %v6241_v3, %v6183_v39  ;;  %v1168_v32 = vmax.bf16 %v1134_v41, %v6347_v37 }
 0x179   : > { %v1369_v11 = vrot.slane %v1199_v20, 1  ;;  %v1645_v27 = vrot.slane %v1199_v20, 2  ;;  %v1231_v43 = vrot.slane %v1199_v20, 7  ;;  %2037 = vst.msk [vmem:[#allocation2 + $0x3c] sm:$0xf] %vm881_vm14, %v4871_v46  ;;  %1887 = vrot.lane.b32.xlu1 %v4871_v46, %s5396_s28  ;;  %v1507_v42 = vrot.slane %v1199_v20, 6 }
 0x17a   : > { %v4872_v48 = vpack.c.bf16 %v1749_v9, %v1749_v9  ;;  %v1135_v25 = vmax.bf16 %v1101_v19, %v6330_v57  ;;  %v1102_v53 = vmax.bf16 %v1068_v29, %v6268_v13  ;;  %v1200_v58 = vunpack.c.l.bf16 %v1168_v32 }
 0x17b   : > { %v1404_v56 = vsel %vm942_vm3, %v1368_v1, %v1369_v11  ;;  %v1680_v39 = vsel %vm972_vm8, %v1644_v7, %v1645_v27  ;;  %v1266_v45 = vsel %vm927_vm2, %v1230_v28, %v1231_v43  ;;  %v1542_v7 = vsel %vm957_vm4, %v1506_v35, %v1507_v42 }
 0x17c   : > { %2038 = vst.msk [vmem:[#allocation2 + $0x40] sm:$0xf] %vm881_vm14, %v4872_v48  ;;  %1889 = vrot.lane.b32.xlu0 %v4872_v48, %s5396_s28  ;;  %v1442_v2 = vsel %vm1428_vm0, %v1404_v56, -inf  ;;  %v1718_v17 = vsel %vm1704_vm6, %v1680_v39, -inf  ;;  %v1305_v1 = vsel %vm1289_vm7, %v1266_v45, -inf  ;;  %v1370_v41 = vrot.slane %v1200_v58, 1 }
 0x17d   : > { %v1474_v49 = vmax.f32 %v1336_v51, %v1442_v2  ;;  %v1337_v28 = vmax.f32 %v1199_v20, %v1305_v1  ;;  %v1581_v46 = vsel %vm1565_vm10, %v1542_v7, -inf  ;;  %v1646_v9 = vrot.slane %v1200_v58, 2  ;;  %v6389_v2 = vld [vmem:[#allocation2 + $0x64] sm:$0xf] }
 0x17e   : > { %v1169_v19 = vmax.bf16 %v1135_v25, %v6363_v61  ;;  %v1232_v29 = vrot.slane %v1200_v58, 7  ;;  %v1508_v32 = vrot.slane %v1200_v58, 6  ;;  %v1403_v56 = vsel %vm942_vm3, %v1369_v11, %v1370_v41 }
 0x17f   : > { %v1612_v48 = vmax.f32 %v1474_v49, %v1580_v22  ;;  %v1136_v39 = vmax.bf16 %v1102_v53, %v6347_v37  ;;  %v1069_v35 = vmax.bf16 %v6265_v55, %v6200_v23  ;;  %v1443_v20 = vsel %vm1427_vm9, %v1403_v56, -inf }
 0x180   : > { %v1679_v51 = vsel %vm972_vm8, %v1645_v27, %v1646_v9  ;;  %v1201_v45 = vunpack.c.l.bf16 %v1169_v19  ;;  %v1265_v25 = vsel %vm927_vm2, %v1231_v43, %v1232_v29  ;;  %v1475_v1 = vmax.f32 %v1337_v28, %v1443_v20 }
 0x181   : > { %v1750_v22 = vmax.f32 %v1612_v48, %v1718_v17  ;;  %v1719_v11 = vsel %vm1703_vm11, %v1679_v51, -inf  ;;  %v1306_v23 = vsel %vm1290_vm15, %v1265_v25, -inf  ;;  %v1541_v49 = vsel %vm957_vm4, %v1507_v42, %v1508_v32 }
 0x182   : > { %v1338_v53 = vmax.f32 %v1200_v58, %v1306_v23  ;;  %v1371_v7 = vrot.slane %v1201_v45, 1  ;;  %v1647_v27 = vrot.slane %v1201_v45, 2  ;;  %v1613_v56 = vmax.f32 %v1475_v1, %v1581_v46 }
 0x183   : > { %v4873_v19 = vpack.c.bf16 %v1750_v22, %v1750_v22  ;;  %v1582_v43 = vsel %vm1566_vm5, %v1541_v49, -inf  ;;  %v1170_v17 = vmax.bf16 %v1136_v39, %v6389_v2  ;;  %v1233_v20 = vrot.slane %v1201_v45, 7 }
 0x184   : > { %v1402_v28 = vsel %vm942_vm3, %v1370_v41, %v1371_v7  ;;  %v1678_v48 = vsel %vm972_vm8, %v1646_v9, %v1647_v27  ;;  %v1509_v58 = vrot.slane %v1201_v45, 6  ;;  %v1751_v42 = vmax.f32 %v1613_v56, %v1719_v11 }
 0x185   : > { %2039 = vst.msk [vmem:[#allocation2 + $0x44] sm:$0xf] %vm881_vm14, %v4873_v19  ;;  %1891 = vrot.lane.b32.xlu1 %v4873_v19, %s5396_s28  ;;  %v1444_v46 = vsel %vm1428_vm0, %v1402_v28, -inf  ;;  %v1720_v51 = vsel %vm1704_vm6, %v1678_v48, -inf  ;;  %v1202_v39 = vunpack.c.l.bf16 %v1170_v17  ;;  %v1264_v41 = vsel %vm927_vm2, %v1232_v29, %v1233_v20 }
 0x186   : > { %v1476_v25 = vmax.f32 %v1338_v53, %v1444_v46  ;;  %v1540_v9 = vsel %vm957_vm4, %v1508_v32, %v1509_v58  ;;  %v1103_v22 = vmax.bf16 %v1069_v35, %v6330_v57  ;;  %v4874_v1 = vpack.c.bf16 %v1751_v42, %v1751_v42  ;;  %v6424_v32 = vld [vmem:[#allocation2 + $0x68] sm:$0xf] }
 0x187   : > { %v1307_v11 = vsel %vm1289_vm7, %v1264_v41, -inf  ;;  %v1372_v23 = vrot.slane %v1202_v39, 1  ;;  %v1583_v49 = vsel %vm1565_vm10, %v1540_v9, -inf  ;;  %v1648_v17 = vrot.slane %v1202_v39, 2 }
 0x188   : > { %v1614_v19 = vmax.f32 %v1476_v25, %v1582_v43  ;;  %v1339_v56 = vmax.f32 %v1201_v45, %v1307_v11  ;;  %v1137_v53 = vmax.bf16 %v1103_v22, %v6363_v61  ;;  %2040 = vst.msk [vmem:[#allocation2 + $0x48] sm:$0xf] %vm881_vm14, %v4874_v1  ;;  %1893 = vrot.lane.b32.xlu0 %v4874_v1, %s5396_s28  ;;  %v1234_v35 = vrot.slane %v1202_v39, 7 }
 0x189   : > { %v1401_v29 = vsel %vm942_vm3, %v1371_v7, %v1372_v23  ;;  %v1510_v28 = vrot.slane %v1202_v39, 6  ;;  %v1070_v48 = vmax.bf16 %v6268_v13, %v6241_v3  ;;  %v1677_v43 = vsel %vm972_vm8, %v1647_v27, %v1648_v17 }
 0x18a   : > { %v1752_v42 = vmax.f32 %v1614_v19, %v1720_v51  ;;  %v1445_v45 = vsel %vm1427_vm9, %v1401_v29, -inf  ;;  %v1171_v46 = vmax.bf16 %v1137_v53, %v6424_v32  ;;  %v1721_v7 = vsel %vm1703_vm11, %v1677_v43, -inf }
 0x18b   : > { %v1477_v25 = vmax.f32 %v1339_v56, %v1445_v45  ;;  %v1263_v41 = vsel %vm927_vm2, %v1233_v20, %v1234_v35  ;;  %v1539_v9 = vsel %vm957_vm4, %v1509_v58, %v1510_v28  ;;  %v1104_v19 = vmax.bf16 %v1070_v48, %v6347_v37  ;;  %v6456_v48 = vld [vmem:[#allocation2 + $0x6c] sm:$0xf] }
 0x18c   : > { %v4875_v3 = vpack.c.bf16 %v1752_v42, %v1752_v42  ;;  %v1203_v51 = vunpack.c.l.bf16 %v1171_v46  ;;  %v1308_v22 = vsel %vm1290_vm15, %v1263_v41, -inf  ;;  %v1584_v27 = vsel %vm1566_vm5, %v1539_v9, -inf }
 0x18d   : > { %v1615_v1 = vmax.f32 %v1477_v25, %v1583_v49  ;;  %v1340_v11 = vmax.f32 %v1202_v39, %v1308_v22  ;;  %v1071_v56 = vmax.bf16 %v6330_v57, %v6265_v55  ;;  %v1138_v45 = vmax.bf16 %v1104_v19, %v6389_v2 }
 0x18e   : > { %2041 = vst.msk [vmem:[#allocation2 + $0x4c] sm:$0xf] %vm881_vm14, %v4875_v3  ;;  %1895 = vrot.lane.b32.xlu1 %v4875_v3, %s5396_s28  ;;  %v1373_v20 = vrot.slane %v1203_v51, 1  ;;  %v1649_v58 = vrot.slane %v1203_v51, 2  ;;  %v1235_v53 = vrot.slane %v1203_v51, 7  ;;  %v1511_v29 = vrot.slane %v1203_v51, 6 }
 0x18f   : > { %v1753_v42 = vmax.f32 %v1615_v1, %v1721_v7  ;;  %v1105_v43 = vmax.bf16 %v1071_v56, %v6363_v61  ;;  %v1072_v39 = vmax.bf16 %v6347_v37, %v6268_v13  ;;  %v1073_v19 = vmax.bf16 %v6363_v61, %v6330_v57 }
 0x190   : > { %v1400_v49 = vsel %vm942_vm3, %v1372_v23, %v1373_v20  ;;  %v1676_v55 = vsel %vm972_vm8, %v1648_v17, %v1649_v58  ;;  %v1262_v46 = vsel %vm927_vm2, %v1234_v35, %v1235_v53  ;;  %v1538_v25 = vsel %vm957_vm4, %v1510_v28, %v1511_v29 }
 0x191   : > { %v4876_v7 = vpack.c.bf16 %v1753_v42, %v1753_v42  ;;  %v1446_v41 = vsel %vm1428_vm0, %v1400_v49, -inf  ;;  %v1722_v13 = vsel %vm1704_vm6, %v1676_v55, -inf  ;;  %v1172_v23 = vmax.bf16 %v1138_v45, %v6456_v48 }
 0x192   : > { %v1478_v9 = vmax.f32 %v1340_v11, %v1446_v41  ;;  %v1309_v17 = vsel %vm1289_vm7, %v1262_v46, -inf  ;;  %v1585_v3 = vsel %vm1565_vm10, %v1538_v25, -inf  ;;  %v1139_v35 = vmax.bf16 %v1105_v43, %v6424_v32 }
 0x193   : > { %2042 = vst.msk [vmem:[#allocation2 + $0x50] sm:$0xf] %vm881_vm14, %v4876_v7  ;;  %1897 = vrot.lane.b32.xlu0 %v4876_v7, %s5396_s28  ;;  %v1204_v28 = vunpack.c.l.bf16 %v1172_v23  ;;  %v1341_v22 = vmax.f32 %v1203_v51, %v1309_v17  ;;  %v1106_v1 = vmax.bf16 %v1072_v39, %v6389_v2  ;;  %v1074_v42 = vmax.bf16 %v6389_v2, %v6347_v37 }
 0x194   : > { %v1616_v11 = vmax.f32 %v1478_v9, %v1584_v27  ;;  %v1173_v56 = vmax.bf16 %v1139_v35, %v5955_v8  ;;  %v1075_v45 = vmax.bf16 %v6424_v32, %v6363_v61  ;;  %v1107_v7 = vmax.bf16 %v1073_v19, %v6424_v32 }
 0x195   : > { %v1374_v43 = vrot.slane %v1204_v28, 1  ;;  %v1650_v49 = vrot.slane %v1204_v28, 2  ;;  %v1236_v55 = vrot.slane %v1204_v28, 7  ;;  %v1512_v46 = vrot.slane %v1204_v28, 6 }
 0x196   : > { %v1754_v25 = vmax.f32 %v1616_v11, %v1722_v13  ;;  %v1205_v51 = vunpack.c.l.bf16 %v1173_v56  ;;  %v1140_v39 = vmax.bf16 %v1106_v1, %v6456_v48 }
 0x197   : > { %v1399_v57 = vsel %vm942_vm3, %v1373_v20, %v1374_v43  ;;  %v1675_v27 = vsel %vm972_vm8, %v1649_v58, %v1650_v49  ;;  %v1261_v37 = vsel %vm927_vm2, %v1235_v53, %v1236_v55  ;;  %v1537_v41 = vsel %vm957_vm4, %v1511_v29, %v1512_v46 }
 0x198   : > { %v4877_v23 = vpack.c.bf16 %v1754_v25, %v1754_v25  ;;  %v1447_v13 = vsel %vm1427_vm9, %v1399_v57, -inf  ;;  %v1723_v9 = vsel %vm1703_vm11, %v1675_v27, -inf  ;;  %v1310_v17 = vsel %vm1290_vm15, %v1261_v37, -inf }
 0x199   : > { %v1479_v20 = vmax.f32 %v1341_v22, %v1447_v13  ;;  %v1342_v35 = vmax.f32 %v1204_v28, %v1310_v17  ;;  %v1375_v1 = vrot.slane %v1205_v51, 1  ;;  %v1586_v58 = vsel %vm1566_vm5, %v1537_v41, -inf }
 0x19a   : > { %2043 = vst.msk [vmem:[#allocation2 + $0x54] sm:$0xf] %vm881_vm14, %v4877_v23  ;;  %1899 = vrot.lane.b32.xlu1 %v4877_v23, %s5396_s28  ;;  %v1651_v53 = vrot.slane %v1205_v51, 2  ;;  %v1174_v29 = vmax.bf16 %v1140_v39, %v5981_v47  ;;  %v1237_v19 = vrot.slane %v1205_v51, 7  ;;  %v1513_v11 = vrot.slane %v1205_v51, 6 }
 0x19b   : > { %v1617_v56 = vmax.f32 %v1479_v20, %v1585_v3  ;;  %v1398_v25 = vsel %vm942_vm3, %v1374_v43, %v1375_v1  ;;  %v1141_v22 = vmax.bf16 %v1107_v7, %v5955_v8  ;;  %v1108_v28 = vmax.bf16 %v1074_v42, %v6456_v48 }
 0x19c   : > { %v1448_v57 = vsel %vm1428_vm0, %v1398_v25, -inf  ;;  %v1674_v27 = vsel %vm972_vm8, %v1650_v49, %v1651_v53  ;;  %v1206_v37 = vunpack.c.l.bf16 %v1174_v29  ;;  %v1260_v39 = vsel %vm927_vm2, %v1236_v55, %v1237_v19 }
 0x19d   : > { %v1755_v41 = vmax.f32 %v1617_v56, %v1723_v9  ;;  %v1480_v23 = vmax.f32 %v1342_v35, %v1448_v57  ;;  %v1724_v3 = vsel %vm1704_vm6, %v1674_v27, -inf  ;;  %v1311_v43 = vsel %vm1289_vm7, %v1260_v39, -inf }
 0x19e   : > { %v1343_v7 = vmax.f32 %v1205_v51, %v1311_v43  ;;  %v1376_v42 = vrot.slane %v1206_v37, 1  ;;  %v1536_v13 = vsel %vm957_vm4, %v1512_v46, %v1513_v11  ;;  %v1652_v17 = vrot.slane %v1206_v37, 2 }
 0x19f   : > { %v4878_v20 = vpack.c.bf16 %v1755_v41, %v1755_v41  ;;  %v1618_v49 = vmax.f32 %v1480_v23, %v1586_v58  ;;  %v1587_v29 = vsel %vm1565_vm10, %v1536_v13, -inf  ;;  %v1175_v55 = vmax.bf16 %v1141_v22, %v5949_v30 }
 0x1a0   : > { %v1397_v9 = vsel %vm942_vm3, %v1375_v1, %v1376_v42  ;;  %v1673_v35 = vsel %vm972_vm8, %v1651_v53, %v1652_v17  ;;  %v1238_v56 = vrot.slane %v1206_v37, 7  ;;  %v1514_v51 = vrot.slane %v1206_v37, 6 }
 0x1a1   : > { %2044 = vst.msk [vmem:[#allocation2 + $0x58] sm:$0xf] %vm881_vm14, %v4878_v20  ;;  %1901 = vrot.lane.b32.xlu0 %v4878_v20, %s5396_s28  ;;  %v1756_v46 = vmax.f32 %v1618_v49, %v1724_v3  ;;  %v1449_v58 = vsel %vm1427_vm9, %v1397_v9, -inf  ;;  %v1725_v25 = vsel %vm1703_vm11, %v1673_v35, -inf  ;;  %v1207_v30 = vunpack.c.l.bf16 %v1175_v55 }
 0x1a2   : > { %v1481_v22 = vmax.f32 %v1343_v7, %v1449_v58  ;;  %v1259_v1 = vsel %vm927_vm2, %v1237_v19, %v1238_v56  ;;  %v1535_v53 = vsel %vm957_vm4, %v1513_v11, %v1514_v51  ;;  %v1142_v57 = vmax.bf16 %v1108_v28, %v5981_v47 }
 0x1a3   : > { %v4879_v27 = vpack.c.bf16 %v1756_v46, %v1756_v46  ;;  %v1312_v39 = vsel %vm1290_vm15, %v1259_v1, -inf  ;;  %v1377_v41 = vrot.slane %v1207_v30, 1  ;;  %v1588_v23 = vsel %vm1566_vm5, %v1535_v53, -inf  ;;  %v2063_v1 = vld [vmem:[#allocation2 + $0x14] sm:$0xf] }
 0x1a4   : > { %v1619_v3 = vmax.f32 %v1481_v22, %v1587_v29  ;;  %v1344_v43 = vmax.f32 %v1206_v37, %v1312_v39  ;;  %v1653_v13 = vrot.slane %v1207_v30, 2  ;;  %v1176_v7 = vmax.bf16 %v1142_v57, %v5979_v10  ;;  %v6568_v22 = vld [vmem:[#allocation2 + $0x78] sm:$0xf] }
 0x1a5   : > { %2045 = vst.msk [vmem:[#allocation2 + $0x5c] sm:$0xf] %vm881_vm14, %v4879_v27  ;;  %1903 = vrot.lane.b32.xlu1 %v4879_v27, %s5396_s28  ;;  %v1396_v47 = vsel %vm942_vm3, %v1376_v42, %v1377_v41  ;;  %v1239_v19 = vrot.slane %v1207_v30, 7  ;;  %v1515_v11 = vrot.slane %v1207_v30, 6  ;;  %v1109_v28 = vmax.bf16 %v1075_v45, %v5955_v8  ;;  %v2065_v8 = vld [vmem:[#allocation2 + $0x1c] sm:$0xf] }
 0x1a6   : > { %v1757_v20 = vmax.f32 %v1619_v3, %v1725_v25  ;;  %v1450_v37 = vsel %vm1428_vm0, %v1396_v47, -inf  ;;  %v1672_v10 = vsel %vm972_vm8, %v1652_v17, %v1653_v13  ;;  %v6554_v49 = vunpack.c.l.bf16 %v1176_v7  ;;  %v6582_v7 = vld [vmem:[#allocation2 + $0x24] sm:$0xf] }
 0x1a7   : > { %v1482_v29 = vmax.f32 %v1344_v43, %v1450_v37  ;;  %v1726_v42 = vsel %vm1704_vm6, %v1672_v10, -inf  ;;  %v1258_v55 = vsel %vm927_vm2, %v1238_v56, %v1239_v19  ;;  %v1534_v61 = vsel %vm957_vm4, %v1514_v51, %v1515_v11  ;;  %v2066_v43 = vld [vmem:[#allocation2 + $0x20] sm:$0xf] }
 0x1a8   : > { %v4880_v45 = vpack.c.bf16 %v1757_v20, %v1757_v20  ;;  %v1313_v9 = vsel %vm1289_vm7, %v1258_v55, -inf  ;;  %v1378_v35 = vrot.slane %v6554_v49, 1  ;;  %v1589_v17 = vsel %vm1565_vm10, %v1534_v61, -inf  ;;  %v6602_v55 = vld [vmem:[#allocation2 + $0x2c] sm:$0xf] }
 0x1a9   : > { %v1620_v46 = vmax.f32 %v1482_v29, %v1588_v23  ;;  %v1345_v58 = vmax.f32 %v1207_v30, %v1313_v9  ;;  %v1654_v25 = vrot.slane %v6554_v49, 2  ;;  %v1143_v56 = vmax.bf16 %v6568_v22, %v1109_v28 }
 0x1aa   : > { %2046 = vst.msk [vmem:[#allocation2 + $0x60] sm:$0xf] %vm881_vm14, %v4880_v45  ;;  %1905 = vrot.lane.b32.xlu0 %v4880_v45, %s5396_s28  ;;  %v1395_v51 = vsel %vm942_vm3, %v1377_v41, %v1378_v35  ;;  %v1240_v53 = vrot.slane %v6554_v49, 7  ;;  %v1516_v57 = vrot.slane %v6554_v49, 6  ;;  %v2097_v27 = vmax.bf16 %v2065_v8, %v2063_v1  ;;  %v6605_v45 = vld [vmem:[#allocation2 + $0x30] sm:$0xf] }
 0x1ab   : > { %v1758_v30 = vmax.f32 %v1620_v46, %v1726_v42  ;;  %v1451_v39 = vsel %vm1427_vm9, %v1395_v51, -inf  ;;  %v1671_v23 = vsel %vm972_vm8, %v1653_v13, %v1654_v25  ;;  %v1177_v3 = vmax.bf16 %v1143_v56, %v6021_v44  ;;  %v6594_v13 = vld [vmem:[#allocation2 + $0x28] sm:$0xf]  ;;  %v2064_v42 = vld [vmem:[#allocation2 + $0x18] sm:$0xf] }
 0x1ac   : > { %v1483_v47 = vmax.f32 %v1345_v58, %v1451_v39  ;;  %v1727_v41 = vsel %vm1703_vm11, %v1671_v23, -inf  ;;  %v1257_v28 = vsel %vm927_vm2, %v1239_v19, %v1240_v53  ;;  %v1533_v20 = vsel %vm957_vm4, %v1515_v11, %v1516_v57  ;;  %v6614_v51 = vld [vmem:[#allocation2 + $0x34] sm:$0xf] }
 0x1ad   : > { %v4881_v44 = vpack.c.bf16 %v1758_v30, %v1758_v30  ;;  %v6596_v37 = vunpack.c.l.bf16 %v1177_v3  ;;  %v1314_v10 = vsel %vm1290_vm15, %v1257_v28, -inf  ;;  %v1590_v29 = vsel %vm1566_vm5, %v1533_v20, -inf  ;;  %v6616_v30 = vld [vmem:[#allocation2 + $0x38] sm:$0xf]  ;;  %v6636_v20 = vld [vmem:[#allocation2 + $0x3c] sm:$0xf] }
 0x1ae   : > { %v1621_v19 = vmax.f32 %v1483_v47, %v1589_v17  ;;  %v1346_v61 = vmax.f32 %v6554_v49, %v1314_v10  ;;  %v2098_v11 = vmax.bf16 %v2066_v43, %v2064_v42  ;;  %v2099_v9 = vmax.bf16 %v6582_v7, %v2065_v8 }
 0x1af   : > { %2047 = vst.msk [vmem:[#allocation2 + $0x64] sm:$0xf] %vm881_vm14, %v4881_v44  ;;  %1907 = vrot.lane.b32.xlu1 %v4881_v44, %s5396_s28  ;;  %v1379_v46 = vrot.slane %v6596_v37, 1  ;;  %v1655_v58 = vrot.slane %v6596_v37, 2  ;;  %v2131_v56 = vmax.bf16 %v2097_v27, %v6582_v7  ;;  %v2100_v1 = vmax.bf16 %v6594_v13, %v2066_v43  ;;  %v6639_v44 = vld [vmem:[#allocation2 + $0x40] sm:$0xf] }
 0x1b0   : > { %v1759_v17 = vmax.f32 %v1621_v19, %v1727_v41  ;;  %v2132_v39 = vmax.bf16 %v2098_v11, %v6594_v13  ;;  %v2133_v8 = vmax.bf16 %v2099_v9, %v6602_v55  ;;  %v1076_v23 = vmax.bf16 %v6456_v48, %v6389_v2  ;;  %v6647_v9 = vld [vmem:[#allocation2 + $0x74] sm:$0xf] }
 0x1b1   : > { %v1394_v3 = vsel %vm942_vm3, %v1378_v35, %v1379_v46  ;;  %v1670_v27 = vsel %vm972_vm8, %v1654_v25, %v1655_v58  ;;  %v2165_v43 = vmax.bf16 %v2131_v56, %v6602_v55  ;;  %v2134_v47 = vmax.bf16 %v2100_v1, %v6605_v45 }
 0x1b2   : > { %v4882_v41 = vpack.c.bf16 %v1759_v17, %v1759_v17  ;;  %v1452_v28 = vsel %vm1428_vm0, %v1394_v3, -inf  ;;  %v1728_v2 = vsel %vm1704_vm6, %v1670_v27, -inf  ;;  %v2166_v35 = vmax.bf16 %v2132_v39, %v6605_v45 }
 0x1b3   : > { %v1484_v10 = vmax.f32 %v1346_v61, %v1452_v28  ;;  %v2167_v25 = vmax.bf16 %v2133_v8, %v6614_v51  ;;  %v2199_v42 = vmax.bf16 %v2165_v43, %v6614_v51  ;;  %v2168_v19 = vmax.bf16 %v2134_v47, %v6616_v30  ;;  %v6658_v43 = vld [vmem:[#allocation2 + $0x7c] sm:$0xf] }
 0x1b4   : > { %2048 = vst.msk [vmem:[#allocation2 + $0x68] sm:$0xf] %vm881_vm14, %v4882_v41  ;;  %1909 = vrot.lane.b32.xlu0 %v4882_v41, %s5396_s28  ;;  %v2200_v11 = vmax.bf16 %v2166_v35, %v6616_v30  ;;  %v1110_v56 = vmax.bf16 %v6647_v9, %v1076_v23  ;;  %v1241_v1 = vrot.slane %v6596_v37, 7  ;;  %v1517_v61 = vrot.slane %v6596_v37, 6 }
 0x1b5   : > { %v1622_v17 = vmax.f32 %v1484_v10, %v1590_v29  ;;  %v2201_v39 = vmax.bf16 %v2167_v25, %v6636_v20  ;;  %v6653_v8 = vunpack.c.l.bf16 %v2199_v42  ;;  %v2202_v3 = vmax.bf16 %v2168_v19, %v6639_v44 }
 0x1b6   : > { %v6656_v27 = vunpack.c.l.bf16 %v2200_v11  ;;  %v1144_v47 = vmax.bf16 %v6658_v43, %v1110_v56  ;;  %v1256_v23 = vsel %vm927_vm2, %v1240_v53, %v1241_v1  ;;  %v1532_v29 = vsel %vm957_vm4, %v1516_v57, %v1517_v61 }
 0x1b7   : > { %v1760_v41 = vmax.f32 %v1622_v17, %v1728_v2  ;;  %v6673_v28 = vunpack.c.l.bf16 %v2201_v39  ;;  %v9756_v35 = vrot.slane %v6653_v8, 7  ;;  %v9758_v10 = vrot.slane %v6653_v8, 6 }
 0x1b8   : > { %v2264_v25 = vrot.slane %v6656_v27, 7  ;;  %v9760_v42 = vrot.slane %v6656_v27, 1  ;;  %v2520_v53 = vrot.slane %v6656_v27, 6  ;;  %v9762_v19 = vrot.slane %v6656_v27, 2 }
 0x1b9   : > { %v4883_v11 = vpack.c.bf16 %v1760_v41, %v1760_v41  ;;  %v2393_v49 = vrot.slane %v6673_v28, 1  ;;  %v2649_v57 = vrot.slane %v6673_v28, 2  ;;  %v6683_v2 = vunpack.c.l.bf16 %v2202_v3 }
 0x1ba   : > { %v2315_v56 = vsel %vm927_vm2, %v9756_v35, %v2264_v25  ;;  %v2571_v17 = vsel %vm957_vm4, %v9758_v10, %v2520_v53  ;;  %v2265_v39 = vrot.slane %v6673_v28, 7  ;;  %v2521_v41 = vrot.slane %v6673_v28, 6 }
 0x1bb   : > { %2049 = vst.msk [vmem:[#allocation2 + $0x6c] sm:$0xf] %vm881_vm14, %v4883_v11  ;;  %1911 = vrot.lane.b32.xlu1 %v4883_v11, %s5396_s28  ;;  %v2328_v3 = vsel %vm1289_vm7, %v2315_v56, -inf  ;;  %v2442_v35 = vsel %vm942_vm3, %v9760_v42, %v2393_v49  ;;  %v2584_v63 = vsel %vm1565_vm10, %v2571_v17, -inf  ;;  %v2698_v10 = vsel %vm972_vm8, %v9762_v19, %v2649_v57 }
 0x1bc   : > { %v2360_v34 = vmax.f32 %v6656_v27, %v2328_v3  ;;  %v2456_v11 = vsel %vm1427_vm9, %v2442_v35, -inf  ;;  %v2712_v56 = vsel %vm1703_vm11, %v2698_v10, -inf  ;;  %v2314_v42 = vsel %vm927_vm2, %v2264_v25, %v2265_v39 }
 0x1bd   : > { %v2329_v17 = vsel %vm1290_vm15, %v2314_v42, -inf  ;;  %v2394_v26 = vrot.slane %v6683_v2, 1  ;;  %v2570_v3 = vsel %vm957_vm4, %v2520_v53, %v2521_v41  ;;  %v2650_v35 = vrot.slane %v6683_v2, 2 }
 0x1be   : > { %v2488_v19 = vmax.f32 %v2360_v34, %v2456_v11  ;;  %v2361_v10 = vmax.f32 %v6673_v28, %v2329_v17  ;;  %v2585_v16 = vsel %vm1566_vm5, %v2570_v3, -inf  ;;  %v1178_v25 = vmax.bf16 %v1144_v47, %v6041_v12 }
 0x1bf   : > { %v2441_v42 = vsel %vm942_vm3, %v2393_v49, %v2394_v26  ;;  %v2697_v53 = vsel %vm972_vm8, %v2649_v57, %v2650_v35  ;;  %v1315_v34 = vsel %vm1289_vm7, %v1256_v23, -inf  ;;  %v1591_v11 = vsel %vm1565_vm10, %v1532_v29, -inf }
 0x1c0   : > { %v2616_v17 = vmax.f32 %v2488_v19, %v2584_v63  ;;  %v2457_v47 = vsel %vm1428_vm0, %v2441_v42, -inf  ;;  %v2713_v3 = vsel %vm1704_vm6, %v2697_v53, -inf  ;;  %v6746_v0 = vunpack.c.l.bf16 %v1178_v25 }
 0x1c1   : > { %v2489_v49 = vmax.f32 %v2361_v10, %v2457_v47  ;;  %v1347_v18 = vmax.f32 %v6596_v37, %v1315_v34  ;;  %v1077_v57 = vmax.bf16 %v5366_v36, %v6424_v32  ;;  %v2101_v23 = vmax.bf16 %v6602_v55, %v6582_v7 }
 0x1c2   : > { %v2744_v21 = vmax.f32 %v2616_v17, %v2712_v56  ;;  %v1380_v63 = vrot.slane %v6746_v0, 1  ;;  %v1656_v29 = vrot.slane %v6746_v0, 2  ;;  %v1242_v19 = vrot.slane %v6746_v0, 7  ;;  %v6776_v17 = vld [vmem:[#allocation2 + $0x44] sm:$0xf] }
 0x1c3   : > { %v2617_v42 = vmax.f32 %v2489_v49, %v2585_v16  ;;  %v1111_v25 = vmax.bf16 %v6568_v22, %v1077_v57  ;;  %v1518_v10 = vrot.slane %v6746_v0, 6  ;;  %v2135_v53 = vmax.bf16 %v2101_v23, %v6614_v51  ;;  %v5368_v57 = vld [vmem:[#allocation2 + $0x88] sm:$0xf] }
 0x1c4   : > { %v4898_v34 = vpack.c.bf16 %v2744_v21, %v2744_v21  ;;  %v1393_v36 = vsel %vm942_vm3, %v1379_v46, %v1380_v63  ;;  %v1669_v32 = vsel %vm972_vm8, %v1655_v58, %v1656_v29  ;;  %v1255_v16 = vsel %vm927_vm2, %v1241_v1, %v1242_v19  ;;  %v5367_v46 = vld [vmem:[#allocation2 + $0x80] sm:$0xf] }
 0x1c5   : > { %v2745_v22 = vmax.f32 %v2617_v42, %v2713_v3  ;;  %v1453_v21 = vsel %vm1427_vm9, %v1393_v36, -inf  ;;  %v1729_v7 = vsel %vm1703_vm11, %v1669_v32, -inf  ;;  %v1145_v56 = vmax.bf16 %v5367_v46, %v1111_v25 }
 0x1c6   : > { %2878 = vrot.lane.b32.xlu0 %v4898_v34, %s5397_s29  ;;  %3033 = vst.msk [vmem:[#allocation2 + $0x28] sm:$0xf] %vm881_vm14, %v4898_v34  ;;  %v1485_v58 = vmax.f32 %v1347_v18, %v1453_v21  ;;  %v1316_v1 = vsel %vm1290_vm15, %v1255_v16, -inf  ;;  %v1531_v47 = vsel %vm957_vm4, %v1517_v61, %v1518_v10  ;;  %v2169_v3 = vmax.bf16 %v2135_v53, %v6636_v20 }
 0x1c7   : > { %v4899_v49 = vpack.c.bf16 %v2745_v22, %v2745_v22  ;;  %v1179_v23 = vmax.bf16 %v5368_v57, %v1145_v56  ;;  %v1348_v42 = vmax.f32 %v6746_v0, %v1316_v1  ;;  %v1592_v18 = vsel %vm1566_vm5, %v1531_v47, -inf }
 0x1c8   : > { %v1623_v25 = vmax.f32 %v1485_v58, %v1591_v11  ;;  %v2203_v34 = vmax.bf16 %v2169_v3, %v6776_v17  ;;  %v2266_v36 = vrot.slane %v6683_v2, 7  ;;  %v2522_v37 = vrot.slane %v6683_v2, 6 }
 0x1c9   : > { %2880 = vrot.lane.b32.xlu1 %v4899_v49, %s5397_s29  ;;  %3034 = vst.msk [vmem:[#allocation2 + $0x2c] sm:$0xf] %vm881_vm14, %v4899_v49  ;;  %v6797_v61 = vunpack.c.l.bf16 %v1179_v23  ;;  %v2102_v53 = vmax.bf16 %v6605_v45, %v6594_v13  ;;  %v1078_v32 = vmax.bf16 %v6647_v9, %v6456_v48  ;;  %v1383_v11 = vrot.slane %v6068_v33, 1 }
 0x1ca   : > { %v1761_v16 = vmax.f32 %v1623_v25, %v1729_v7  ;;  %v6804_v22 = vunpack.c.l.bf16 %v2203_v34  ;;  %v2313_v21 = vsel %vm927_vm2, %v2265_v39, %v2266_v36  ;;  %v2569_v46 = vsel %vm957_vm4, %v2521_v41, %v2522_v37  ;;  %v6847_v25 = vld [vmem:[#allocation2 + $0x48] sm:$0xf] }
 0x1cb   : > { %v1381_v56 = vrot.slane %v6797_v61, 1  ;;  %v1657_v58 = vrot.slane %v6797_v61, 2  ;;  %v2330_v48 = vsel %vm1289_vm7, %v2313_v21, -inf  ;;  %v2586_v9 = vsel %vm1565_vm10, %v2569_v46, -inf }
 0x1cc   : > { %v4884_v7 = vpack.c.bf16 %v1761_v16, %v1761_v16  ;;  %v2362_v1 = vmax.f32 %v6683_v2, %v2330_v48  ;;  %v2395_v39 = vrot.slane %v6804_v22, 1  ;;  %v2651_v28 = vrot.slane %v6804_v22, 2 }
 0x1cd   : > { %v1392_v41 = vsel %vm942_vm3, %v1380_v63, %v1381_v56  ;;  %v1668_v47 = vsel %vm972_vm8, %v1656_v29, %v1657_v58  ;;  %v2136_v3 = vmax.bf16 %v2102_v53, %v6616_v30  ;;  %v2267_v49 = vrot.slane %v6804_v22, 7 }
 0x1ce   : > { %2050 = vst.msk [vmem:[#allocation2 + $0x70] sm:$0xf] %vm881_vm14, %v4884_v7  ;;  %1913 = vrot.lane.b32.xlu0 %v4884_v7, %s5396_s28  ;;  %v1454_v57 = vsel %vm1428_vm0, %v1392_v41, -inf  ;;  %v1730_v23 = vsel %vm1704_vm6, %v1668_v47, -inf  ;;  %v2440_v63 = vsel %vm942_vm3, %v2394_v26, %v2395_v39  ;;  %v2696_v29 = vsel %vm972_vm8, %v2650_v35, %v2651_v28 }
 0x1cf   : > { %v1486_v34 = vmax.f32 %v1348_v42, %v1454_v57  ;;  %v2458_v53 = vsel %vm1427_vm9, %v2440_v63, -inf  ;;  %v2714_v16 = vsel %vm1703_vm11, %v2696_v29, -inf  ;;  %v2170_v21 = vmax.bf16 %v2136_v3, %v6639_v44  ;;  %v5369_v63 = vld [vmem:[#allocation2 + $0x8c] sm:$0xf] }
 0x1d0   : > { %v2490_v46 = vmax.f32 %v2362_v1, %v2458_v53  ;;  %v2312_v26 = vsel %vm927_vm2, %v2266_v36, %v2267_v49  ;;  %v2523_v2 = vrot.slane %v6804_v22, 6  ;;  %v1112_v35 = vmax.bf16 %v6658_v43, %v1078_v32 }
 0x1d1   : > { %v1624_v48 = vmax.f32 %v1486_v34, %v1592_v18  ;;  %v2204_v42 = vmax.bf16 %v2170_v21, %v6847_v25  ;;  %v2331_v7 = vsel %vm1290_vm15, %v2312_v26, -inf  ;;  %v1243_v41 = vrot.slane %v6797_v61, 7 }
 0x1d2   : > { %v2618_v47 = vmax.f32 %v2490_v46, %v2586_v9  ;;  %v2363_v1 = vmax.f32 %v6804_v22, %v2331_v7  ;;  %v2568_v36 = vsel %vm957_vm4, %v2522_v37, %v2523_v2  ;;  %v1146_v3 = vmax.bf16 %v1112_v35, %v6041_v12 }
 0x1d3   : > { %v1762_v57 = vmax.f32 %v1624_v48, %v1730_v23  ;;  %v6870_v43 = vunpack.c.l.bf16 %v2204_v42  ;;  %v2587_v18 = vsel %vm1566_vm5, %v2568_v36, -inf  ;;  %v1254_v32 = vsel %vm927_vm2, %v1242_v19, %v1243_v41 }
 0x1d4   : > { %v2746_v9 = vmax.f32 %v2618_v47, %v2714_v16  ;;  %v1180_v29 = vmax.bf16 %v5369_v63, %v1146_v3  ;;  %v1317_v34 = vsel %vm1289_vm7, %v1254_v32, -inf  ;;  %v9854_v37 = vrot.slane %v6093_v62, 1 }
 0x1d5   : > { %v4885_v23 = vpack.c.bf16 %v1762_v57, %v1762_v57  ;;  %v2396_v53 = vrot.slane %v6870_v43, 1  ;;  %v2652_v21 = vrot.slane %v6870_v43, 2  ;;  %v1349_v19 = vmax.f32 %v6797_v61, %v1317_v34 }
 0x1d6   : > { %v1389_v12 = vsel %vm942_vm3, %v1383_v11, %v9854_v37  ;;  %v4900_v16 = vpack.c.bf16 %v2746_v9, %v2746_v9  ;;  %v1212_v46 = vunpack.c.l.bf16 %v1180_v29  ;;  %v1519_v35 = vrot.slane %v6797_v61, 6 }
 0x1d7   : > { %v1457_v26 = vsel %vm1427_vm9, %v1389_v12, -inf  ;;  %2051 = vst.msk [vmem:[#allocation2 + $0x74] sm:$0xf] %vm881_vm14, %v4885_v23  ;;  %1915 = vrot.lane.b32.xlu1 %v4885_v23, %s5396_s28  ;;  %v2439_v48 = vsel %vm942_vm3, %v2395_v39, %v2396_v53  ;;  %v2695_v42 = vsel %vm972_vm8, %v2651_v28, %v2652_v21  ;;  %v1659_v7 = vrot.slane %v6068_v33, 2 }
 0x1d8   : > { %v2103_v47 = vmax.bf16 %v6614_v51, %v6602_v55  ;;  %3035 = vst.msk [vmem:[#allocation2 + $0x30] sm:$0xf] %vm881_vm14, %v4900_v16  ;;  %2882 = vrot.lane.b32.xlu0 %v4900_v16, %s5397_s29  ;;  %v2459_v36 = vsel %vm1428_vm0, %v2439_v48, -inf  ;;  %v2715_v39 = vsel %vm1704_vm6, %v2695_v42, -inf  ;;  %v1244_v3 = vrot.slane %v1212_v46, 7 }
 0x1d9   : > { %v1382_v57 = vrot.slane %v1212_v46, 1  ;;  %v2491_v32 = vmax.f32 %v2363_v1, %v2459_v36  ;;  %v1520_v9 = vrot.slane %v1212_v46, 6  ;;  %v1530_v28 = vsel %vm957_vm4, %v1518_v10, %v1519_v35 }
 0x1da   : > { %v1658_v63 = vrot.slane %v1212_v46, 2  ;;  %v9855_v29 = vrot.slane %v6068_v33, 7  ;;  %v1253_v37 = vsel %vm927_vm2, %v1243_v41, %v1244_v3  ;;  %v2137_v61 = vmax.bf16 %v2103_v47, %v6636_v20 }
 0x1db   : > { %v1390_v1 = vsel %vm942_vm3, %v1382_v57, %v1383_v11  ;;  %v1391_v0 = vsel %vm942_vm3, %v1381_v56, %v1382_v57  ;;  %v2619_v10 = vmax.f32 %v2491_v32, %v2587_v18  ;;  %v1318_v12 = vsel %vm1290_vm15, %v1253_v37, -inf }
 0x1dc   : > { %v1252_v34 = vsel %vm927_vm2, %v1244_v3, %v9855_v29  ;;  %v1455_v41 = vsel %vm1427_vm9, %v1391_v0, -inf  ;;  %v1350_v16 = vmax.f32 %v1212_v46, %v1318_v12  ;;  %v1456_v11 = vsel %vm1428_vm0, %v1390_v1, -inf }
 0x1dd   : > { %v1319_v23 = vsel %vm1289_vm7, %v1252_v34, -inf  ;;  %v1487_v42 = vmax.f32 %v1349_v19, %v1455_v41  ;;  %v2747_v36 = vmax.f32 %v2619_v10, %v2715_v39  ;;  %v9856_v56 = vrot.slane %v6068_v33, 6 }
 0x1de   : > { %v1351_v48 = vmax.f32 %v6068_v33, %v1319_v23  ;;  %v1529_v3 = vsel %vm957_vm4, %v1519_v35, %v1520_v9  ;;  %v1593_v57 = vsel %vm1565_vm10, %v1530_v28, -inf  ;;  %v1488_v32 = vmax.f32 %v1350_v16, %v1456_v11  ;;  %v6971_v23 = vld [vmem:[#allocation2 + $0x4c] sm:$0xf] }
 0x1df   : > { %v1528_v18 = vsel %vm957_vm4, %v1520_v9, %v9856_v56  ;;  %v1594_v29 = vsel %vm1566_vm5, %v1529_v3, -inf  ;;  %v4901_v39 = vpack.c.bf16 %v2747_v36, %v2747_v36  ;;  %v1625_v34 = vmax.f32 %v1487_v42, %v1593_v57 }
 0x1e0   : > { %v1489_v46 = vmax.f32 %v1351_v48, %v1457_v26  ;;  %v1595_v19 = vsel %vm1565_vm10, %v1528_v18, -inf  ;;  %v9857_v33 = vrot.slane %v6093_v62, 2  ;;  %v1666_v35 = vsel %vm972_vm8, %v1658_v63, %v1659_v7  ;;  %v6983_v18 = vld [vmem:[#allocation2 + $0x50] sm:$0xf] }
 0x1e1   : > { %v1626_v9 = vmax.f32 %v1488_v32, %v1594_v29  ;;  %v1667_v26 = vsel %vm972_vm8, %v1657_v58, %v1658_v63  ;;  %v1732_v1 = vsel %vm1704_vm6, %v1666_v35, -inf  ;;  %3036 = vst.msk [vmem:[#allocation2 + $0x34] sm:$0xf] %vm881_vm14, %v4901_v39  ;;  %2884 = vrot.lane.b32.xlu1 %v4901_v39, %s5397_s29  ;;  %v2104_v10 = vmax.bf16 %v6616_v30, %v6605_v45  ;;  %v1152_v35 = vld [vmem:[#allocation2 + $0x9c] sm:$0xf] }
 0x1e2   : > { %v1665_v37 = vsel %vm972_vm8, %v1659_v7, %v9857_v33  ;;  %v1627_v28 = vmax.f32 %v1489_v46, %v1595_v19  ;;  %v1731_v0 = vsel %vm1703_vm11, %v1667_v26, -inf  ;;  %v2268_v41 = vrot.slane %v6870_v43, 7  ;;  %v5370_v33 = vld [vmem:[#allocation2 + $0x94] sm:$0xf] }
 0x1e3   : > { %v1733_v7 = vsel %vm1703_vm11, %v1665_v37, -inf  ;;  %v1763_v12 = vmax.f32 %v1625_v34, %v1731_v0  ;;  %v1764_v58 = vmax.f32 %v1626_v9, %v1732_v1  ;;  %v2138_v16 = vmax.bf16 %v2104_v10, %v6639_v44  ;;  %v7012_v34 = vld [vmem:[#allocation2 + $0x54] sm:$0xf] }
 0x1e4   : > { %v1765_v63 = vmax.f32 %v1627_v28, %v1733_v7  ;;  %v2171_v48 = vmax.bf16 %v2137_v61, %v6776_v17  ;;  %v2524_v11 = vrot.slane %v6870_v43, 6  ;;  %v2105_v42 = vmax.bf16 %v6636_v20, %v6614_v51 }
 0x1e5   : > { %v4886_v36 = vpack.c.bf16 %v1763_v12, %v1763_v12  ;;  %v6979_v56 = vpack.c.bf16 %v1764_v58, %v1764_v58  ;;  %v2311_v3 = vsel %vm927_vm2, %v2267_v49, %v2268_v41  ;;  %v2172_v57 = vmax.bf16 %v2138_v16, %v6847_v25 }
 0x1e6   : > { %v6981_v47 = vpack.c.bf16 %v1765_v63, %v1765_v63  ;;  %v2205_v32 = vmax.bf16 %v2171_v48, %v6971_v23  ;;  %v2332_v46 = vsel %vm1289_vm7, %v2311_v3, -inf  ;;  %v2567_v51 = vsel %vm957_vm4, %v2523_v2, %v2524_v11 }
 0x1e7   : > { %9858 = vst [vmem:[#allocation5_spill] sm:$0xff] %v6979_v56  ;;  %2052 = vst.msk [vmem:[#allocation2 + $0x78] sm:$0xf] %vm881_vm14, %v4886_v36  ;;  %1917 = vrot.lane.b32.xlu0 %v4886_v36, %s5396_s28  ;;  %v2364_v49 = vmax.f32 %v6870_v43, %v2332_v46  ;;  %v2588_v29 = vsel %vm1565_vm10, %v2567_v51, -inf  ;;  %v2106_v22 = vmax.bf16 %v6639_v44, %v6616_v30  ;;  %v1247_v9 = vrot.slane %v6080_v50, 7 }
 0x1e8   : > { %9859 = vst [vmem:[#allocation6_spill] sm:$0xff] %v6981_v47  ;;  %2053 = vst.msk [vmem:[#allocation2 + $0x7c] sm:$0xf] %vm881_vm14, %v6979_v56  ;;  %v2139_v2 = vmax.bf16 %v2105_v42, %v6776_v17  ;;  %v2206_v19 = vmax.bf16 %v2172_v57, %v6983_v18  ;;  %v7010_v39 = vunpack.c.l.bf16 %v2205_v32  ;;  %v1150_v37 = vmax.bf16 %v5370_v33, %v6066_v40  ;;  %v7050_v46 = vld [vmem:[#allocation2 + $0x58] sm:$0xf] }
 0x1e9   : > { %2054 = vst.msk [vmem:[#allocation2 + $0x80] sm:$0xf] %vm881_vm14, %v6981_v47  ;;  %v2140_v28 = vmax.bf16 %v2106_v22, %v6847_v25  ;;  %v1355_v30 = vrot.slane %v5794_v5, 1  ;;  %v1523_v1 = vrot.slane %v6080_v50, 6 }
 0x1ea   : > { %v2173_v26 = vmax.bf16 %v2139_v2, %v6971_v23  ;;  %v7020_v0 = vunpack.c.l.bf16 %v2206_v19  ;;  %v2269_v7 = vrot.slane %v7010_v39, 7  ;;  %v2397_v10 = vrot.slane %v7010_v39, 1 }
 0x1eb   : > { %v2525_v61 = vrot.slane %v7010_v39, 6  ;;  %v2653_v40 = vrot.slane %v7010_v39, 2  ;;  %v2174_v12 = vmax.bf16 %v2140_v28, %v6983_v18  ;;  %v1184_v63 = vmax.bf16 %v1152_v35, %v1150_v37 }
 0x1ec   : > { %v2207_v58 = vmax.bf16 %v2173_v26, %v7012_v34  ;;  %v2310_v16 = vsel %vm927_vm2, %v2268_v41, %v2269_v7  ;;  %v2398_v48 = vrot.slane %v7020_v0, 1  ;;  %v2654_v36 = vrot.slane %v7020_v0, 2 }
 0x1ed   : > { %v2566_v42 = vsel %vm957_vm4, %v2524_v11, %v2525_v61  ;;  %v2333_v3 = vsel %vm1290_vm15, %v2310_v16, -inf  ;;  %v2438_v41 = vsel %vm942_vm3, %v2396_v53, %v2397_v10  ;;  %v2694_v32 = vsel %vm972_vm8, %v2652_v21, %v2653_v40 }
 0x1ee   : > { %v2589_v57 = vsel %vm1566_vm5, %v2566_v42, -inf  ;;  %v2365_v11 = vmax.f32 %v7010_v39, %v2333_v3  ;;  %v2437_v51 = vsel %vm942_vm3, %v2397_v10, %v2398_v48  ;;  %v2693_v22 = vsel %vm972_vm8, %v2653_v40, %v2654_v36 }
 0x1ef   : > { %v2460_v43 = vsel %vm1427_vm9, %v2438_v41, -inf  ;;  %v2461_v53 = vsel %vm1428_vm0, %v2437_v51, -inf  ;;  %v2717_v21 = vsel %vm1704_vm6, %v2693_v22, -inf  ;;  %v2716_v19 = vsel %vm1703_vm11, %v2694_v32, -inf }
 0x1f0   : > { %v2492_v2 = vmax.f32 %v2364_v49, %v2460_v43  ;;  %v2493_v33 = vmax.f32 %v2365_v11, %v2461_v53  ;;  %v2208_v37 = vmax.bf16 %v2174_v12, %v7050_v46  ;;  %v7070_v35 = vunpack.c.l.bf16 %v2207_v58 }
 0x1f1   : > { %v2270_v28 = vrot.slane %v7020_v0, 7  ;;  %v2526_v10 = vrot.slane %v7020_v0, 6  ;;  %v7074_v40 = vunpack.c.l.bf16 %v1184_v63  ;;  %v9860_v16 = vrot.slane %v6093_v62, 7 }
 0x1f2   : > { %v2620_v26 = vmax.f32 %v2492_v2, %v2588_v29  ;;  %v2621_v42 = vmax.f32 %v2493_v33, %v2589_v57  ;;  %v7080_v3 = vunpack.c.l.bf16 %v2208_v37  ;;  %v2271_v41 = vrot.slane %v7070_v35, 7 }
 0x1f3   : > { %v1250_v49 = vsel %vm927_vm2, %v9860_v16, %v1247_v9  ;;  %v2399_v12 = vrot.slane %v7070_v35, 1  ;;  %v2527_v32 = vrot.slane %v7070_v35, 6  ;;  %v2655_v29 = vrot.slane %v7070_v35, 2 }
 0x1f4   : > { %v2748_v58 = vmax.f32 %v2620_v26, %v2716_v19  ;;  %v1248_v63 = vrot.slane %v7074_v40, 7  ;;  %v2749_v11 = vmax.f32 %v2621_v42, %v2717_v21  ;;  %v2308_v57 = vsel %vm927_vm2, %v2270_v28, %v2271_v41 }
 0x1f5   : > { %v9769_v51 = vrot.slane %v7080_v3, 1  ;;  %v9768_v22 = vrot.slane %v7080_v3, 2  ;;  %v2335_v53 = vsel %vm1290_vm15, %v2308_v57, -inf  ;;  %v2564_v21 = vsel %vm957_vm4, %v2526_v10, %v2527_v32 }
 0x1f6   : > { %v4902_v43 = vpack.c.bf16 %v2748_v58, %v2748_v58  ;;  %v1249_v2 = vsel %vm927_vm2, %v1247_v9, %v1248_v63  ;;  %v4903_v19 = vpack.c.bf16 %v2749_v11, %v2749_v11  ;;  %v2367_v33 = vmax.f32 %v7070_v35, %v2335_v53 }
 0x1f7   : > { %v2435_v37 = vsel %vm942_vm3, %v2399_v12, %v9769_v51  ;;  %v2591_v26 = vsel %vm1566_vm5, %v2564_v21, -inf  ;;  %v2691_v16 = vsel %vm972_vm8, %v2655_v29, %v9768_v22  ;;  %v9861_v42 = vrot.slane %v5794_v5, 7 }
 0x1f8   : > { %3037 = vst.msk [vmem:[#allocation2 + $0x38] sm:$0xf] %vm881_vm14, %v4902_v43  ;;  %2886 = vrot.lane.b32.xlu0 %v4902_v43, %s5397_s29  ;;  %v2463_v9 = vsel %vm1428_vm0, %v2435_v37, -inf  ;;  %v1321_v11 = vsel %vm1289_vm7, %v1250_v49, -inf  ;;  %3038 = vst.msk [vmem:[#allocation2 + $0x3c] sm:$0xf] %vm881_vm14, %v4903_v19  ;;  %2888 = vrot.lane.b32.xlu1 %v4903_v19, %s5397_s29 }
 0x1f9   : > { %v1280_v58 = vsel %vm927_vm2, %v1248_v63, %v9861_v42  ;;  %v2495_v57 = vmax.f32 %v2367_v33, %v2463_v9  ;;  %v2719_v43 = vsel %vm1704_vm6, %v2691_v16, -inf  ;;  %v1322_v21 = vsel %vm1290_vm15, %v1249_v2, -inf }
 0x1fa   : > { %v1291_v53 = vsel %vm1289_vm7, %v1280_v58, -inf  ;;  %v1353_v63 = vmax.f32 %v6080_v50, %v1321_v11  ;;  %v1354_v49 = vmax.f32 %v7074_v40, %v1322_v21  ;;  %v1386_v42 = vrot.slane %v7074_v40, 1 }
 0x1fb   : > { %v1323_v37 = vmax.f32 %v5794_v5, %v1291_v53  ;;  %v2623_v22 = vmax.f32 %v2495_v57, %v2591_v26  ;;  %v9862_v19 = vrot.slane %v5799_v14, 1  ;;  %v1524_v9 = vrot.slane %v7074_v40, 6 }
 0x1fc   : > { %v9863_v2 = vrot.slane %v6093_v62, 6  ;;  %v9864_v58 = vrot.slane %v6080_v50, 1  ;;  %v1418_v11 = vsel %vm942_vm3, %v1386_v42, %v1355_v30 }
 0x1fd   : > { %v1417_v33 = vsel %vm942_vm3, %v1355_v30, %v9862_v19  ;;  %v2751_v62 = vmax.f32 %v2623_v22, %v2719_v43  ;;  %v1460_v19 = vsel %vm1428_vm0, %v1418_v11, -inf  ;;  %v1525_v30 = vsel %vm957_vm4, %v1523_v1, %v1524_v9 }
 0x1fe   : > { %v1526_v16 = vsel %vm957_vm4, %v9863_v2, %v1523_v1  ;;  %v1387_v26 = vsel %vm942_vm3, %v9864_v58, %v1386_v42  ;;  %v1429_v57 = vsel %vm1427_vm9, %v1417_v33, -inf  ;;  %v1492_v51 = vmax.f32 %v1354_v49, %v1460_v19 }
 0x1ff   : > { %v1597_v53 = vsel %vm1565_vm10, %v1526_v16, -inf  ;;  %v1459_v21 = vsel %vm1427_vm9, %v1387_v26, -inf  ;;  %v1461_v2 = vmax.f32 %v1323_v37, %v1429_v57  ;;  %v9865_v42 = vrot.slane %v5794_v5, 6 }
 0x200   : > { %v1491_v58 = vmax.f32 %v1353_v63, %v1459_v21  ;;  %v4905_v22 = vpack.c.bf16 %v2751_v62, %v2751_v62  ;;  %v1598_v16 = vsel %vm1566_vm5, %v1525_v30, -inf  ;;  %v1631_v37 = vrot.slane %v5794_v5, 2  ;;  %v7210_v30 = vld [vmem:[#allocation2 + $0x5c] sm:$0xf] }
 0x201   : > { %v1556_v33 = vsel %vm957_vm4, %v1524_v9, %v9865_v42  ;;  %v1630_v26 = vmax.f32 %v1492_v51, %v1598_v16  ;;  %v1662_v11 = vrot.slane %v7074_v40, 2  ;;  %v9866_v1 = vrot.slane %v5799_v14, 2 }
 0x202   : > { %v1567_v43 = vsel %vm1565_vm10, %v1556_v33, -inf  ;;  %v1629_v49 = vmax.f32 %v1491_v58, %v1597_v53  ;;  %3040 = vst.msk [vmem:[#allocation2 + $0x44] sm:$0xf] %vm881_vm14, %v4905_v22  ;;  %2892 = vrot.lane.b32.xlu1 %v4905_v22, %s5397_s29  ;;  %v2107_v57 = vmax.bf16 %v6776_v17, %v6636_v20  ;;  %v2108_v5 = vmax.bf16 %v6847_v25, %v6639_v44 }
 0x203   : > { %v1599_v63 = vmax.f32 %v1461_v2, %v1567_v43  ;;  %v1693_v9 = vsel %vm972_vm8, %v1631_v37, %v9866_v1  ;;  %v2272_v53 = vrot.slane %v7080_v3, 7  ;;  %v9867_v51 = vrot.slane %v6080_v50, 2  ;;  %v7219_v43 = vld [vmem:[#allocation2 + $0x60] sm:$0xf] }
 0x204   : > { %v1694_v62 = vsel %vm972_vm8, %v1662_v11, %v1631_v37  ;;  %v1705_v14 = vsel %vm1703_vm11, %v1693_v9, -inf  ;;  %v2528_v21 = vrot.slane %v7080_v3, 6  ;;  %v2141_v50 = vmax.bf16 %v2107_v57, %v6971_v23 }
 0x205   : > { %v1663_v40 = vsel %vm972_vm8, %v9867_v51, %v1662_v11  ;;  %v1736_v44 = vsel %vm1704_vm6, %v1694_v62, -inf  ;;  %v1737_v19 = vmax.f32 %v1599_v63, %v1705_v14  ;;  %v2142_v42 = vmax.bf16 %v2108_v5, %v6983_v18 }
 0x206   : > { %v1735_v20 = vsel %vm1703_vm11, %v1663_v40, -inf  ;;  %v1768_v58 = vmax.f32 %v1630_v26, %v1736_v44  ;;  %v2309_v33 = vsel %vm927_vm2, %v2269_v7, %v2270_v28  ;;  %v2175_v16 = vmax.bf16 %v2141_v50, %v7012_v34 }
 0x207   : > { %v1767_v2 = vmax.f32 %v1629_v49, %v1735_v20  ;;  %v4860_v22 = vpack.c.bf16 %v1737_v19, %v1737_v19  ;;  %v2334_v37 = vsel %vm1289_vm7, %v2309_v33, -inf  ;;  %v2436_v63 = vsel %vm942_vm3, %v2398_v48, %v2399_v12 }
 0x208   : > { %v7232_v26 = vpack.c.bf16 %v1768_v58, %v1768_v58  ;;  %v2176_v7 = vmax.bf16 %v2142_v42, %v7050_v46  ;;  %v2366_v28 = vmax.f32 %v7020_v0, %v2334_v37  ;;  %v2209_v11 = vmax.bf16 %v2175_v16, %v7210_v30 }
 0x209   : > { %v7230_v49 = vpack.c.bf16 %v1767_v2, %v1767_v2  ;;  %2026 = vst.msk [vmem:[#allocation2 + $0x10] sm:$0xf] %vm881_vm14, %v4860_v22  ;;  %1865 = vrot.lane.b32.xlu0 %v4860_v22, %s5396_s28  ;;  %v2462_v1 = vsel %vm1427_vm9, %v2436_v63, -inf  ;;  %v2565_v48 = vsel %vm957_vm4, %v2525_v61, %v2526_v10  ;;  %v2692_v12 = vsel %vm972_vm8, %v2654_v36, %v2655_v29 }
 0x20a   : > { %9869 = vst [vmem:[#allocation8_spill] sm:$0xff] %v7232_v26  ;;  %2057 = vst.msk [vmem:[#allocation2 + $0x8c] sm:$0xf] %vm881_vm14, %v7232_v26  ;;  %v2210_v9 = vmax.bf16 %v2176_v7, %v7219_v43  ;;  %v2494_v57 = vmax.f32 %v2366_v28, %v2462_v1  ;;  %v2590_v39 = vsel %vm1565_vm10, %v2565_v48, -inf  ;;  %v2718_v61 = vsel %vm1703_vm11, %v2692_v12, -inf }
 0x20b   : > { %9868 = vst [vmem:[#allocation7_spill] sm:$0xff] %v7230_v49  ;;  %2056 = vst.msk [vmem:[#allocation2 + $0x88] sm:$0xf] %vm881_vm14, %v7230_v49  ;;  %v2241_v10 = vunpack.c.l.bf16 %v2209_v11  ;;  %v2109_v0 = vmax.bf16 %v6971_v23, %v6776_v17  ;;  %v2110_v36 = vmax.bf16 %v6983_v18, %v6847_v25  ;;  %v2307_v29 = vsel %vm927_vm2, %v2271_v41, %v2272_v53  ;;  %v7303_v7 = vld [vmem:[#allocation2 + $0x64] sm:$0xf] }
 0x20c   : > { %v7270_v5 = vunpack.c.l.bf16 %v2210_v9  ;;  %v2622_v51 = vmax.f32 %v2494_v57, %v2590_v39  ;;  %v2336_v40 = vsel %vm1289_vm7, %v2307_v29, -inf  ;;  %v2563_v62 = vsel %vm957_vm4, %v2527_v32, %v2528_v21  ;;  %v7305_v28 = vld [vmem:[#allocation2 + $0x68] sm:$0xf] }
 0x20d   : > { %v2273_v17 = vrot.slane %v2241_v10, 7  ;;  %v2401_v14 = vrot.slane %v2241_v10, 1  ;;  %v2529_v20 = vrot.slane %v2241_v10, 6  ;;  %v2657_v25 = vrot.slane %v2241_v10, 2 }
 0x20e   : > { %v2402_v44 = vrot.slane %v7270_v5, 1  ;;  %v2658_v19 = vrot.slane %v7270_v5, 2  ;;  %v2750_v41 = vmax.f32 %v2622_v51, %v2718_v61  ;;  %v2143_v50 = vmax.bf16 %v2109_v0, %v7012_v34 }
 0x20f   : > { %v2306_v2 = vsel %vm927_vm2, %v2272_v53, %v2273_v17  ;;  %v2562_v35 = vsel %vm957_vm4, %v2528_v21, %v2529_v20  ;;  %v2144_v58 = vmax.bf16 %v2110_v36, %v7050_v46  ;;  %v2274_v32 = vrot.slane %v7270_v5, 7 }
 0x210   : > { %v2337_v42 = vsel %vm1290_vm15, %v2306_v2, -inf  ;;  %v2433_v33 = vsel %vm942_vm3, %v2401_v14, %v2402_v44  ;;  %v2593_v22 = vsel %vm1566_vm5, %v2562_v35, -inf  ;;  %v2689_v53 = vsel %vm972_vm8, %v2657_v25, %v2658_v19 }
 0x211   : > { %v2369_v21 = vmax.f32 %v2241_v10, %v2337_v42  ;;  %v2465_v16 = vsel %vm1428_vm0, %v2433_v33, -inf  ;;  %v2721_v37 = vsel %vm1704_vm6, %v2689_v53, -inf  ;;  %v4904_v63 = vpack.c.bf16 %v2750_v41, %v2750_v41 }
 0x212   : > { %v2177_v11 = vmax.bf16 %v2143_v50, %v7210_v30  ;;  %v2178_v1 = vmax.bf16 %v2144_v58, %v7219_v43  ;;  %v2530_v48 = vrot.slane %v7270_v5, 6  ;;  %v2368_v12 = vmax.f32 %v7080_v3, %v2336_v40 }
 0x213   : > { %v2497_v9 = vmax.f32 %v2369_v21, %v2465_v16  ;;  %3039 = vst.msk [vmem:[#allocation2 + $0x40] sm:$0xf] %vm881_vm14, %v4904_v63  ;;  %2890 = vrot.lane.b32.xlu0 %v4904_v63, %s5397_s29  ;;  %v9870_v57 = vrot.slane %v7080_v3, 1  ;;  %v2592_v61 = vsel %vm1565_vm10, %v2563_v62, -inf  ;;  %v9871_v10 = vrot.slane %v7080_v3, 2 }
 0x214   : > { %v2211_v36 = vmax.bf16 %v2177_v11, %v7303_v7  ;;  %v2212_v29 = vmax.bf16 %v2178_v1, %v7305_v28  ;;  %v2111_v62 = vmax.bf16 %v7012_v34, %v6971_v23  ;;  %v2112_v3 = vmax.bf16 %v7050_v46, %v6983_v18 }
 0x215   : > { %v2434_v39 = vsel %vm942_vm3, %v9870_v57, %v2401_v14  ;;  %v2690_v0 = vsel %vm972_vm8, %v9871_v10, %v2657_v25  ;;  %v2625_v41 = vmax.f32 %v2497_v9, %v2593_v22  ;;  %v2305_v2 = vsel %vm927_vm2, %v2273_v17, %v2274_v32 }
 0x216   : > { %v2464_v51 = vsel %vm1427_vm9, %v2434_v39, -inf  ;;  %v2720_v40 = vsel %vm1703_vm11, %v2690_v0, -inf  ;;  %v7333_v50 = vunpack.c.l.bf16 %v2211_v36  ;;  %v7335_v25 = vunpack.c.l.bf16 %v2212_v29 }
 0x217   : > { %v2496_v14 = vmax.f32 %v2368_v12, %v2464_v51  ;;  %v2561_v35 = vsel %vm957_vm4, %v2529_v20, %v2530_v48  ;;  %v2753_v58 = vmax.f32 %v2625_v41, %v2721_v37  ;;  %v2145_v33 = vmax.bf16 %v2111_v62, %v7210_v30  ;;  %v7361_v12 = vld [vmem:[#allocation2 + $0x6c] sm:$0xf] }
 0x218   : > { %v2146_v22 = vmax.bf16 %v2112_v3, %v7219_v43  ;;  %v2275_v23 = vrot.slane %v7333_v50, 7  ;;  %v2403_v18 = vrot.slane %v7333_v50, 1  ;;  %v2404_v53 = vrot.slane %v7335_v25, 1 }
 0x219   : > { %v2624_v42 = vmax.f32 %v2496_v14, %v2592_v61  ;;  %v2531_v21 = vrot.slane %v7333_v50, 6  ;;  %v4907_v16 = vpack.c.bf16 %v2753_v58, %v2753_v58  ;;  %v2659_v17 = vrot.slane %v7333_v50, 2  ;;  %v7376_v61 = vld [vmem:[#allocation2 + $0x70] sm:$0xf] }
 0x21a   : > { %v2660_v63 = vrot.slane %v7335_v25, 2  ;;  %v2304_v37 = vsel %vm927_vm2, %v2274_v32, %v2275_v23  ;;  %v2431_v11 = vsel %vm942_vm3, %v2403_v18, %v2404_v53  ;;  %v2179_v9 = vmax.bf16 %v2145_v33, %v7303_v7 }
 0x21b   : > { %v2752_v20 = vmax.f32 %v2624_v42, %v2720_v40  ;;  %v2560_v1 = vsel %vm957_vm4, %v2530_v48, %v2531_v21  ;;  %3042 = vst.msk [vmem:[#allocation2 + $0x4c] sm:$0xf] %vm881_vm14, %v4907_v16  ;;  %2896 = vrot.lane.b32.xlu1 %v4907_v16, %s5397_s29  ;;  %v2339_v32 = vsel %vm1290_vm15, %v2304_v37, -inf  ;;  %v2467_v57 = vsel %vm1428_vm0, %v2431_v11, -inf }
 0x21c   : > { %v2595_v39 = vsel %vm1566_vm5, %v2560_v1, -inf  ;;  %v2687_v48 = vsel %vm972_vm8, %v2659_v17, %v2660_v63  ;;  %v2371_v10 = vmax.f32 %v7333_v50, %v2339_v32  ;;  %v2180_v29 = vmax.bf16 %v2146_v22, %v7305_v28 }
 0x21d   : > { %v2723_v0 = vsel %vm1704_vm6, %v2687_v48, -inf  ;;  %v4906_v36 = vpack.c.bf16 %v2752_v20, %v2752_v20  ;;  %v2213_v51 = vmax.bf16 %v2179_v9, %v7361_v12  ;;  %v2276_v40 = vrot.slane %v7335_v25, 7  ;;  %v7423_v48 = vld [vmem:[#allocation2 + $0x74] sm:$0xf] }
 0x21e   : > { %v2532_v41 = vrot.slane %v7335_v25, 6  ;;  %v2338_v14 = vsel %vm1289_vm7, %v2305_v2, -inf  ;;  %v2499_v62 = vmax.f32 %v2371_v10, %v2467_v57  ;;  %v2214_v3 = vmax.bf16 %v2180_v29, %v7376_v61 }
 0x21f   : > { %3041 = vst.msk [vmem:[#allocation2 + $0x48] sm:$0xf] %vm881_vm14, %v4906_v36  ;;  %2894 = vrot.lane.b32.xlu0 %v4906_v36, %s5397_s29  ;;  %v2370_v58 = vmax.f32 %v7270_v5, %v2338_v14  ;;  %v2432_v42 = vsel %vm942_vm3, %v2402_v44, %v2403_v18  ;;  %v7395_v33 = vunpack.c.l.bf16 %v2213_v51  ;;  %v2594_v2 = vsel %vm1565_vm10, %v2561_v35, -inf }
 0x220   : > { %v2466_v22 = vsel %vm1427_vm9, %v2432_v42, -inf  ;;  %v2688_v16 = vsel %vm972_vm8, %v2658_v19, %v2659_v17  ;;  %v2627_v20 = vmax.f32 %v2499_v62, %v2595_v39  ;;  %v7405_v37 = vunpack.c.l.bf16 %v2214_v3 }
 0x221   : > { %v2498_v11 = vmax.f32 %v2370_v58, %v2466_v22  ;;  %v2722_v44 = vsel %vm1703_vm11, %v2688_v16, -inf  ;;  %v2277_v18 = vrot.slane %v7395_v33, 7  ;;  %v2405_v1 = vrot.slane %v7395_v33, 1 }
 0x222   : > { %v2533_v9 = vrot.slane %v7395_v33, 6  ;;  %v2661_v35 = vrot.slane %v7395_v33, 2  ;;  %v2755_v32 = vmax.f32 %v2627_v20, %v2723_v0  ;;  %v2406_v5 = vrot.slane %v7405_v37, 1 }
 0x223   : > { %v9777_v19 = vrot.slane %v7405_v37, 2  ;;  %v2626_v17 = vmax.f32 %v2498_v11, %v2594_v2  ;;  %v2302_v57 = vsel %vm927_vm2, %v2276_v40, %v2277_v18  ;;  %v2113_v10 = vmax.bf16 %v7210_v30, %v7012_v34  ;;  %v7452_v11 = vld [vmem:[#allocation2 + $0x78] sm:$0xf] }
 0x224   : > { %v2558_v39 = vsel %vm957_vm4, %v2532_v41, %v2533_v9  ;;  %v2114_v0 = vmax.bf16 %v7219_v43, %v7050_v46  ;;  %v4909_v36 = vpack.c.bf16 %v2755_v32, %v2755_v32  ;;  %v2341_v29 = vsel %vm1290_vm15, %v2302_v57, -inf }
 0x225   : > { %v2429_v51 = vsel %vm942_vm3, %v2405_v1, %v2406_v5  ;;  %v2597_v14 = vsel %vm1566_vm5, %v2558_v39, -inf  ;;  %v2373_v62 = vmax.f32 %v7395_v33, %v2341_v29  ;;  %v2685_v46 = vsel %vm972_vm8, %v2661_v35, %v9777_v19 }
 0x226   : > { %v2469_v34 = vsel %vm1428_vm0, %v2429_v51, -inf  ;;  %v2754_v3 = vmax.f32 %v2626_v17, %v2722_v44  ;;  %3044 = vst.msk [vmem:[#allocation2 + $0x54] sm:$0xf] %vm881_vm14, %v4909_v36  ;;  %2900 = vrot.lane.b32.xlu1 %v4909_v36, %s5397_s29  ;;  %v2725_v58 = vsel %vm1704_vm6, %v2685_v46, -inf  ;;  %v2119_v42 = vmax.bf16 %v7423_v48, %v7361_v12 }
 0x227   : > { %v2147_v22 = vmax.bf16 %v2113_v10, %v7303_v7  ;;  %v2148_v2 = vmax.bf16 %v2114_v0, %v7305_v28  ;;  %v2501_v16 = vmax.f32 %v2373_v62, %v2469_v34  ;;  %v2278_v44 = vrot.slane %v7405_v37, 7 }
 0x228   : > { %v4908_v20 = vpack.c.bf16 %v2754_v3, %v2754_v3  ;;  %v2534_v32 = vrot.slane %v7405_v37, 6  ;;  %v2303_v39 = vsel %vm927_vm2, %v2275_v23, %v2276_v40  ;;  %v2430_v10 = vsel %vm942_vm3, %v2404_v53, %v2405_v1 }
 0x229   : > { %v2181_v17 = vmax.bf16 %v2147_v22, %v7361_v12  ;;  %v2182_v57 = vmax.bf16 %v2148_v2, %v7376_v61  ;;  %v2629_v0 = vmax.f32 %v2501_v16, %v2597_v14  ;;  %v2340_v36 = vsel %vm1289_vm7, %v2303_v39, -inf }
 0x22a   : > { %3043 = vst.msk [vmem:[#allocation2 + $0x50] sm:$0xf] %vm881_vm14, %v4908_v20  ;;  %2898 = vrot.lane.b32.xlu0 %v4908_v20, %s5397_s29  ;;  %v2468_v29 = vsel %vm1427_vm9, %v2430_v10, -inf  ;;  %v2559_v23 = vsel %vm957_vm4, %v2531_v21, %v2532_v41  ;;  %v2372_v1 = vmax.f32 %v7335_v25, %v2340_v36  ;;  %v2686_v62 = vsel %vm972_vm8, %v2660_v63, %v2661_v35 }
 0x22b   : > { %v2215_v40 = vmax.bf16 %v2181_v17, %v7423_v48  ;;  %v2216_v53 = vmax.bf16 %v2182_v57, %v7452_v11  ;;  %v2596_v51 = vsel %vm1565_vm10, %v2559_v23, -inf  ;;  %v2757_v14 = vmax.f32 %v2629_v0, %v2725_v58  ;;  %v2090_v58 = vld [vmem:[#allocation2 + $0x80] sm:$0xf]  ;;  %v7528_v0 = vld [vmem:[#allocation2 + $0x7c] sm:$0xf] }
 0x22c   : > { %v2115_v50 = vmax.bf16 %v7303_v7, %v7210_v30  ;;  %v2116_v21 = vmax.bf16 %v7305_v28, %v7219_v43  ;;  %v2500_v46 = vmax.f32 %v2372_v1, %v2468_v29  ;;  %v2724_v3 = vsel %vm1703_vm11, %v2686_v62, -inf  ;;  %v7543_v1 = vld [vmem:[#allocation2 + $0x88] sm:$0xf]  ;;  %v7548_v62 = vld [vmem:[#allocation2 + $0x84] sm:$0xf] }
 0x22d   : > { %v7489_v41 = vunpack.c.l.bf16 %v2215_v40  ;;  %v7491_v34 = vunpack.c.l.bf16 %v2216_v53  ;;  %v4911_v22 = vpack.c.bf16 %v2757_v14, %v2757_v14  ;;  %v2117_v25 = vmax.bf16 %v7361_v12, %v7303_v7 }
 0x22e   : > { %v2118_v63 = vmax.bf16 %v7376_v61, %v7305_v28  ;;  %v2120_v30 = vmax.bf16 %v7452_v11, %v7376_v61  ;;  %v2628_v28 = vmax.f32 %v2500_v46, %v2596_v51  ;;  %v2122_v17 = vmax.bf16 %v2090_v58, %v7452_v11 }
 0x22f   : > { %v9775_v43 = vrot.slane %v7489_v41, 7  ;;  %v2407_v35 = vrot.slane %v7489_v41, 1  ;;  %v9773_v2 = vrot.slane %v7491_v34, 1  ;;  %v9771_v16 = vrot.slane %v7489_v41, 6  ;;  %3046 = vst.msk [vmem:[#allocation2 + $0x5c] sm:$0xf] %vm881_vm14, %v4911_v22  ;;  %2904 = vrot.lane.b32.xlu1 %v4911_v22, %s5397_s29 }
 0x230   : > { %v9778_v7 = vrot.slane %v7489_v41, 2  ;;  %v9770_v20 = vrot.slane %v7491_v34, 2  ;;  %v2149_v36 = vmax.bf16 %v2115_v50, %v7361_v12  ;;  %v2756_v14 = vmax.f32 %v2628_v28, %v2724_v3 }
 0x231   : > { %v2300_v57 = vsel %vm927_vm2, %v2278_v44, %v9775_v43  ;;  %v2427_v39 = vsel %vm942_vm3, %v2407_v35, %v9773_v2  ;;  %v2556_v10 = vsel %vm957_vm4, %v2534_v32, %v9771_v16  ;;  %v2150_v50 = vmax.bf16 %v2116_v21, %v7376_v61  ;;  %v7556_v16 = vld [vmem:[#allocation2 + $0x8c] sm:$0xf] }
 0x232   : > { %v2343_v29 = vsel %vm1290_vm15, %v2300_v57, -inf  ;;  %v2471_v23 = vsel %vm1428_vm0, %v2427_v39, -inf  ;;  %v2599_v40 = vsel %vm1566_vm5, %v2556_v10, -inf  ;;  %v2683_v53 = vsel %vm972_vm8, %v9778_v7, %v9770_v20 }
 0x233   : > { %v2375_v12 = vmax.f32 %v7489_v41, %v2343_v29  ;;  %v2727_v51 = vsel %vm1704_vm6, %v2683_v53, -inf  ;;  %v2151_v46 = vmax.bf16 %v2117_v25, %v7423_v48  ;;  %v2152_v22 = vmax.bf16 %v2118_v63, %v7452_v11 }
 0x234   : > { %v2153_v57 = vmax.bf16 %v2119_v42, %v7528_v0  ;;  %v7554_v39 = vmax.bf16 %v2120_v30, %v2090_v58  ;;  %v4910_v20 = vpack.c.bf16 %v2756_v14, %v2756_v14  ;;  %v7559_v29 = vmax.bf16 %v7543_v1, %v2122_v17 }
 0x235   : > { %v2503_v10 = vmax.f32 %v2375_v12, %v2471_v23  ;;  %v2183_v3 = vmax.bf16 %v2149_v36, %v7423_v48  ;;  %v2184_v28 = vmax.bf16 %v2150_v50, %v7452_v11  ;;  %v2185_v61 = vmax.bf16 %v2151_v46, %v7528_v0 }
 0x236   : > { %v2186_v21 = vmax.bf16 %v2152_v22, %v2090_v58  ;;  %v2187_v25 = vmax.bf16 %v2153_v57, %v7548_v62  ;;  %3045 = vst.msk [vmem:[#allocation2 + $0x58] sm:$0xf] %vm881_vm14, %v4910_v20  ;;  %2902 = vrot.lane.b32.xlu0 %v4910_v20, %s5397_s29  ;;  %v9776_v17 = vrot.slane %v7491_v34, 7  ;;  %v2536_v14 = vrot.slane %v7491_v34, 6  ;;  %v8309_v56 = vld [vmem:[#allocation2 + $0x5c] sm:$0xf] }
 0x237   : > { %v2631_v63 = vmax.f32 %v2503_v10, %v2599_v40  ;;  %v2217_v30 = vmax.bf16 %v2183_v3, %v7528_v0  ;;  %v2218_v36 = vmax.bf16 %v2184_v28, %v2090_v58  ;;  %v2219_v11 = vmax.bf16 %v2185_v61, %v7548_v62 }
 0x238   : > { %v2220_v23 = vmax.bf16 %v2186_v21, %v7543_v1  ;;  %v2221_v53 = vmax.bf16 %v2187_v25, %v7556_v16  ;;  %v7583_v20 = vsel %vm927_vm2, %v2277_v18, %v2278_v44 }
 0x239   : > { %v2759_v12 = vmax.f32 %v2631_v63, %v2727_v51  ;;  %v7574_v40 = vunpack.c.l.bf16 %v2217_v30  ;;  %v7585_v58 = vunpack.c.l.bf16 %v2218_v36  ;;  %v7587_v50 = vunpack.c.l.bf16 %v2219_v11 }
 0x23a   : > { %v7589_v46 = vunpack.c.l.bf16 %v2220_v23  ;;  %v7591_v22 = vunpack.c.l.bf16 %v2221_v53 }
 0x23b   : > { %v4913_v51 = vpack.c.bf16 %v2759_v12, %v2759_v12  ;;  %v2281_v57 = vrot.slane %v7574_v40, 7  ;;  %v9774_v10 = vrot.slane %v7574_v40, 1  ;;  %v2537_v3 = vrot.slane %v7574_v40, 6 }
 0x23c   : > { %v2282_v28 = vrot.slane %v7585_v58, 7  ;;  %v2283_v18 = vrot.slane %v7587_v50, 7  ;;  %v2284_v44 = vrot.slane %v7589_v46, 7  ;;  %v9772_v61 = vrot.slane %v7591_v22, 7 }
 0x23d   : > { %3048 = vst.msk [vmem:[#allocation2 + $0x64] sm:$0xf] %vm881_vm14, %v4913_v51  ;;  %2908 = vrot.lane.b32.xlu1 %v4913_v51, %s5397_s29  ;;  %v2298_v21 = vsel %vm927_vm2, %v9776_v17, %v2281_v57  ;;  %v2410_v25 = vrot.slane %v7585_v58, 1  ;;  %v2411_v63 = vrot.slane %v7587_v50, 1  ;;  %v2412_v30 = vrot.slane %v7589_v46, 1 }
 0x23e   : > { %v2294_v36 = vsel %vm927_vm2, %v2284_v44, %v9772_v61  ;;  %v2295_v11 = vsel %vm927_vm2, %v2283_v18, %v2284_v44  ;;  %v2296_v23 = vsel %vm927_vm2, %v2282_v28, %v2283_v18  ;;  %v2297_v53 = vsel %vm927_vm2, %v2281_v57, %v2282_v28 }
 0x23f   : > { %v2345_v12 = vsel %vm1290_vm15, %v2298_v21, -inf  ;;  %v2346_v51 = vsel %vm1289_vm7, %v2297_v53, -inf  ;;  %v2347_v42 = vsel %vm1290_vm15, %v2296_v23, -inf  ;;  %v2348_v61 = vsel %vm1289_vm7, %v2295_v11, -inf }
 0x240   : > { %v7629_v44 = vsel %vm1290_vm15, %v2294_v36, -inf  ;;  %v2377_v18 = vmax.f32 %v7574_v40, %v2345_v12  ;;  %v2378_v57 = vmax.f32 %v7585_v58, %v2346_v51  ;;  %v2379_v28 = vmax.f32 %v7587_v50, %v2347_v42 }
 0x241   : > { %v2380_v21 = vmax.f32 %v7589_v46, %v2348_v61  ;;  %v2413_v23 = vrot.slane %v7591_v22, 1  ;;  %v2423_v11 = vsel %vm942_vm3, %v2411_v63, %v2412_v30  ;;  %v2424_v36 = vsel %vm942_vm3, %v2410_v25, %v2411_v63 }
 0x242   : > { %v2425_v12 = vsel %vm942_vm3, %v9774_v10, %v2410_v25  ;;  %v2475_v42 = vsel %vm1428_vm0, %v2423_v11, -inf  ;;  %v2538_v61 = vrot.slane %v7585_v58, 6  ;;  %v2474_v63 = vsel %vm1427_vm9, %v2424_v36, -inf }
 0x243   : > { %v2422_v51 = vsel %vm942_vm3, %v2412_v30, %v2413_v23  ;;  %v2473_v53 = vsel %vm1428_vm0, %v2425_v12, -inf  ;;  %v2507_v2 = vmax.f32 %v2379_v28, %v2475_v42  ;;  %v2506_v43 = vmax.f32 %v2378_v57, %v2474_v63 }
 0x244   : > { %v2476_v25 = vsel %vm1427_vm9, %v2422_v51, -inf  ;;  %v2505_v10 = vmax.f32 %v2377_v18, %v2473_v53  ;;  %v2539_v11 = vrot.slane %v7587_v50, 6  ;;  %v2540_v19 = vrot.slane %v7589_v46, 6 }
 0x245   : > { %v2508_v17 = vmax.f32 %v2380_v21, %v2476_v25  ;;  %v9779_v7 = vrot.slane %v7591_v22, 6  ;;  %v2553_v30 = vsel %vm957_vm4, %v2537_v3, %v2538_v61  ;;  %v2554_v28 = vsel %vm957_vm4, %v2536_v14, %v2537_v3 }
 0x246   : > { %v2552_v12 = vsel %vm957_vm4, %v2538_v61, %v2539_v11  ;;  %v2602_v18 = vsel %vm1565_vm10, %v2553_v30, -inf  ;;  %v2665_v57 = vrot.slane %v7574_v40, 2  ;;  %v2551_v53 = vsel %vm957_vm4, %v2539_v11, %v2540_v19 }
 0x247   : > { %v2550_v21 = vsel %vm957_vm4, %v2540_v19, %v9779_v7  ;;  %v2601_v36 = vsel %vm1566_vm5, %v2554_v28, -inf  ;;  %v2603_v42 = vsel %vm1566_vm5, %v2552_v12, -inf  ;;  %v2604_v3 = vsel %vm1565_vm10, %v2551_v53, -inf  ;;  %v2059_v53 = vld [vmem:[#allocation2 + $0x4] sm:$0xf] }
 0x248   : > { %v7687_v61 = vsel %vm1566_vm5, %v2550_v21, -inf  ;;  %v2633_v51 = vmax.f32 %v2505_v10, %v2601_v36  ;;  %v2634_v63 = vmax.f32 %v2506_v43, %v2602_v18  ;;  %v2635_v25 = vmax.f32 %v2507_v2, %v2603_v42  ;;  %v2061_v36 = vld [vmem:[#allocation2 + $0xc] sm:$0xf] }
 0x249   : > { %v2636_v30 = vmax.f32 %v2508_v17, %v2604_v3  ;;  %v2666_v7 = vrot.slane %v7585_v58, 2  ;;  %v2667_v19 = vrot.slane %v7587_v50, 2  ;;  %v2668_v11 = vrot.slane %v7589_v46, 2 }
 0x24a   : > { %v2669_v28 = vrot.slane %v7591_v22, 2  ;;  %v2342_v12 = vsel %vm1289_vm7, %v7583_v20, -inf  ;;  %v2428_v43 = vsel %vm942_vm3, %v2406_v5, %v2407_v35 }
 0x24b   : > { %v2680_v2 = vsel %vm972_vm8, %v2666_v7, %v2667_v19  ;;  %v2681_v17 = vsel %vm972_vm8, %v2665_v57, %v2666_v7  ;;  %v2374_v58 = vmax.f32 %v7405_v37, %v2342_v12  ;;  %v2470_v20 = vsel %vm1427_vm9, %v2428_v43, -inf  ;;  %v2060_v43 = vld [vmem:[#allocation2 + $0x8] sm:$0xf] }
 0x24c   : > { %v2678_v50 = vsel %vm972_vm8, %v2668_v11, %v2669_v28  ;;  %v2679_v5 = vsel %vm972_vm8, %v2667_v19, %v2668_v11  ;;  %v2729_v35 = vsel %vm1704_vm6, %v2681_v17, -inf  ;;  %v2730_v46 = vsel %vm1703_vm11, %v2680_v2, -inf  ;;  %v2058_v11 = vld [vmem:[#allocation2] sm:$0xf]  ;;  %v2062_v2 = vld [vmem:[#allocation2 + $0x10] sm:$0xf] }
 0x24d   : > { %v2731_v7 = vsel %vm1704_vm6, %v2679_v5, -inf  ;;  %v2732_v10 = vsel %vm1703_vm11, %v2678_v50, -inf  ;;  %v2761_v18 = vmax.f32 %v2633_v51, %v2729_v35  ;;  %v2762_v21 = vmax.f32 %v2634_v63, %v2730_v46 }
 0x24e   : > { %v2763_v42 = vmax.f32 %v2635_v25, %v2731_v7  ;;  %v2764_v3 = vmax.f32 %v2636_v30, %v2732_v10  ;;  %v2502_v12 = vmax.f32 %v2374_v58, %v2470_v20  ;;  %v2557_v19 = vsel %vm957_vm4, %v2533_v9, %v2534_v32 }
 0x24f   : > { %v4915_v17 = vpack.c.bf16 %v2761_v18, %v2761_v18  ;;  %v7731_v5 = vpack.c.bf16 %v2762_v21, %v2762_v21  ;;  %v2598_v51 = vsel %vm1565_vm10, %v2557_v19, -inf  ;;  %v9873_v63 = vrot.slane %v7489_v41, 2 }
 0x250   : > { %v9874_v25 = vrot.slane %v7405_v37, 2  ;;  %v7741_v33 = vpack.c.bf16 %v2763_v42, %v2763_v42  ;;  %v7743_v58 = vpack.c.bf16 %v2764_v3, %v2764_v3  ;;  %v2630_v9 = vmax.f32 %v2502_v12, %v2598_v51 }
 0x251   : > { %9872 = vst [vmem:[#allocation9_spill] sm:$0xff] %v7731_v5  ;;  %3050 = vst.msk [vmem:[#allocation2 + $0x6c] sm:$0xf] %vm881_vm14, %v4915_v17  ;;  %2912 = vrot.lane.b32.xlu1 %v4915_v17, %s5397_s29  ;;  %v2092_v20 = vmax.bf16 %v2060_v43, %v2058_v11  ;;  %v2093_v37 = vmax.bf16 %v2061_v36, %v2059_v53  ;;  %v2094_v50 = vmax.bf16 %v2062_v2, %v2060_v43  ;;  %v5371_v11 = vld [vmem:[#allocation2 + $0x14] sm:$0xf] }
 0x252   : > { %v2684_v30 = vsel %vm972_vm8, %v9874_v25, %v9873_v63  ;;  %9875 = vst [vmem:[#allocation10_spill] sm:$0xff] %v7741_v33  ;;  %9876 = vst [vmem:[#allocation11_spill] sm:$0xff] %v7743_v58  ;;  %v9877_v35 = vrot.slane %v7491_v34, 7  ;;  %v9878_v46 = vrot.slane %v7489_v41, 7  ;;  %v9879_v21 = vrot.slane %v7574_v40, 1 }
 0x253   : > { %v2726_v32 = vsel %vm1703_vm11, %v2684_v30, -inf  ;;  %3051 = vst.msk [vmem:[#allocation2 + $0x70] sm:$0xf] %vm881_vm14, %v7731_v5  ;;  %3052 = vst.msk [vmem:[#allocation2 + $0x74] sm:$0xf] %vm881_vm14, %v7741_v33  ;;  %v9880_v53 = vrot.slane %v7491_v34, 1  ;;  %v2126_v19 = vmax.bf16 %v2092_v20, %v2062_v2  ;;  %v2127_v43 = vmax.bf16 %v5371_v11, %v2093_v37 }
 0x254   : > { %v2299_v7 = vsel %vm927_vm2, %v9878_v46, %v9877_v35  ;;  %3053 = vst.msk [vmem:[#allocation2 + $0x78] sm:$0xf] %vm881_vm14, %v7743_v58  ;;  %v2758_v10 = vmax.f32 %v2630_v9, %v2726_v32  ;;  %v9881_v3 = vrot.slane %v7489_v41, 6  ;;  %v5372_v17 = vld [vmem:[#allocation2 + $0x18] sm:$0xf]  ;;  %v9882_v41 = vrot.slane %v7491_v34, 2 }
 0x255   : > { %v2344_v18 = vsel %vm1289_vm7, %v2299_v7, -inf  ;;  %v2426_v42 = vsel %vm942_vm3, %v9880_v53, %v9879_v21  ;;  %v2128_v51 = vmax.bf16 %v5372_v17, %v2094_v50  ;;  %v2160_v32 = vmax.bf16 %v5372_v17, %v2126_v19  ;;  %v5373_v20 = vld [vmem:[#allocation2 + $0x1c] sm:$0xf]  ;;  %v5374_v50 = vld [vmem:[#allocation2 + $0x20] sm:$0xf] }
 0x256   : > { %v2555_v12 = vsel %vm957_vm4, %v9881_v3, %v2536_v14  ;;  %v2376_v63 = vmax.f32 %v7491_v34, %v2344_v18  ;;  %v4912_v25 = vpack.c.bf16 %v2758_v10, %v2758_v10  ;;  %v2472_v30 = vsel %vm1427_vm9, %v2426_v42, -inf }
 0x257   : > { %v2600_v9 = vsel %vm1565_vm10, %v2555_v12, -inf  ;;  %v2682_v14 = vsel %vm972_vm8, %v9882_v41, %v2665_v57  ;;  %v2161_v37 = vmax.bf16 %v5373_v20, %v2127_v43  ;;  %v2162_v35 = vmax.bf16 %v5374_v50, %v2128_v51  ;;  %v5375_v57 = vld [vmem:[#allocation2 + $0x24] sm:$0xf] }
 0x258   : > { %v2504_v46 = vmax.f32 %v2376_v63, %v2472_v30  ;;  %3047 = vst.msk [vmem:[#allocation2 + $0x60] sm:$0xf] %vm881_vm14, %v4912_v25  ;;  %2906 = vrot.lane.b32.xlu0 %v4912_v25, %s5397_s29  ;;  %v2728_v7 = vsel %vm1703_vm11, %v2682_v14, -inf  ;;  %v2095_v10 = vmax.bf16 %v5371_v11, %v2061_v36  ;;  %v2096_v40 = vmax.bf16 %v5372_v17, %v2062_v2 }
 0x259   : > { %v2121_v34 = vmax.bf16 %v7528_v0, %v7423_v48  ;;  %v2194_v18 = vmax.bf16 %v5374_v50, %v2160_v32  ;;  %v2195_v21 = vmax.bf16 %v5375_v57, %v2161_v37  ;;  %v2196_v53 = vmax.bf16 %v2162_v35, %v6594_v13  ;;  %v2158_v35 = vld [vmem:[#allocation2 + $0x90] sm:$0xf] }
 0x25a   : > { %v2632_v42 = vmax.f32 %v2504_v46, %v2600_v9  ;;  %v2129_v3 = vmax.bf16 %v5373_v20, %v2095_v10  ;;  %v2130_v12 = vmax.bf16 %v5374_v50, %v2096_v40  ;;  %v2123_v19 = vmax.bf16 %v7548_v62, %v7528_v0  ;;  %v2159_v40 = vld [vmem:[#allocation2 + $0x94] sm:$0xf] }
 0x25b   : > { %v2155_v43 = vmax.bf16 %v2121_v34, %v7548_v62  ;;  %v7796_v51 = vunpack.c.l.bf16 %v2194_v18  ;;  %v7798_v36 = vunpack.c.l.bf16 %v2195_v21  ;;  %v7800_v2 = vunpack.c.l.bf16 %v2196_v53 }
 0x25c   : > { %v2760_v48 = vmax.f32 %v2632_v42, %v2728_v7  ;;  %v2163_v11 = vmax.bf16 %v5375_v57, %v2129_v3  ;;  %v2164_v17 = vmax.bf16 %v2130_v12, %v6594_v13  ;;  %v2157_v63 = vmax.bf16 %v7556_v16, %v2123_v19 }
 0x25d   : > { %v2189_v25 = vmax.bf16 %v2155_v43, %v7556_v16  ;;  %v2258_v30 = vrot.slane %v7796_v51, 7  ;;  %v2259_v0 = vrot.slane %v7798_v36, 7  ;;  %v2387_v62 = vrot.slane %v7798_v36, 1 }
 0x25e   : > { %v9788_v9 = vrot.slane %v7800_v2, 1  ;;  %v2514_v41 = vrot.slane %v7796_v51, 6  ;;  %v9786_v14 = vrot.slane %v7798_v36, 6  ;;  %v2643_v32 = vrot.slane %v7798_v36, 2 }
 0x25f   : > { %v9784_v13 = vrot.slane %v7800_v2, 2  ;;  %v2320_v16 = vsel %vm927_vm2, %v2258_v30, %v2259_v0  ;;  %v4914_v37 = vpack.c.bf16 %v2760_v48, %v2760_v48  ;;  %v2197_v50 = vmax.bf16 %v2163_v11, %v6602_v55  ;;  %v2192_v11 = vld [vmem:[#allocation2 + $0x98] sm:$0xf] }
 0x260   : > { %v2447_v20 = vsel %vm942_vm3, %v2387_v62, %v9788_v9  ;;  %v2323_v46 = vsel %vm1290_vm15, %v2320_v16, -inf  ;;  %v2576_v10 = vsel %vm957_vm4, %v2514_v41, %v9786_v14  ;;  %v2198_v21 = vmax.bf16 %v2164_v17, %v6605_v45  ;;  %v2193_v16 = vld [vmem:[#allocation2 + $0x9c] sm:$0xf] }
 0x261   : > { %v2451_v7 = vsel %vm1428_vm0, %v2447_v20, -inf  ;;  %v2703_v55 = vsel %vm972_vm8, %v2643_v32, %v9784_v13  ;;  %v2355_v34 = vmax.f32 %v7798_v36, %v2323_v46  ;;  %v2579_v18 = vsel %vm1566_vm5, %v2576_v10, -inf  ;;  %3049 = vst.msk [vmem:[#allocation2 + $0x68] sm:$0xf] %vm881_vm14, %v4914_v37  ;;  %2910 = vrot.lane.b32.xlu0 %v4914_v37, %s5397_s29 }
 0x262   : > { %v2707_v57 = vsel %vm1704_vm6, %v2703_v55, -inf  ;;  %v7850_v53 = vunpack.c.l.bf16 %v2197_v50  ;;  %v2260_v42 = vrot.slane %v7800_v2, 7  ;;  %v9787_v3 = vrot.slane %v7800_v2, 6 }
 0x263   : > { %v2190_v12 = vmax.bf16 %v2158_v35, %v7559_v29  ;;  %v2483_v19 = vmax.f32 %v2355_v34, %v2451_v7  ;;  %v7855_v43 = vunpack.c.l.bf16 %v2198_v21  ;;  %v2191_v48 = vmax.bf16 %v2159_v40, %v2157_v63 }
 0x264   : > { %v9883_v20 = vmax.bf16 %v7554_v39, %v7543_v1  ;;  %v9783_v45 = vrot.slane %v7850_v53, 7  ;;  %v9789_v17 = vrot.slane %v7850_v53, 1  ;;  %v9781_v50 = vrot.slane %v7850_v53, 6 }
 0x265   : > { %v9785_v46 = vrot.slane %v7850_v53, 2  ;;  %v2611_v10 = vmax.f32 %v2483_v19, %v2579_v18  ;;  %v9782_v29 = vrot.slane %v7855_v43, 1  ;;  %v9780_v7 = vrot.slane %v7855_v43, 2 }
 0x266   : > { %v2222_v37 = vmax.bf16 %v9883_v20, %v2158_v35  ;;  %v2223_v63 = vmax.bf16 %v2189_v25, %v2159_v40  ;;  %v2318_v1 = vsel %vm927_vm2, %v2260_v42, %v9783_v45  ;;  %v2574_v39 = vsel %vm957_vm4, %v9787_v3, %v9781_v50  ;;  %v7923_v50 = vpop.permute.xlu0 %1869 }
 0x267   : > { %v2224_v35 = vmax.bf16 %v2192_v11, %v2190_v12  ;;  %v2225_v55 = vmax.bf16 %v2193_v16, %v2191_v48  ;;  %v2739_v34 = vmax.f32 %v2611_v10, %v2707_v57  ;;  %v2325_v25 = vsel %vm1290_vm15, %v2318_v1, -inf  ;;  %1964 = vst.msk [vmem:[#allocation3 + $0x8] sm:$0xf] %vm1961_vm12, %v7923_v50 }
 0x268   : > { %v2445_v40 = vsel %vm942_vm3, %v9789_v17, %v9782_v29  ;;  %v2581_v18 = vsel %vm1566_vm5, %v2574_v39, -inf  ;;  %v2357_v21 = vmax.f32 %v7850_v53, %v2325_v25  ;;  %v2701_v57 = vsel %vm972_vm8, %v9785_v46, %v9780_v7 }
 0x269   : > { %v2453_v12 = vsel %vm1428_vm0, %v2445_v40, -inf  ;;  %v7897_v19 = vunpack.c.l.bf16 %v2222_v37  ;;  %v4893_v48 = vpack.c.bf16 %v2739_v34, %v2739_v34  ;;  %v2709_v11 = vsel %vm1704_vm6, %v2701_v57, -inf  ;;  %v7909_v40 = vpop.permute.xlu1 %1867 }
 0x26a   : > { %v7901_v16 = vunpack.c.l.bf16 %v2223_v63  ;;  %v7903_v20 = vunpack.c.l.bf16 %v2224_v35  ;;  %v2485_v10 = vmax.f32 %v2357_v21, %v2453_v12  ;;  %v7905_v1 = vunpack.c.l.bf16 %v2225_v55  ;;  %1963 = vst.msk [vmem:[#allocation3 + $0x4] sm:$0xf] %vm1961_vm12, %v7909_v40 }
 0x26b   : > { %v2286_v39 = vrot.slane %v7897_v19, 7  ;;  %v2386_v25 = vrot.slane %v7796_v51, 1  ;;  %3028 = vst.msk [vmem:[#allocation2 + $0x14] sm:$0xf] %vm881_vm14, %v4893_v48  ;;  %2868 = vrot.lane.b32.xlu1 %v4893_v48, %s5397_s29  ;;  %v2414_v35 = vrot.slane %v7897_v19, 1  ;;  %v9884_v12 = vrot.slane %v7591_v22, 7 }
 0x26c   : > { %v2287_v37 = vrot.slane %v7901_v16, 7  ;;  %v2288_v63 = vrot.slane %v7903_v20, 7  ;;  %v2415_v34 = vrot.slane %v7901_v16, 1  ;;  %v2613_v55 = vmax.f32 %v2485_v10, %v2581_v18 }
 0x26d   : > { %v2289_v21 = vrot.slane %v7905_v1, 7  ;;  %v2293_v57 = vsel %vm927_vm2, %v9884_v12, %v2286_v39  ;;  %v2416_v7 = vrot.slane %v7903_v20, 1  ;;  %v2417_v10 = vrot.slane %v7905_v1, 1 }
 0x26e   : > { %v2291_v48 = vsel %vm927_vm2, %v2287_v37, %v2288_v63  ;;  %v2292_v29 = vsel %vm927_vm2, %v2286_v39, %v2287_v37  ;;  %v2350_v18 = vsel %vm1289_vm7, %v2293_v57, -inf  ;;  %v2741_v45 = vmax.f32 %v2613_v55, %v2709_v11 }
 0x26f   : > { %v2290_v13 = vsel %vm927_vm2, %v2288_v63, %v2289_v21  ;;  %v2321_v12 = vsel %vm927_vm2, %v2289_v21, %v2258_v30  ;;  %v2351_v46 = vsel %vm1290_vm15, %v2292_v29, -inf  ;;  %v2352_v37 = vsel %vm1289_vm7, %v2291_v48, -inf  ;;  %v7950_v21 = vpop.permute.xlu1 %1871  ;;  %v7952_v29 = vpop.permute.xlu0 %1873 }
 0x270   : > { %v2322_v39 = vsel %vm1289_vm7, %v2321_v12, -inf  ;;  %v2353_v11 = vsel %vm1290_vm15, %v2290_v13, -inf  ;;  %v2382_v55 = vmax.f32 %v7897_v19, %v2350_v18  ;;  %v4895_v63 = vpack.c.bf16 %v2741_v45, %v2741_v45  ;;  %1965 = vst.msk [vmem:[#allocation3 + $0xc] sm:$0xf] %vm1961_vm12, %v7950_v21  ;;  %1966 = vst.msk [vmem:[#allocation3 + $0x10] sm:$0xf] %vm1961_vm12, %v7952_v29 }
 0x271   : > { %v2354_v57 = vmax.f32 %v7796_v51, %v2322_v39  ;;  %v2383_v14 = vmax.f32 %v7901_v16, %v2351_v46  ;;  %v2384_v30 = vmax.f32 %v7903_v20, %v2352_v37  ;;  %v2385_v12 = vmax.f32 %v7905_v1, %v2353_v11 }
 0x272   : > { %v2418_v48 = vsel %vm942_vm3, %v2416_v7, %v2417_v10  ;;  %v2419_v13 = vsel %vm942_vm3, %v2415_v34, %v2416_v7  ;;  %v2420_v45 = vsel %vm942_vm3, %v2414_v35, %v2415_v34  ;;  %3030 = vst.msk [vmem:[#allocation2 + $0x1c] sm:$0xf] %vm881_vm14, %v4895_v63  ;;  %2872 = vrot.lane.b32.xlu1 %v4895_v63, %s5397_s29  ;;  %v2543_v9 = vrot.slane %v7901_v16, 6 }
 0x273   : > { %v2421_v46 = vsel %vm942_vm3, %v2413_v23, %v2414_v35  ;;  %v2448_v18 = vsel %vm942_vm3, %v2386_v25, %v2387_v62  ;;  %v2449_v7 = vsel %vm942_vm3, %v2417_v10, %v2386_v25  ;;  %v2478_v34 = vsel %vm1427_vm9, %v2420_v45, -inf }
 0x274   : > { %v2450_v39 = vsel %vm1427_vm9, %v2448_v18, -inf  ;;  %v2477_v37 = vsel %vm1428_vm0, %v2421_v46, -inf  ;;  %v2479_v23 = vsel %vm1428_vm0, %v2419_v13, -inf  ;;  %v2480_v35 = vsel %vm1427_vm9, %v2418_v48, -inf }
 0x275   : > { %v2481_v62 = vsel %vm1428_vm0, %v2449_v7, -inf  ;;  %v2482_v11 = vmax.f32 %v2354_v57, %v2450_v39  ;;  %v9885_v25 = vmax.f32 %v7591_v22, %v7629_v44  ;;  %v2510_v63 = vmax.f32 %v2382_v55, %v2478_v34  ;;  %v7993_v7 = vpop.permute.xlu1 %1875  ;;  %v7995_v57 = vpop.permute.xlu0 %1877 }
 0x276   : > { %v2511_v45 = vmax.f32 %v2383_v14, %v2479_v23  ;;  %v2512_v18 = vmax.f32 %v2384_v30, %v2480_v35  ;;  %v2513_v3 = vmax.f32 %v2385_v12, %v2481_v62  ;;  %v2542_v46 = vrot.slane %v7897_v19, 6  ;;  %1967 = vst.msk [vmem:[#allocation3 + $0x14] sm:$0xf] %vm1961_vm12, %v7993_v7  ;;  %1968 = vst.msk [vmem:[#allocation3 + $0x18] sm:$0xf] %vm1961_vm12, %v7995_v57 }
 0x277   : > { %v2509_v10 = vmax.f32 %v9885_v25, %v2477_v37  ;;  %v2544_v13 = vrot.slane %v7903_v20, 6  ;;  %v2545_v48 = vrot.slane %v7905_v1, 6  ;;  %v9886_v44 = vrot.slane %v7591_v22, 6 }
 0x278   : > { %v2642_v55 = vrot.slane %v7796_v51, 2  ;;  %v2670_v30 = vrot.slane %v7897_v19, 2  ;;  %v2671_v12 = vrot.slane %v7901_v16, 2  ;;  %v2548_v39 = vsel %vm957_vm4, %v2542_v46, %v2543_v9 }
 0x279   : > { %v2637_v17 = vmax.f32 %v2509_v10, %v7687_v61  ;;  %v2549_v14 = vsel %vm957_vm4, %v9886_v44, %v2542_v46  ;;  %v2546_v34 = vsel %vm957_vm4, %v2544_v13, %v2545_v48  ;;  %v2547_v61 = vsel %vm957_vm4, %v2543_v9, %v2544_v13 }
 0x27a   : > { %v2577_v37 = vsel %vm957_vm4, %v2545_v48, %v2514_v41  ;;  %v2606_v19 = vsel %vm1565_vm10, %v2549_v14, -inf  ;;  %v2607_v16 = vsel %vm1566_vm5, %v2548_v39, -inf  ;;  %v2608_v35 = vsel %vm1565_vm10, %v2547_v61, -inf }
 0x27b   : > { %v2578_v23 = vsel %vm1565_vm10, %v2577_v37, -inf  ;;  %v2609_v9 = vsel %vm1566_vm5, %v2546_v34, -inf  ;;  %v2638_v51 = vmax.f32 %v2510_v63, %v2606_v19  ;;  %v2639_v25 = vmax.f32 %v2511_v45, %v2607_v16 }
 0x27c   : > { %v2610_v62 = vmax.f32 %v2482_v11, %v2578_v23  ;;  %v2640_v10 = vmax.f32 %v2512_v18, %v2608_v35  ;;  %v2641_v41 = vmax.f32 %v2513_v3, %v2609_v9  ;;  %v2672_v46 = vrot.slane %v7903_v20, 2  ;;  %v8037_v3 = vpop.permute.xlu1 %1879  ;;  %v8039_v20 = vpop.permute.xlu0 %1881 }
 0x27d   : > { %v2673_v13 = vrot.slane %v7905_v1, 2  ;;  %v2676_v48 = vsel %vm972_vm8, %v2670_v30, %v2671_v12  ;;  %v2677_v44 = vsel %vm972_vm8, %v2669_v28, %v2670_v30  ;;  %v2704_v11 = vsel %vm972_vm8, %v2642_v55, %v2643_v32  ;;  %1969 = vst.msk [vmem:[#allocation3 + $0x1c] sm:$0xf] %vm1961_vm12, %v8037_v3  ;;  %1970 = vst.msk [vmem:[#allocation3 + $0x20] sm:$0xf] %vm1961_vm12, %v8039_v20 }
 0x27e   : > { %v2262_v63 = vrot.slane %v7855_v43, 7  ;;  %v2675_v22 = vsel %vm972_vm8, %v2671_v12, %v2672_v46  ;;  %v2706_v45 = vsel %vm1703_vm11, %v2704_v11, -inf  ;;  %v2733_v32 = vsel %vm1704_vm6, %v2677_v44, -inf }
 0x27f   : > { %v2674_v1 = vsel %vm972_vm8, %v2672_v46, %v2673_v13  ;;  %v2705_v28 = vsel %vm972_vm8, %v2673_v13, %v2642_v55  ;;  %v2734_v18 = vsel %vm1703_vm11, %v2676_v48, -inf  ;;  %v2735_v14 = vsel %vm1704_vm6, %v2675_v22, -inf }
 0x280   : > { %v2736_v30 = vsel %vm1703_vm11, %v2674_v1, -inf  ;;  %v2737_v12 = vsel %vm1704_vm6, %v2705_v28, -inf  ;;  %v2738_v34 = vmax.f32 %v2610_v62, %v2706_v45  ;;  %v2765_v55 = vmax.f32 %v2637_v17, %v2733_v32  ;;  %v8080_v13 = vpop.permute.xlu0 %1885 }
 0x281   : > { %v2766_v61 = vmax.f32 %v2638_v51, %v2734_v18  ;;  %v2767_v39 = vmax.f32 %v2639_v25, %v2735_v14  ;;  %v2768_v37 = vmax.f32 %v2640_v10, %v2736_v30  ;;  %v2769_v23 = vmax.f32 %v2641_v41, %v2737_v12  ;;  %v8078_v41 = vpop.permute.xlu1 %1883  ;;  %1972 = vst.msk [vmem:[#allocation3 + $0x28] sm:$0xf] %vm1961_vm12, %v8080_v13 }
 0x282   : > { %v9887_v19 = vrot.slane %v6653_v8, 7  ;;  %v4892_v35 = vpack.c.bf16 %v2738_v34, %v2738_v34  ;;  %v8065_v9 = vpack.c.bf16 %v2765_v55, %v2765_v55  ;;  %v2391_v48 = vrot.slane %v6653_v8, 1  ;;  %1971 = vst.msk [vmem:[#allocation3 + $0x24] sm:$0xf] %vm1961_vm12, %v8078_v41 }
 0x283   : > { %v8067_v46 = vpack.c.bf16 %v2766_v61, %v2766_v61  ;;  %v8071_v17 = vpack.c.bf16 %v2767_v39, %v2767_v39  ;;  %v8073_v51 = vpack.c.bf16 %v2768_v37, %v2768_v37  ;;  %v8075_v25 = vpack.c.bf16 %v2769_v23, %v2769_v23 }
 0x284   : > { %v2316_v16 = vsel %vm927_vm2, %v2262_v63, %v9887_v19  ;;  %9888 = vst [vmem:[#allocation12_spill] sm:$0xff] %v8065_v9  ;;  %3027 = vst.msk [vmem:[#allocation2 + $0x10] sm:$0xf] %vm881_vm14, %v4892_v35  ;;  %2866 = vrot.lane.b32.xlu0 %v4892_v35, %s5397_s29  ;;  %v2518_v44 = vrot.slane %v7855_v43, 6  ;;  %v2647_v11 = vrot.slane %v6653_v8, 2  ;;  %v2319_v1 = vsel %vm927_vm2, %v2259_v0, %v2260_v42 }
 0x285   : > { %9889 = vst [vmem:[#allocation13_spill] sm:$0xff] %v8067_v46  ;;  %v2327_v62 = vsel %vm1290_vm15, %v2316_v16, -inf  ;;  %9890 = vst [vmem:[#allocation14_spill] sm:$0xff] %v8071_v17  ;;  %v2324_v22 = vsel %vm1289_vm7, %v2319_v1, -inf  ;;  %v9893_v28 = vrot.slane %v7850_v53, 1  ;;  %v9894_v45 = vrot.slane %v7800_v2, 1 }
 0x286   : > { %9891 = vst [vmem:[#allocation15_spill] sm:$0xff] %v8073_v51  ;;  %9892 = vst [vmem:[#allocation16_spill] sm:$0xff] %v8075_v25  ;;  %v2359_v10 = vmax.f32 %v6653_v8, %v2327_v62  ;;  %v9895_v0 = vrot.slane %v7800_v2, 6  ;;  %v9896_v42 = vrot.slane %v7798_v36, 6  ;;  %v9897_v14 = vrot.slane %v7850_v53, 2 }
 0x287   : > { %3055 = vst.msk [vmem:[#allocation2 + $0x80] sm:$0xf] %vm881_vm14, %v8067_v46  ;;  %3054 = vst.msk [vmem:[#allocation2 + $0x7c] sm:$0xf] %vm881_vm14, %v8065_v9  ;;  %v2446_v32 = vsel %vm942_vm3, %v9894_v45, %v9893_v28  ;;  %v9898_v30 = vrot.slane %v7800_v2, 2  ;;  %v9899_v34 = vrot.slane %v6656_v27, 1  ;;  %v2356_v23 = vmax.f32 %v7800_v2, %v2324_v22 }
 0x288   : > { %3057 = vst.msk [vmem:[#allocation2 + $0x88] sm:$0xf] %vm881_vm14, %v8073_v51  ;;  %3058 = vst.msk [vmem:[#allocation2 + $0x8c] sm:$0xf] %vm881_vm14, %v8075_v25  ;;  %v2575_v18 = vsel %vm957_vm4, %v9896_v42, %v9895_v0  ;;  %v9900_v61 = vrot.slane %v6653_v8, 6  ;;  %v9901_v39 = vrot.slane %v6656_v27, 2 }
 0x289   : > { %3056 = vst.msk [vmem:[#allocation2 + $0x84] sm:$0xf] %vm881_vm14, %v8071_v17  ;;  %v2702_v12 = vsel %vm972_vm8, %v9898_v30, %v9897_v14  ;;  %v2443_v55 = vsel %vm942_vm3, %v2391_v48, %v9899_v34  ;;  %v8136_v19 = vld [vmem:[#allocation2 + $0x28] sm:$0xf]  ;;  %v8138_v16 = vld [vmem:[#allocation2 + $0x30] sm:$0xf] }
 0x28a   : > { %v2572_v36 = vsel %vm957_vm4, %v2518_v44, %v9900_v61  ;;  %v2699_v37 = vsel %vm972_vm8, %v2647_v11, %v9901_v39  ;;  %9902 = vst [vmem:[#allocation17_spill] sm:$0xff] %v8136_v19  ;;  %9903 = vst [vmem:[#allocation18_spill] sm:$0xff] %v8138_v16  ;;  %v3072_v35 = vld [vmem:[#allocation2 + $0x34] sm:$0xf]  ;;  %v3073_v62 = vld [vmem:[#allocation2 + $0x38] sm:$0xf]  ;;  %v3103_v34 = vmax.bf16 %v8138_v16, %v8136_v19  ;;  %v8166_v61 = vpop.permute.xlu1 %1887 }
 0x28b   : > { %v2455_v1 = vsel %vm1428_vm0, %v2443_v55, -inf  ;;  %v2583_v8 = vsel %vm1566_vm5, %v2572_v36, -inf  ;;  %v2711_v27 = vsel %vm1704_vm6, %v2699_v37, -inf  ;;  %v2452_v28 = vsel %vm1427_vm9, %v2446_v32, -inf  ;;  %v8148_v45 = vld [vmem:[#allocation2 + $0x2c] sm:$0xf] }
 0x28c   : > { %9904 = vst [vmem:[#allocation19_spill] sm:$0xff] %v8148_v45  ;;  %v2487_v2 = vmax.f32 %v2359_v10, %v2455_v1  ;;  %v2484_v22 = vmax.f32 %v2356_v23, %v2452_v28  ;;  %v2580_v0 = vsel %vm1565_vm10, %v2575_v18, -inf  ;;  %v2708_v42 = vsel %vm1703_vm11, %v2702_v12, -inf  ;;  %v3074_v14 = vld [vmem:[#allocation2 + $0x3c] sm:$0xf]  ;;  %v8168_v12 = vpop.permute.xlu0 %1889 }
 0x28d   : > { %v8154_v30 = vld [vmem:[#allocation2 + $0x40] sm:$0xf]  ;;  %v3104_v55 = vmax.bf16 %v3072_v35, %v8148_v45  ;;  %v3105_v32 = vmax.bf16 %v3073_v62, %v8138_v16  ;;  %v9905_v10 = vrot.slane %v7850_v53, 7  ;;  %v8170_v37 = vld [vmem:[#allocation2 + $0x44] sm:$0xf]  ;;  %v9906_v28 = vrot.slane %v7855_v43, 1 }
 0x28e   : > { %v2615_v36 = vmax.f32 %v2487_v2, %v2583_v8  ;;  %v2612_v39 = vmax.f32 %v2484_v22, %v2580_v0  ;;  %v8172_v23 = vld [vmem:[#allocation2 + $0x48] sm:$0xf]  ;;  %v3137_v25 = vmax.bf16 %v3103_v34, %v3073_v62  ;;  %v8182_v22 = vld [vmem:[#allocation2 + $0x4c] sm:$0xf]  ;;  %v8184_v0 = vld [vmem:[#allocation2 + $0x50] sm:$0xf] }
 0x28f   : > { %v2317_v18 = vsel %vm927_vm2, %v9905_v10, %v2262_v63  ;;  %v2444_v51 = vsel %vm942_vm3, %v9906_v28, %v2391_v48  ;;  %v3138_v63 = vmax.bf16 %v3104_v55, %v3074_v14  ;;  %v3139_v10 = vmax.bf16 %v3105_v32, %v8154_v30  ;;  %v8204_v28 = vpop.permute.xlu1 %1891  ;;  %1973 = vst.msk [vmem:[#allocation3 + $0x2c] sm:$0xf] %vm1961_vm12, %v8166_v61  ;;  %v9973_v15 = vld [vmem:[#allocation16_spill] sm:$0xff] }
 0x290   : > { %v2326_v1 = vsel %vm1289_vm7, %v2317_v18, -inf  ;;  %v2743_v8 = vmax.f32 %v2615_v36, %v2711_v27  ;;  %v2740_v2 = vmax.f32 %v2612_v39, %v2708_v42  ;;  %v2454_v18 = vsel %vm1427_vm9, %v2444_v51, -inf  ;;  %1974 = vst.msk [vmem:[#allocation3 + $0x30] sm:$0xf] %vm1961_vm12, %v8168_v12  ;;  %1975 = vst.msk [vmem:[#allocation3 + $0x34] sm:$0xf] %vm1961_vm12, %v8204_v28 }
 0x291   : > { %v2358_v46 = vmax.f32 %v7855_v43, %v2326_v1  ;;  %v9907_v17 = vrot.slane %v7850_v53, 6  ;;  %v3171_v34 = vmax.bf16 %v3137_v25, %v8154_v30  ;;  %v3172_v55 = vmax.bf16 %v3138_v63, %v8170_v37 }
 0x292   : > { %v3173_v32 = vmax.bf16 %v3139_v10, %v8172_v23  ;;  %v4897_v42 = vpack.c.bf16 %v2743_v8, %v2743_v8  ;;  %v4894_v36 = vpack.c.bf16 %v2740_v2, %v2740_v2  ;;  %v9908_v1 = vrot.slane %v7855_v43, 2 }
 0x293   : > { %v2573_v48 = vsel %vm957_vm4, %v9907_v17, %v2518_v44  ;;  %v2486_v27 = vmax.f32 %v2358_v46, %v2454_v18  ;;  %v3205_v51 = vmax.bf16 %v3171_v34, %v8172_v23  ;;  %v3206_v17 = vmax.bf16 %v3172_v55, %v8182_v22  ;;  %v8206_v46 = vpop.permute.xlu0 %1893 }
 0x294   : > { %v2582_v39 = vsel %vm1565_vm10, %v2573_v48, -inf  ;;  %v2700_v53 = vsel %vm972_vm8, %v9908_v1, %v2647_v11  ;;  %v3207_v25 = vmax.bf16 %v3173_v32, %v8184_v0  ;;  %2876 = vrot.lane.b32.xlu1 %v4897_v42, %s5397_s29  ;;  %3032 = vst.msk [vmem:[#allocation2 + $0x24] sm:$0xf] %vm881_vm14, %v4897_v42  ;;  %3029 = vst.msk [vmem:[#allocation2 + $0x18] sm:$0xf] %vm881_vm14, %v4894_v36  ;;  %2870 = vrot.lane.b32.xlu0 %v4894_v36, %s5397_s29 }
 0x295   : > { %v2614_v44 = vmax.f32 %v2486_v27, %v2582_v39  ;;  %v2710_v43 = vsel %vm1703_vm11, %v2700_v53, -inf  ;;  %v3106_v11 = vmax.bf16 %v3074_v14, %v3072_v35  ;;  %v3107_v63 = vmax.bf16 %v8154_v30, %v3073_v62  ;;  %1976 = vst.msk [vmem:[#allocation3 + $0x38] sm:$0xf] %vm1961_vm12, %v8206_v46 }
 0x296   : > { %v3108_v10 = vmax.bf16 %v8170_v37, %v3074_v14  ;;  %v8216_v8 = vunpack.c.l.bf16 %v3205_v51  ;;  %v8218_v2 = vunpack.c.l.bf16 %v3206_v17  ;;  %v8220_v18 = vunpack.c.l.bf16 %v3207_v25  ;;  %v8245_v25 = vld [vmem:[#allocation2 + $0x54] sm:$0xf] }
 0x297   : > { %v2742_v48 = vmax.f32 %v2614_v44, %v2710_v43  ;;  %v3140_v34 = vmax.bf16 %v3106_v11, %v8170_v37  ;;  %v3141_v55 = vmax.bf16 %v3107_v63, %v8172_v23  ;;  %v3109_v32 = vmax.bf16 %v8172_v23, %v8154_v30  ;;  %v8248_v43 = vpop.permute.xlu1 %1895  ;;  %v8250_v11 = vpop.permute.xlu0 %1897 }
 0x298   : > { %9909 = vst [vmem:[#allocation20_spill] sm:$0xff] %v8216_v8  ;;  %9910 = vst [vmem:[#allocation21_spill] sm:$0xff] %v8218_v2  ;;  %v8227_v35 = vmax.bf16 %v3108_v10, %v8182_v22  ;;  %v9794_v62 = vrot.slane %v8216_v8, 7  ;;  %v3270_v14 = vrot.slane %v8218_v2, 7  ;;  %v9795_v27 = vrot.slane %v8218_v2, 1 }
 0x299   : > { %v3399_v42 = vrot.slane %v8220_v18, 1  ;;  %v9796_v36 = vrot.slane %v8216_v8, 6  ;;  %v3526_v39 = vrot.slane %v8218_v2, 6  ;;  %v9798_v1 = vrot.slane %v8218_v2, 2  ;;  %1977 = vst.msk [vmem:[#allocation3 + $0x3c] sm:$0xf] %vm1961_vm12, %v8248_v43 }
 0x29a   : > { %v3655_v53 = vrot.slane %v8220_v18, 2  ;;  %v3311_v30 = vsel %vm927_vm2, %v9794_v62, %v3270_v14  ;;  %v4896_v17 = vpack.c.bf16 %v2742_v48, %v2742_v48  ;;  %v3174_v44 = vmax.bf16 %v3140_v34, %v8182_v22  ;;  %v8264_v34 = vld [vmem:[#allocation2 + $0x58] sm:$0xf]  ;;  %1978 = vst.msk [vmem:[#allocation3 + $0x40] sm:$0xf] %vm1961_vm12, %v8250_v11 }
 0x29b   : > { %v3438_v51 = vsel %vm942_vm3, %v9795_v27, %v3399_v42  ;;  %v3334_v63 = vsel %vm1290_vm15, %v3311_v30, -inf  ;;  %v3567_v62 = vsel %vm957_vm4, %v9796_v36, %v3526_v39  ;;  %v3175_v36 = vmax.bf16 %v3141_v55, %v8184_v0 }
 0x29c   : > { %v3462_v10 = vsel %vm1428_vm0, %v3438_v51, -inf  ;;  %v3694_v48 = vsel %vm972_vm8, %v9798_v1, %v3655_v53  ;;  %v3366_v27 = vmax.f32 %v8218_v2, %v3334_v63  ;;  %v3590_v30 = vsel %vm1566_vm5, %v3567_v62, -inf  ;;  %3031 = vst.msk [vmem:[#allocation2 + $0x20] sm:$0xf] %vm881_vm14, %v4896_v17  ;;  %2874 = vrot.lane.b32.xlu0 %v4896_v17, %s5397_s29 }
 0x29d   : > { %v3718_v51 = vsel %vm1704_vm6, %v3694_v48, -inf  ;;  %v3208_v49 = vmax.bf16 %v3174_v44, %v8245_v25  ;;  %v3271_v1 = vrot.slane %v8220_v18, 7  ;;  %v3527_v26 = vrot.slane %v8220_v18, 6 }
 0x29e   : > { %v3143_v63 = vmax.bf16 %v3109_v32, %v8184_v0  ;;  %v3494_v47 = vmax.f32 %v3366_v27, %v3462_v10  ;;  %v3209_v62 = vmax.bf16 %v3175_v36, %v8264_v34  ;;  %v3176_v48 = vmax.bf16 %v8227_v35, %v8245_v25  ;;  %v8294_v36 = vpop.permute.xlu1 %1899 }
 0x29f   : > { %v3110_v6 = vmax.bf16 %v8182_v22, %v8170_v37  ;;  %v3240_v17 = vunpack.c.l.bf16 %v3208_v49  ;;  %v3310_v55 = vsel %vm927_vm2, %v3270_v14, %v3271_v1  ;;  %v3566_v44 = vsel %vm957_vm4, %v3526_v39, %v3527_v26  ;;  %v8296_v49 = vpop.permute.xlu0 %1901  ;;  %1979 = vst.msk [vmem:[#allocation3 + $0x44] sm:$0xf] %vm1961_vm12, %v8294_v36 }
 0x2a0   : > { %v3177_v58 = vmax.bf16 %v3143_v63, %v8264_v34  ;;  %v3622_v9 = vmax.f32 %v3494_v47, %v3590_v30  ;;  %v8288_v32 = vunpack.c.l.bf16 %v3209_v62  ;;  %v3335_v27 = vsel %vm1289_vm7, %v3310_v55, -inf  ;;  %1980 = vst.msk [vmem:[#allocation3 + $0x48] sm:$0xf] %vm1961_vm12, %v8296_v49 }
 0x2a1   : > { %v3591_v35 = vsel %vm1565_vm10, %v3566_v44, -inf  ;;  %v3272_v37 = vrot.slane %v3240_v17, 7  ;;  %v3400_v14 = vrot.slane %v3240_v17, 1  ;;  %v3528_v10 = vrot.slane %v3240_v17, 6 }
 0x2a2   : > { %v3656_v5 = vrot.slane %v3240_v17, 2  ;;  %v3750_v39 = vmax.f32 %v3622_v9, %v3718_v51  ;;  %v9807_v63 = vrot.slane %v8288_v32, 1  ;;  %v9810_v47 = vrot.slane %v8288_v32, 2 }
 0x2a3   : > { %v3367_v30 = vmax.f32 %v8220_v18, %v3335_v27  ;;  %v3309_v62 = vsel %vm927_vm2, %v3271_v1, %v3272_v37  ;;  %v3565_v55 = vsel %vm957_vm4, %v3527_v26, %v3528_v10  ;;  %v3437_v44 = vsel %vm942_vm3, %v3399_v42, %v3400_v14  ;;  %v8319_v1 = vld [vmem:[#allocation2 + $0x60] sm:$0xf]  ;;  %v8321_v42 = vpop.permute.xlu1 %1903  ;;  %v8323_v27 = vpop.permute.xlu0 %1905 }
 0x2a4   : > { %v3693_v33 = vsel %vm972_vm8, %v3655_v53, %v3656_v5  ;;  %v4935_v9 = vpack.c.bf16 %v3750_v39, %v3750_v39  ;;  %v3336_v51 = vsel %vm1290_vm15, %v3309_v62, -inf  ;;  %v3436_v18 = vsel %vm942_vm3, %v3400_v14, %v9807_v63  ;;  %1981 = vst.msk [vmem:[#allocation3 + $0x4c] sm:$0xf] %vm1961_vm12, %v8321_v42  ;;  %1982 = vst.msk [vmem:[#allocation3 + $0x50] sm:$0xf] %vm1961_vm12, %v8323_v27 }
 0x2a5   : > { %v3592_v26 = vsel %vm1566_vm5, %v3565_v55, -inf  ;;  %v3368_v53 = vmax.f32 %v3240_v17, %v3336_v51  ;;  %v3464_v39 = vsel %vm1428_vm0, %v3436_v18, -inf  ;;  %v3692_v62 = vsel %vm972_vm8, %v3656_v5, %v9810_v47 }
 0x2a6   : > { %v3463_v14 = vsel %vm1427_vm9, %v3437_v44, -inf  ;;  %3889 = vrot.lane.b32.xlu1 %v4935_v9, %s5398_s30  ;;  %v3720_v55 = vsel %vm1704_vm6, %v3692_v62, -inf  ;;  %v3719_v17 = vsel %vm1703_vm11, %v3693_v33, -inf  ;;  %v3210_v51 = vmax.bf16 %v3176_v48, %v8309_v56 }
 0x2a7   : > { %v3495_v63 = vmax.f32 %v3367_v30, %v3463_v14  ;;  %v3496_v18 = vmax.f32 %v3368_v53, %v3464_v39  ;;  %v3211_v2 = vmax.bf16 %v3177_v58, %v8319_v1  ;;  %v3273_v5 = vrot.slane %v8288_v32, 7  ;;  %v8345_v30 = vpop.permute.xlu1 %1907  ;;  %v8347_v14 = vpop.permute.xlu0 %1909 }
 0x2a8   : > { %v3529_v47 = vrot.slane %v8288_v32, 6  ;;  %v3242_v8 = vunpack.c.l.bf16 %v3210_v51  ;;  %v3111_v9 = vmax.bf16 %v8184_v0, %v8172_v23  ;;  %v3144_v62 = vmax.bf16 %v3110_v6, %v8245_v25  ;;  %1983 = vst.msk [vmem:[#allocation3 + $0x54] sm:$0xf] %vm1961_vm12, %v8345_v30  ;;  %1984 = vst.msk [vmem:[#allocation3 + $0x58] sm:$0xf] %vm1961_vm12, %v8347_v14 }
 0x2a9   : > { %v3623_v44 = vmax.f32 %v3495_v63, %v3591_v35  ;;  %v3624_v33 = vmax.f32 %v3496_v18, %v3592_v26  ;;  %v8349_v48 = vunpack.c.l.bf16 %v3211_v2  ;;  %v3308_v58 = vsel %vm927_vm2, %v3272_v37, %v3273_v5 }
 0x2aa   : > { %v3564_v53 = vsel %vm957_vm4, %v3528_v10, %v3529_v47  ;;  %v3274_v63 = vrot.slane %v3242_v8, 7  ;;  %v3402_v39 = vrot.slane %v3242_v8, 1  ;;  %v3530_v51 = vrot.slane %v3242_v8, 6 }
 0x2ab   : > { %v3751_v35 = vmax.f32 %v3623_v44, %v3719_v17  ;;  %v3752_v23 = vmax.f32 %v3624_v33, %v3720_v55  ;;  %v9818_v6 = vrot.slane %v8349_v48, 1  ;;  %v3658_v16 = vrot.slane %v3242_v8, 2  ;;  %v1912_v26 = vpop.permute.xlu1 %1911  ;;  %v8363_v17 = vpop.permute.xlu0 %2878 }
 0x2ac   : > { %v9817_v45 = vrot.slane %v8349_v48, 2  ;;  %v3307_v2 = vsel %vm927_vm2, %v3273_v5, %v3274_v63  ;;  %v3563_v37 = vsel %vm957_vm4, %v3529_v47, %v3530_v51  ;;  %v3337_v10 = vsel %vm1289_vm7, %v3308_v58, -inf  ;;  %1985 = vst.msk [vmem:[#allocation3 + $0x5c] sm:$0xf] %vm1961_vm12, %v1912_v26 }
 0x2ad   : > { %v4936_v19 = vpack.c.bf16 %v3751_v35, %v3751_v35  ;;  %v4937_v18 = vpack.c.bf16 %v3752_v23, %v3752_v23  ;;  %v3338_v55 = vsel %vm1290_vm15, %v3307_v2, -inf  ;;  %v3434_v44 = vsel %vm942_vm3, %v3402_v39, %v9818_v6  ;;  %v8401_v6 = vld [vmem:[#allocation2 + $0x68] sm:$0xf]  ;;  %2969 = vst.msk [vmem:[#allocation3 + $0x18] sm:$0xf] %vm2962_vm13, %v8363_v17 }
 0x2ae   : > { %v3594_v5 = vsel %vm1566_vm5, %v3563_v37, -inf  ;;  %v3370_v47 = vmax.f32 %v3242_v8, %v3338_v55  ;;  %v3466_v33 = vsel %vm1428_vm0, %v3434_v44, -inf  ;;  %v3690_v58 = vsel %vm972_vm8, %v3658_v16, %v9817_v45 }
 0x2af   : > { %3891 = vrot.lane.b32.xlu0 %v4936_v19, %s5398_s30  ;;  %v3369_v35 = vmax.f32 %v8288_v32, %v3337_v10  ;;  %3893 = vrot.lane.b32.xlu1 %v4937_v18, %s5398_s30  ;;  %v3722_v23 = vsel %vm1704_vm6, %v3690_v58, -inf  ;;  %v9911_v2 = vrot.slane %v8288_v32, 1  ;;  %v3593_v8 = vsel %vm1565_vm10, %v3564_v53, -inf  ;;  %v8398_v58 = vld [vmem:[#allocation2 + $0x64] sm:$0xf] }
 0x2b0   : > { %v9912_v37 = vrot.slane %v8288_v32, 2  ;;  %v3498_v44 = vmax.f32 %v3370_v47, %v3466_v33  ;;  %v3145_v45 = vmax.bf16 %v3111_v9, %v8264_v34  ;;  %v3178_v32 = vmax.bf16 %v3144_v62, %v8309_v56 }
 0x2b1   : > { %v3435_v19 = vsel %vm942_vm3, %v9911_v2, %v3402_v39  ;;  %v1914_v39 = vpop.permute.xlu0 %1913  ;;  %v3275_v53 = vrot.slane %v8349_v48, 7  ;;  %v3113_v20 = vmax.bf16 %v8264_v34, %v8184_v0  ;;  %v3114_v12 = vmax.bf16 %v8309_v56, %v8245_v25 }
 0x2b2   : > { %v3691_v55 = vsel %vm972_vm8, %v9912_v37, %v3658_v16  ;;  %v3465_v10 = vsel %vm1427_vm9, %v3435_v19, -inf  ;;  %v3531_v16 = vrot.slane %v8349_v48, 6  ;;  %v3626_v47 = vmax.f32 %v3498_v44, %v3594_v5  ;;  %v8409_v37 = vpop.permute.xlu1 %2880  ;;  %1986 = vst.msk [vmem:[#allocation3 + $0x60] sm:$0xf] %vm1961_vm12, %v1914_v39 }
 0x2b3   : > { %v3721_v18 = vsel %vm1703_vm11, %v3691_v55, -inf  ;;  %v3497_v2 = vmax.f32 %v3369_v35, %v3465_v10  ;;  %v3179_v33 = vmax.bf16 %v3145_v45, %v8319_v1  ;;  %v3112_v19 = vmax.bf16 %v8245_v25, %v8182_v22  ;;  %2970 = vst.msk [vmem:[#allocation3 + $0x1c] sm:$0xf] %vm2962_vm13, %v8409_v37 }
 0x2b4   : > { %v3212_v35 = vmax.bf16 %v3178_v32, %v8398_v58  ;;  %v3306_v62 = vsel %vm927_vm2, %v3274_v63, %v3275_v53  ;;  %v3562_v45 = vsel %vm957_vm4, %v3530_v51, %v3531_v16  ;;  %v3754_v50 = vmax.f32 %v3626_v47, %v3722_v23  ;;  %v8488_v63 = vld [vmem:[#allocation2 + $0x6c] sm:$0xf] }
 0x2b5   : > { %v3625_v9 = vmax.f32 %v3497_v2, %v3593_v8  ;;  %v3213_v40 = vmax.bf16 %v3179_v33, %v8401_v6  ;;  %v3339_v21 = vsel %vm1289_vm7, %v3306_v62, -inf  ;;  %v3595_v29 = vsel %vm1565_vm10, %v3562_v45, -inf  ;;  %v8492_v26 = vpop.permute.xlu0 %2882  ;;  %v8512_v2 = vld [vmem:[#allocation2 + $0x70] sm:$0xf] }
 0x2b6   : > { %v3244_v57 = vunpack.c.l.bf16 %v3212_v35  ;;  %v3371_v3 = vmax.f32 %v8349_v48, %v3339_v21  ;;  %v4939_v41 = vpack.c.bf16 %v3754_v50, %v3754_v50  ;;  %v3146_v61 = vmax.bf16 %v3112_v19, %v8309_v56  ;;  %v1916_v42 = vpop.permute.xlu1 %1915  ;;  %2971 = vst.msk [vmem:[#allocation3 + $0x20] sm:$0xf] %vm2962_vm13, %v8492_v26 }
 0x2b7   : > { %v3753_v7 = vmax.f32 %v3625_v9, %v3721_v18  ;;  %v8470_v13 = vunpack.c.l.bf16 %v3213_v40  ;;  %v3147_v0 = vmax.bf16 %v3113_v20, %v8319_v1  ;;  %v9913_v30 = vrot.slane %v8349_v48, 1  ;;  %1987 = vst.msk [vmem:[#allocation3 + $0x64] sm:$0xf] %vm1961_vm12, %v1916_v42 }
 0x2b8   : > { %v3276_v28 = vrot.slane %v3244_v57, 7  ;;  %v3404_v46 = vrot.slane %v3244_v57, 1  ;;  %v3532_v43 = vrot.slane %v3244_v57, 6  ;;  %3897 = vrot.lane.b32.xlu1 %v4939_v41, %s5398_s30  ;;  %v3660_v36 = vrot.slane %v3244_v57, 2 }
 0x2b9   : > { %v4938_v22 = vpack.c.bf16 %v3753_v7, %v3753_v7  ;;  %v3405_v11 = vrot.slane %v8470_v13, 1  ;;  %v3661_v49 = vrot.slane %v8470_v13, 2  ;;  %v3180_v51 = vmax.bf16 %v3146_v61, %v8398_v58  ;;  %v1918_v45 = vpop.permute.xlu0 %1917 }
 0x2ba   : > { %v3305_v27 = vsel %vm927_vm2, %v3275_v53, %v3276_v28  ;;  %v3561_v25 = vsel %vm957_vm4, %v3531_v16, %v3532_v43  ;;  %v3433_v14 = vsel %vm942_vm3, %v9913_v30, %v3404_v46  ;;  %v9914_v53 = vrot.slane %v8349_v48, 2  ;;  %1988 = vst.msk [vmem:[#allocation3 + $0x68] sm:$0xf] %vm1961_vm12, %v1918_v45 }
 0x2bb   : > { %3895 = vrot.lane.b32.xlu0 %v4938_v22, %s5398_s30  ;;  %v3340_v5 = vsel %vm1290_vm15, %v3305_v27, -inf  ;;  %v3432_v23 = vsel %vm942_vm3, %v3404_v46, %v3405_v11  ;;  %v3596_v8 = vsel %vm1566_vm5, %v3561_v25, -inf  ;;  %v3688_v55 = vsel %vm972_vm8, %v3660_v36, %v3661_v49 }
 0x2bc   : > { %v3372_v44 = vmax.f32 %v3244_v57, %v3340_v5  ;;  %v3468_v10 = vsel %vm1428_vm0, %v3432_v23, -inf  ;;  %v3724_v18 = vsel %vm1704_vm6, %v3688_v55, -inf  ;;  %v3467_v39 = vsel %vm1427_vm9, %v3433_v14, -inf }
 0x2bd   : > { %v3499_v32 = vmax.f32 %v3371_v3, %v3467_v39  ;;  %v3689_v16 = vsel %vm972_vm8, %v9914_v53, %v3660_v36  ;;  %v3181_v47 = vmax.bf16 %v3147_v0, %v8401_v6  ;;  %v3214_v33 = vmax.bf16 %v3180_v51, %v8488_v63  ;;  %v8537_v42 = vpop.permute.xlu0 %2886 }
 0x2be   : > { %v3500_v19 = vmax.f32 %v3372_v44, %v3468_v10  ;;  %v3723_v9 = vsel %vm1703_vm11, %v3689_v16, -inf  ;;  %v3277_v35 = vrot.slane %v8470_v13, 7  ;;  %v3533_v62 = vrot.slane %v8470_v13, 6  ;;  %2973 = vst.msk [vmem:[#allocation3 + $0x28] sm:$0xf] %vm2962_vm13, %v8537_v42 }
 0x2bf   : > { %v3627_v50 = vmax.f32 %v3499_v32, %v3595_v29  ;;  %v3215_v40 = vmax.bf16 %v3181_v47, %v8512_v2  ;;  %v3246_v48 = vunpack.c.l.bf16 %v3214_v33  ;;  %v3115_v21 = vmax.bf16 %v8319_v1, %v8264_v34  ;;  %v8574_v33 = vld [vmem:[#allocation2 + $0x74] sm:$0xf] }
 0x2c0   : > { %v3628_v7 = vmax.f32 %v3500_v19, %v3596_v8  ;;  %v3304_v57 = vsel %vm927_vm2, %v3276_v28, %v3277_v35  ;;  %v3560_v3 = vsel %vm957_vm4, %v3532_v43, %v3533_v62  ;;  %v3148_v20 = vmax.bf16 %v3114_v12, %v8398_v58  ;;  %9915 = vst [vmem:[#allocation22_spill] sm:$0xff] %v8574_v33 }
 0x2c1   : > { %v3755_v41 = vmax.f32 %v3627_v50, %v3723_v9  ;;  %v8533_v61 = vunpack.c.l.bf16 %v3215_v40  ;;  %v3278_v29 = vrot.slane %v3246_v48, 7  ;;  %v3406_v22 = vrot.slane %v3246_v48, 1  ;;  %v1866_v32 = vpop.permute.xlu0 %1865 }
 0x2c2   : > { %v3756_v46 = vmax.f32 %v3628_v7, %v3724_v18  ;;  %v3534_v36 = vrot.slane %v3246_v48, 6  ;;  %v3662_v0 = vrot.slane %v3246_v48, 2  ;;  %v3341_v34 = vsel %vm1289_vm7, %v3304_v57, -inf  ;;  %1962 = vst.msk [vmem:[#allocation3] sm:$0xf] %vm1961_vm12, %v1866_v32 }
 0x2c3   : > { %v4940_v27 = vpack.c.bf16 %v3755_v41, %v3755_v41  ;;  %v3303_v28 = vsel %vm927_vm2, %v3277_v35, %v3278_v29  ;;  %v3407_v43 = vrot.slane %v8533_v61, 1  ;;  %v3663_v12 = vrot.slane %v8533_v61, 2  ;;  %v8580_v35 = vld [vmem:[#allocation2 + $0x78] sm:$0xf] }
 0x2c4   : > { %v4941_v25 = vpack.c.bf16 %v3756_v46, %v3756_v46  ;;  %v3342_v30 = vsel %vm1290_vm15, %v3303_v28, -inf  ;;  %v3559_v14 = vsel %vm957_vm4, %v3533_v62, %v3534_v36  ;;  %v3373_v51 = vmax.f32 %v8470_v13, %v3341_v34  ;;  %9916 = vst [vmem:[#allocation23_spill] sm:$0xff] %v8580_v35 }
 0x2c5   : > { %3899 = vrot.lane.b32.xlu0 %v4940_v27, %s5398_s30  ;;  %v3374_v5 = vmax.f32 %v3246_v48, %v3342_v30  ;;  %v3430_v23 = vsel %vm942_vm3, %v3406_v22, %v3407_v43  ;;  %v3598_v8 = vsel %vm1566_vm5, %v3559_v14, -inf  ;;  %v3686_v55 = vsel %vm972_vm8, %v3662_v0, %v3663_v12 }
 0x2c6   : > { %3901 = vrot.lane.b32.xlu1 %v4941_v25, %s5398_s30  ;;  %v3470_v44 = vsel %vm1428_vm0, %v3430_v23, -inf  ;;  %v3726_v10 = vsel %vm1704_vm6, %v3686_v55, -inf  ;;  %v3431_v18 = vsel %vm942_vm3, %v3405_v11, %v3406_v22  ;;  %v3597_v39 = vsel %vm1565_vm10, %v3560_v3, -inf }
 0x2c7   : > { %v3502_v53 = vmax.f32 %v3374_v5, %v3470_v44  ;;  %v3469_v16 = vsel %vm1427_vm9, %v3431_v18, -inf  ;;  %v3687_v47 = vsel %vm972_vm8, %v3661_v49, %v3662_v0  ;;  %v3149_v19 = vmax.bf16 %v3115_v21, %v8401_v6  ;;  %v8616_v44 = vld [vmem:[#allocation2 + $0x7c] sm:$0xf] }
 0x2c8   : > { %v3501_v11 = vmax.f32 %v3373_v51, %v3469_v16  ;;  %v3725_v9 = vsel %vm1703_vm11, %v3687_v47, -inf  ;;  %v3182_v62 = vmax.bf16 %v3148_v20, %v8488_v63  ;;  %v3279_v45 = vrot.slane %v8533_v61, 7  ;;  %9917 = vst [vmem:[#allocation24_spill] sm:$0xff] %v8616_v44  ;;  %v8633_v16 = vld [vmem:[#allocation2] sm:$0xf] }
 0x2c9   : > { %v3630_v13 = vmax.f32 %v3502_v53, %v3598_v8  ;;  %v3183_v50 = vmax.bf16 %v3149_v19, %v8512_v2  ;;  %v3535_v49 = vrot.slane %v8533_v61, 6  ;;  %v3116_v40 = vmax.bf16 %v8398_v58, %v8309_v56 }
 0x2ca   : > { %v3629_v48 = vmax.f32 %v3501_v11, %v3597_v39  ;;  %v3216_v21 = vmax.bf16 %v3182_v62, %v8574_v33  ;;  %v3302_v7 = vsel %vm927_vm2, %v3278_v29, %v3279_v45  ;;  %v3117_v57 = vmax.bf16 %v8401_v6, %v8319_v1  ;;  %v8641_v62 = vld [vmem:[#allocation2 + $0x8] sm:$0xf] }
 0x2cb   : > { %v3758_v3 = vmax.f32 %v3630_v13, %v3726_v10  ;;  %v3217_v20 = vmax.bf16 %v3183_v50, %v8580_v35  ;;  %v3343_v41 = vsel %vm1289_vm7, %v3302_v7, -inf  ;;  %v3558_v22 = vsel %vm957_vm4, %v3534_v36, %v3535_v49  ;;  %v8618_v10 = vld [vmem:[#allocation2 + $0x80] sm:$0xf] }
 0x2cc   : > { %v3757_v46 = vmax.f32 %v3629_v48, %v3725_v9  ;;  %v3248_v56 = vunpack.c.l.bf16 %v3216_v21  ;;  %v3375_v58 = vmax.f32 %v8533_v61, %v3343_v41  ;;  %v3599_v0 = vsel %vm1565_vm10, %v3558_v22, -inf  ;;  %9918 = vst [vmem:[#allocation25_spill] sm:$0xff] %v8618_v10  ;;  %v8649_v48 = vld [vmem:[#allocation2 + $0xc] sm:$0xf] }
 0x2cd   : > { %v4943_v29 = vpack.c.bf16 %v3758_v3, %v3758_v3  ;;  %v8601_v34 = vunpack.c.l.bf16 %v3217_v20  ;;  %v3150_v1 = vmax.bf16 %v3116_v40, %v8488_v63  ;;  %v3151_v6 = vmax.bf16 %v3117_v57, %v8512_v2  ;;  %v3060_v40 = vld [vmem:[#allocation2 + $0x4] sm:$0xf]  ;;  %v8655_v20 = vpop.permute.xlu1 %2884 }
 0x2ce   : > { %v4942_v27 = vpack.c.bf16 %v3757_v46, %v3757_v46  ;;  %v3280_v28 = vrot.slane %v3248_v56, 7  ;;  %v3408_v25 = vrot.slane %v3248_v56, 1  ;;  %v3536_v30 = vrot.slane %v3248_v56, 6  ;;  %2972 = vst.msk [vmem:[#allocation3 + $0x24] sm:$0xf] %vm2962_vm13, %v8655_v20 }
 0x2cf   : > { %3905 = vrot.lane.b32.xlu1 %v4943_v29, %s5398_s30  ;;  %v3409_v36 = vrot.slane %v8601_v34, 1  ;;  %v3664_v14 = vrot.slane %v3248_v56, 2  ;;  %v3665_v51 = vrot.slane %v8601_v34, 2  ;;  %v3184_v5 = vmax.bf16 %v3150_v1, %v8574_v33 }
 0x2d0   : > { %3903 = vrot.lane.b32.xlu0 %v4942_v27, %s5398_s30  ;;  %v3301_v23 = vsel %vm927_vm2, %v3279_v45, %v3280_v28  ;;  %v3557_v8 = vsel %vm957_vm4, %v3535_v49, %v3536_v30  ;;  %v3429_v55 = vsel %vm942_vm3, %v3407_v43, %v3408_v25  ;;  %v3185_v18 = vmax.bf16 %v3151_v6, %v8580_v35 }
 0x2d1   : > { %v3344_v39 = vsel %vm1290_vm15, %v3301_v23, -inf  ;;  %v3428_v32 = vsel %vm942_vm3, %v3408_v25, %v3409_v36  ;;  %v3600_v53 = vsel %vm1566_vm5, %v3557_v8, -inf  ;;  %v3684_v43 = vsel %vm972_vm8, %v3664_v14, %v3665_v51 }
 0x2d2   : > { %v3376_v47 = vmax.f32 %v3248_v56, %v3344_v39  ;;  %v3472_v19 = vsel %vm1428_vm0, %v3428_v32, -inf  ;;  %v3728_v11 = vsel %vm1704_vm6, %v3684_v43, -inf  ;;  %v3471_v9 = vsel %vm1427_vm9, %v3429_v55, -inf  ;;  %v3063_v43 = vld [vmem:[#allocation2 + $0x10] sm:$0xf] }
 0x2d3   : > { %v3503_v45 = vmax.f32 %v3375_v58, %v3471_v9  ;;  %v3685_v13 = vsel %vm972_vm8, %v3663_v12, %v3664_v14  ;;  %v3218_v50 = vmax.bf16 %v3184_v5, %v8616_v44  ;;  %v3219_v49 = vmax.bf16 %v3185_v18, %v8618_v10 }
 0x2d4   : > { %v3504_v21 = vmax.f32 %v3376_v47, %v3472_v19  ;;  %v3727_v7 = vsel %vm1703_vm11, %v3685_v13, -inf  ;;  %v3281_v57 = vrot.slane %v8601_v34, 7  ;;  %v3537_v3 = vrot.slane %v8601_v34, 6  ;;  %v8705_v13 = vld [vmem:[#allocation2 + $0x84] sm:$0xf] }
 0x2d5   : > { %v3631_v61 = vmax.f32 %v3503_v45, %v3599_v0  ;;  %v8657_v41 = vunpack.c.l.bf16 %v3218_v50  ;;  %v8659_v12 = vunpack.c.l.bf16 %v3219_v49  ;;  %v3093_v22 = vmax.bf16 %v8641_v62, %v8633_v16  ;;  %v8692_v16 = vpop.permute.xlu1 %2888  ;;  %v8703_v45 = vld [vmem:[#allocation2 + $0x14] sm:$0xf]  ;;  %9920 = vst [vmem:[#allocation27_spill] sm:$0xff] %v8705_v13 }
 0x2d6   : > { %v3632_v46 = vmax.f32 %v3504_v21, %v3600_v53  ;;  %v3300_v56 = vsel %vm927_vm2, %v3280_v28, %v3281_v57  ;;  %v3556_v58 = vsel %vm957_vm4, %v3536_v30, %v3537_v3  ;;  %v3094_v29 = vmax.bf16 %v8649_v48, %v3060_v40  ;;  %2974 = vst.msk [vmem:[#allocation3 + $0x2c] sm:$0xf] %vm2962_vm13, %v8692_v16 }
 0x2d7   : > { %9919 = vst [vmem:[#allocation26_spill] sm:$0xff] %v8657_v41  ;;  %v3759_v1 = vmax.f32 %v3631_v61, %v3727_v7  ;;  %v9822_v6 = vrot.slane %v8657_v41, 7  ;;  %v3410_v0 = vrot.slane %v8657_v41, 1  ;;  %v9820_v27 = vrot.slane %v8659_v12, 1  ;;  %v8720_v7 = vld [vmem:[#allocation2 + $0x18] sm:$0xf] }
 0x2d8   : > { %v3760_v25 = vmax.f32 %v3632_v46, %v3728_v11  ;;  %v9821_v14 = vrot.slane %v8657_v41, 6  ;;  %v3666_v5 = vrot.slane %v8657_v41, 2  ;;  %v9819_v23 = vrot.slane %v8659_v12, 2  ;;  %v8726_v46 = vld [vmem:[#allocation2 + $0x1c] sm:$0xf] }
 0x2d9   : > { %v4944_v28 = vpack.c.bf16 %v3759_v1, %v3759_v1  ;;  %v3299_v30 = vsel %vm927_vm2, %v3281_v57, %v9822_v6  ;;  %v3426_v8 = vsel %vm942_vm3, %v3410_v0, %v9820_v27  ;;  %v3345_v55 = vsel %vm1289_vm7, %v3300_v56, -inf  ;;  %v8729_v56 = vld [vmem:[#allocation2 + $0x8c] sm:$0xf] }
 0x2da   : > { %v4945_v18 = vpack.c.bf16 %v3760_v25, %v3760_v25  ;;  %v3346_v39 = vsel %vm1290_vm15, %v3299_v30, -inf  ;;  %v3474_v32 = vsel %vm1428_vm0, %v3426_v8, -inf  ;;  %v3555_v53 = vsel %vm957_vm4, %v3537_v3, %v9821_v14  ;;  %9921 = vst [vmem:[#allocation28_spill] sm:$0xff] %v8729_v56  ;;  %v8740_v8 = vld [vmem:[#allocation2 + $0x20] sm:$0xf] }
 0x2db   : > { %3907 = vrot.lane.b32.xlu0 %v4944_v28, %s5398_s30  ;;  %v3378_v47 = vmax.f32 %v8657_v41, %v3346_v39  ;;  %v3602_v19 = vsel %vm1566_vm5, %v3555_v53, -inf  ;;  %v3682_v11 = vsel %vm972_vm8, %v3666_v5, %v9819_v23  ;;  %v3377_v9 = vmax.f32 %v8601_v34, %v3345_v55  ;;  %v8747_v39 = vpop.permute.xlu0 %2890  ;;  %v8749_v53 = vld [vmem:[#allocation2 + $0x24] sm:$0xf] }
 0x2dc   : > { %3909 = vrot.lane.b32.xlu1 %v4945_v18, %s5398_s30  ;;  %v3730_v50 = vsel %vm1704_vm6, %v3682_v11, -inf  ;;  %v3427_v49 = vsel %vm942_vm3, %v3409_v36, %v3410_v0  ;;  %v3601_v40 = vsel %vm1565_vm10, %v3556_v58, -inf  ;;  %v3683_v21 = vsel %vm972_vm8, %v3665_v51, %v3666_v5  ;;  %v8735_v5 = vld [vmem:[#allocation2 + $0x94] sm:$0xf]  ;;  %v8745_v18 = vpop.permute.xlu1 %2892  ;;  %2975 = vst.msk [vmem:[#allocation3 + $0x30] sm:$0xf] %vm2962_vm13, %v8747_v39 }
 0x2dd   : > { %v3506_v57 = vmax.f32 %v3378_v47, %v3474_v32  ;;  %v3473_v3 = vsel %vm1427_vm9, %v3427_v49, -inf  ;;  %v3729_v61 = vsel %vm1703_vm11, %v3683_v21, -inf  ;;  %v3095_v36 = vmax.bf16 %v3063_v43, %v8641_v62  ;;  %9922 = vst [vmem:[#allocation29_spill] sm:$0xff] %v8735_v5  ;;  %v3194_v47 = vld [vmem:[#allocation2 + $0x9c] sm:$0xf] }
 0x2de   : > { %v3505_v58 = vmax.f32 %v3377_v9, %v3473_v3  ;;  %v3127_v34 = vmax.bf16 %v3093_v22, %v3063_v43  ;;  %v3128_v1 = vmax.bf16 %v3094_v29, %v8703_v45  ;;  %v3124_v51 = vmax.bf16 %v8705_v13, %v8616_v44  ;;  %2976 = vst.msk [vmem:[#allocation3 + $0x34] sm:$0xf] %vm2962_vm13, %v8745_v18  ;;  %v5384_v18 = vld [vmem:[#allocation2 + $0x64] sm:$0xf] }
 0x2df   : > { %v3634_v0 = vmax.f32 %v3506_v57, %v3602_v19  ;;  %v3129_v25 = vmax.bf16 %v3095_v36, %v8720_v7  ;;  %v3096_v28 = vmax.bf16 %v8703_v45, %v8649_v48  ;;  %v3097_v30 = vmax.bf16 %v8720_v7, %v3063_v43  ;;  %v9923_v57 = vld [vmem:[#allocation17_spill] sm:$0xff] }
 0x2e0   : > { %v3633_v62 = vmax.f32 %v3505_v58, %v3601_v40  ;;  %v3161_v22 = vmax.bf16 %v3127_v34, %v8720_v7  ;;  %v3162_v29 = vmax.bf16 %v3128_v1, %v8726_v46  ;;  %v3158_v55 = vmax.bf16 %v8729_v56, %v3124_v51 }
 0x2e1   : > { %v3762_v32 = vmax.f32 %v3634_v0, %v3730_v50  ;;  %v3163_v48 = vmax.bf16 %v3129_v25, %v8740_v8  ;;  %v3130_v43 = vmax.bf16 %v3096_v28, %v8726_v46  ;;  %v3131_v19 = vmax.bf16 %v3097_v30, %v8740_v8  ;;  %v9925_v0 = vld [vmem:[#allocation19_spill] sm:$0xff]  ;;  %v9926_v28 = vld [vmem:[#allocation18_spill] sm:$0xff] }
 0x2e2   : > { %v3761_v11 = vmax.f32 %v3633_v62, %v3729_v61  ;;  %v3195_v9 = vmax.bf16 %v3161_v22, %v8740_v8  ;;  %v3196_v49 = vmax.bf16 %v3162_v29, %v8749_v53  ;;  %v3192_v40 = vmax.bf16 %v8735_v5, %v3158_v55 }
 0x2e3   : > { %v4947_v21 = vpack.c.bf16 %v3762_v32, %v3762_v32  ;;  %v3197_v3 = vmax.bf16 %v3163_v48, %v9923_v57  ;;  %v3164_v50 = vmax.bf16 %v3130_v43, %v8749_v53  ;;  %v3165_v36 = vmax.bf16 %v3131_v19, %v9923_v57  ;;  %v8776_v48 = vpop.permute.xlu1 %2896 }
 0x2e4   : > { %v4946_v58 = vpack.c.bf16 %v3761_v11, %v3761_v11  ;;  %v8760_v34 = vunpack.c.l.bf16 %v3195_v9  ;;  %v8762_v1 = vunpack.c.l.bf16 %v3196_v49  ;;  %v3226_v51 = vmax.bf16 %v3194_v47, %v3192_v40  ;;  %v8778_v47 = vpop.permute.xlu0 %2894  ;;  %2978 = vst.msk [vmem:[#allocation3 + $0x3c] sm:$0xf] %vm2962_vm13, %v8776_v48 }
 0x2e5   : > { %3913 = vrot.lane.b32.xlu1 %v4947_v21, %s5398_s30  ;;  %v8765_v61 = vunpack.c.l.bf16 %v3197_v3  ;;  %v3198_v25 = vmax.bf16 %v3164_v50, %v9925_v0  ;;  %v3199_v30 = vmax.bf16 %v3165_v36, %v9926_v28  ;;  %2977 = vst.msk [vmem:[#allocation3 + $0x38] sm:$0xf] %vm2962_vm13, %v8778_v47  ;;  %v3118_v39 = vmax.bf16 %v5384_v18, %v8488_v63  ;;  %v5385_v47 = vld [vmem:[#allocation2 + $0x68] sm:$0xf] }
 0x2e6   : > { %9924 = vst [vmem:[#allocation17_spill] sm:$0xff] %v8760_v34  ;;  %3911 = vrot.lane.b32.xlu0 %v4946_v58, %s5398_s30  ;;  %v3259_v22 = vrot.slane %v8760_v34, 7  ;;  %v3260_v29 = vrot.slane %v8762_v1, 7  ;;  %v3388_v55 = vrot.slane %v8762_v1, 1  ;;  %v3515_v32 = vrot.slane %v8760_v34, 6 }
 0x2e7   : > { %v3389_v43 = vrot.slane %v8765_v61, 1  ;;  %v9828_v19 = vrot.slane %v8762_v1, 6  ;;  %v3644_v11 = vrot.slane %v8762_v1, 2  ;;  %v9823_v9 = vrot.slane %v8765_v61, 2  ;;  %v8825_v62 = vpop.permute.xlu1 %2900 }
 0x2e8   : > { %v3321_v49 = vsel %vm927_vm2, %v3259_v22, %v3260_v29  ;;  %v8786_v40 = vunpack.c.l.bf16 %v3226_v51  ;;  %v9825_v21 = vrot.slane %v8760_v34, 1  ;;  %v9824_v57 = vrot.slane %v8760_v34, 2  ;;  %2980 = vst.msk [vmem:[#allocation3 + $0x44] sm:$0xf] %vm2962_vm13, %v8825_v62 }
 0x2e9   : > { %v3324_v3 = vsel %vm1290_vm15, %v3321_v49, -inf  ;;  %v3448_v50 = vsel %vm942_vm3, %v3388_v55, %v3389_v43  ;;  %v3577_v36 = vsel %vm957_vm4, %v3515_v32, %v9828_v19  ;;  %v3704_v58 = vsel %vm972_vm8, %v3644_v11, %v9823_v9  ;;  %v8827_v9 = vpop.permute.xlu0 %2898 }
 0x2ea   : > { %9927 = vst [vmem:[#allocation19_spill] sm:$0xff] %v8786_v40  ;;  %v3356_v51 = vmax.f32 %v8762_v1, %v3324_v3  ;;  %v3452_v0 = vsel %vm1428_vm0, %v3448_v50, -inf  ;;  %v3580_v28 = vsel %vm1566_vm5, %v3577_v36, -inf  ;;  %v3708_v49 = vsel %vm1704_vm6, %v3704_v58, -inf  ;;  %2979 = vst.msk [vmem:[#allocation3 + $0x40] sm:$0xf] %vm2962_vm13, %v8827_v9 }
 0x2eb   : > { %v9826_v23 = vrot.slane %v8786_v40, 7  ;;  %v3449_v27 = vsel %vm942_vm3, %v9825_v21, %v3388_v55  ;;  %v9827_v14 = vrot.slane %v8786_v40, 6  ;;  %v3705_v3 = vsel %vm972_vm8, %v9824_v57, %v3644_v11 }
 0x2ec   : > { %v3484_v50 = vmax.f32 %v3356_v51, %v3452_v0  ;;  %v3451_v36 = vsel %vm1427_vm9, %v3449_v27, -inf  ;;  %v3707_v58 = vsel %vm1703_vm11, %v3705_v3, -inf  ;;  %v8823_v6 = vunpack.c.l.bf16 %v3198_v25 }
 0x2ed   : > { %v3322_v55 = vsel %vm927_vm2, %v9826_v23, %v3259_v22  ;;  %v3578_v11 = vsel %vm957_vm4, %v9827_v14, %v3515_v32  ;;  %v8837_v27 = vunpack.c.l.bf16 %v3199_v30  ;;  %v3261_v51 = vrot.slane %v8765_v61, 7 }
 0x2ee   : > { %v3612_v25 = vmax.f32 %v3484_v50, %v3580_v28  ;;  %v3323_v0 = vsel %vm1289_vm7, %v3322_v55, -inf  ;;  %v3579_v3 = vsel %vm1565_vm10, %v3578_v11, -inf  ;;  %v3262_v57 = vrot.slane %v8823_v6, 7 }
 0x2ef   : > { %v3355_v22 = vmax.f32 %v8760_v34, %v3323_v0  ;;  %v3390_v21 = vrot.slane %v8823_v6, 1  ;;  %v9834_v23 = vrot.slane %v8837_v27, 1  ;;  %v3517_v30 = vrot.slane %v8765_v61, 6 }
 0x2f0   : > { %v3740_v32 = vmax.f32 %v3612_v25, %v3708_v49  ;;  %v3319_v28 = vsel %vm927_vm2, %v3261_v51, %v3262_v57  ;;  %v3518_v50 = vrot.slane %v8823_v6, 6  ;;  %v3646_v55 = vrot.slane %v8823_v6, 2 }
 0x2f1   : > { %v3483_v14 = vmax.f32 %v3355_v22, %v3451_v36  ;;  %v3326_v11 = vsel %vm1290_vm15, %v3319_v28, -inf  ;;  %v3446_v0 = vsel %vm942_vm3, %v3390_v21, %v9834_v23  ;;  %v9835_v19 = vrot.slane %v8837_v27, 2  ;;  %v8865_v36 = vpop.permute.xlu1 %2904  ;;  %v8867_v22 = vpop.permute.xlu0 %2902 }
 0x2f2   : > { %v4925_v34 = vpack.c.bf16 %v3740_v32, %v3740_v32  ;;  %v3358_v49 = vmax.f32 %v8823_v6, %v3326_v11  ;;  %v3454_v25 = vsel %vm1428_vm0, %v3446_v0, -inf  ;;  %v3575_v40 = vsel %vm957_vm4, %v3517_v30, %v3518_v50  ;;  %2982 = vst.msk [vmem:[#allocation3 + $0x4c] sm:$0xf] %vm2962_vm13, %v8865_v36  ;;  %2981 = vst.msk [vmem:[#allocation3 + $0x48] sm:$0xf] %vm2962_vm13, %v8867_v22 }
 0x2f3   : > { %v3611_v28 = vmax.f32 %v3483_v14, %v3579_v3  ;;  %v3582_v5 = vsel %vm1566_vm5, %v3575_v40, -inf  ;;  %v3702_v32 = vsel %vm972_vm8, %v3646_v55, %v9835_v19  ;;  %v3320_v6 = vsel %vm927_vm2, %v3260_v29, %v3261_v51 }
 0x2f4   : > { %3869 = vrot.lane.b32.xlu1 %v4925_v34, %s5398_s30  ;;  %v3486_v11 = vmax.f32 %v3358_v49, %v3454_v25  ;;  %v3710_v0 = vsel %vm1704_vm6, %v3702_v32, -inf  ;;  %v3325_v14 = vsel %vm1289_vm7, %v3320_v6, -inf  ;;  %v3447_v40 = vsel %vm942_vm3, %v3389_v43, %v3390_v21  ;;  %v5376_v6 = vld [vmem:[#allocation2 + $0x28] sm:$0xf] }
 0x2f5   : > { %v3739_v3 = vmax.f32 %v3611_v28, %v3707_v58  ;;  %v3357_v23 = vmax.f32 %v8765_v61, %v3325_v14  ;;  %v3453_v19 = vsel %vm1427_vm9, %v3447_v40, -inf  ;;  %v9928_v29 = vrot.slane %v8762_v1, 6  ;;  %v8907_v14 = vpop.permute.xlu1 %2908 }
 0x2f6   : > { %v3614_v51 = vmax.f32 %v3486_v11, %v3582_v5  ;;  %v9929_v25 = vrot.slane %v8765_v61, 2  ;;  %v3099_v21 = vmax.bf16 %v8740_v8, %v8720_v7  ;;  %v9930_v5 = vmax.bf16 %v8726_v46, %v8703_v45  ;;  %v8909_v7 = vpop.permute.xlu0 %2906  ;;  %2984 = vst.msk [vmem:[#allocation3 + $0x54] sm:$0xf] %vm2962_vm13, %v8907_v14 }
 0x2f7   : > { %v3576_v34 = vsel %vm957_vm4, %v9928_v29, %v3517_v30  ;;  %v4924_v58 = vpack.c.bf16 %v3739_v3, %v3739_v3  ;;  %v3485_v28 = vmax.f32 %v3357_v23, %v3453_v19  ;;  %v3263_v61 = vrot.slane %v8837_v27, 7  ;;  %v8912_v19 = vld [vmem:[#allocation2 + $0x2c] sm:$0xf]  ;;  %v5378_v29 = vld [vmem:[#allocation2 + $0x30] sm:$0xf] }
 0x2f8   : > { %v3581_v49 = vsel %vm1565_vm10, %v3576_v34, -inf  ;;  %v3703_v43 = vsel %vm972_vm8, %v9929_v25, %v3646_v55  ;;  %v3132_v30 = vmax.bf16 %v9930_v5, %v8749_v53  ;;  %v3742_v32 = vmax.f32 %v3614_v51, %v3710_v0  ;;  %2983 = vst.msk [vmem:[#allocation3 + $0x50] sm:$0xf] %vm2962_vm13, %v8909_v7 }
 0x2f9   : > { %v3709_v1 = vsel %vm1703_vm11, %v3703_v43, -inf  ;;  %v3133_v11 = vmax.bf16 %v5376_v6, %v3099_v21  ;;  %v3519_v55 = vrot.slane %v8837_v27, 6  ;;  %3867 = vrot.lane.b32.xlu0 %v4924_v58, %s5398_s30  ;;  %v3613_v23 = vmax.f32 %v3485_v28, %v3581_v49  ;;  %v8922_v49 = vld [vmem:[#allocation2 + $0x34] sm:$0xf] }
 0x2fa   : > { %v3166_v40 = vmax.bf16 %v8912_v19, %v3132_v30  ;;  %v3100_v45 = vmax.bf16 %v8749_v53, %v8726_v46  ;;  %v3101_v0 = vmax.bf16 %v5376_v6, %v8740_v8  ;;  %v4927_v3 = vpack.c.bf16 %v3742_v32, %v3742_v32  ;;  %v5380_v46 = vld [vmem:[#allocation2 + $0x38] sm:$0xf] }
 0x2fb   : > { %v3167_v34 = vmax.bf16 %v5378_v29, %v3133_v11  ;;  %v3318_v51 = vsel %vm927_vm2, %v3262_v57, %v3263_v61  ;;  %v3574_v25 = vsel %vm957_vm4, %v3518_v50, %v3519_v55  ;;  %v3741_v43 = vmax.f32 %v3613_v23, %v3709_v1  ;;  %v8937_v23 = vpop.permute.xlu1 %2912 }
 0x2fc   : > { %v3200_v21 = vmax.bf16 %v8922_v49, %v3166_v40  ;;  %v3327_v58 = vsel %vm1289_vm7, %v3318_v51, -inf  ;;  %3873 = vrot.lane.b32.xlu1 %v4927_v3, %s5398_s30  ;;  %v3134_v28 = vmax.bf16 %v8912_v19, %v3100_v45  ;;  %v3135_v5 = vmax.bf16 %v5378_v29, %v3101_v0  ;;  %v8939_v40 = vpop.permute.xlu0 %2910  ;;  %2986 = vst.msk [vmem:[#allocation3 + $0x5c] sm:$0xf] %vm2962_vm13, %v8937_v23 }
 0x2fd   : > { %v3201_v8 = vmax.bf16 %v5380_v46, %v3167_v34  ;;  %v4926_v30 = vpack.c.bf16 %v3741_v43, %v3741_v43  ;;  %v3583_v50 = vsel %vm1565_vm10, %v3574_v25, -inf  ;;  %v3359_v32 = vmax.f32 %v8837_v27, %v3327_v58  ;;  %v8948_v25 = vld [vmem:[#allocation2 + $0x3c] sm:$0xf]  ;;  %2985 = vst.msk [vmem:[#allocation3 + $0x58] sm:$0xf] %vm2962_vm13, %v8939_v40 }
 0x2fe   : > { %v8929_v57 = vunpack.c.l.bf16 %v3200_v21  ;;  %v3168_v6 = vmax.bf16 %v8922_v49, %v3134_v28  ;;  %v3169_v11 = vmax.bf16 %v5380_v46, %v3135_v5  ;;  %v5382_v21 = vld [vmem:[#allocation2 + $0x40] sm:$0xf]  ;;  %v9931_v28 = vrot.slane %v8837_v27, 1 }
 0x2ff   : > { %v8933_v1 = vunpack.c.l.bf16 %v3201_v8  ;;  %3871 = vrot.lane.b32.xlu0 %v4926_v30, %s5398_s30  ;;  %v3102_v30 = vmax.bf16 %v8912_v19, %v8749_v53  ;;  %v3119_v9 = vmax.bf16 %v5385_v47, %v8512_v2  ;;  %v3283_v36 = vrot.slane %v8659_v12, 7 }
 0x300   : > { %v3264_v45 = vrot.slane %v8929_v57, 7  ;;  %v3392_v0 = vrot.slane %v8929_v57, 1  ;;  %v9837_v3 = vrot.slane %v8929_v57, 6  ;;  %v3648_v29 = vrot.slane %v8929_v57, 2 }
 0x301   : > { %v3393_v34 = vrot.slane %v8933_v1, 1  ;;  %v9836_v51 = vrot.slane %v8933_v1, 2  ;;  %v3202_v43 = vmax.bf16 %v8948_v25, %v3168_v6  ;;  %v3203_v58 = vmax.bf16 %v5382_v21, %v3169_v11 }
 0x302   : > { %v3317_v46 = vsel %vm927_vm2, %v3263_v61, %v3264_v45  ;;  %v3573_v8 = vsel %vm957_vm4, %v3519_v55, %v9837_v3  ;;  %v3445_v5 = vsel %vm942_vm3, %v9931_v28, %v3392_v0  ;;  %v9932_v55 = vrot.slane %v8837_v27, 2 }
 0x303   : > { %v3328_v6 = vsel %vm1290_vm15, %v3317_v46, -inf  ;;  %v3444_v11 = vsel %vm942_vm3, %v3392_v0, %v3393_v34  ;;  %v3700_v61 = vsel %vm972_vm8, %v3648_v29, %v9836_v51  ;;  %v3584_v19 = vsel %vm1566_vm5, %v3573_v8, -inf }
 0x304   : > { %v3701_v21 = vsel %vm972_vm8, %v9932_v55, %v3648_v29  ;;  %v3360_v28 = vmax.f32 %v8929_v57, %v3328_v6  ;;  %v3456_v53 = vsel %vm1428_vm0, %v3444_v11, -inf  ;;  %v3455_v0 = vsel %vm1427_vm9, %v3445_v5, -inf  ;;  %v8988_v29 = vpop.permute.xlu1 %2868  ;;  %v8990_v6 = vpop.permute.xlu0 %2866 }
 0x305   : > { %v3712_v46 = vsel %vm1704_vm6, %v3700_v61, -inf  ;;  %v3487_v51 = vmax.f32 %v3359_v32, %v3455_v0  ;;  %v8984_v3 = vunpack.c.l.bf16 %v3202_v43  ;;  %v8986_v27 = vunpack.c.l.bf16 %v3203_v58  ;;  %2964 = vst.msk [vmem:[#allocation3 + $0x4] sm:$0xf] %vm2962_vm13, %v8988_v29  ;;  %2963 = vst.msk [vmem:[#allocation3] sm:$0xf] %vm2962_vm13, %v8990_v6 }
 0x306   : > { %v3488_v55 = vmax.f32 %v3360_v28, %v3456_v53  ;;  %v3711_v11 = vsel %vm1703_vm11, %v3701_v21, -inf  ;;  %v3265_v8 = vrot.slane %v8933_v1, 7  ;;  %v3521_v5 = vrot.slane %v8933_v1, 6  ;;  %v5090_v21 = vld [vmem:[%s9749_s3] sm:$0xff]  }
 0x307   : > { %v3615_v56 = vmax.f32 %v3487_v51, %v3583_v50  ;;  %v3266_v61 = vrot.slane %v8984_v3, 7  ;;  %v3394_v32 = vrot.slane %v8984_v3, 1  ;;  %v9848_v43 = vrot.slane %v8986_v27, 1  ;;  %5024 = vmatprep.subr.bf16.mxu1 %v5090_v21 }
 0x308   : > { %v3616_v58 = vmax.f32 %v3488_v55, %v3584_v19  ;;  %v3522_v0 = vrot.slane %v8984_v3, 6  ;;  %v3650_v13 = vrot.slane %v8984_v3, 2  ;;  %v3316_v19 = vsel %vm927_vm2, %v3264_v45, %v3265_v8  ;;  %v9022_v33 = vpop.permute.xlu1 %2872  ;;  %v9024_v45 = vpop.permute.xlu0 %2870  ;;  %5025 = vmatpush3.bf16.msra.mxu1 %v5090_v21 }
 0x309   : > { %v3743_v53 = vmax.f32 %v3615_v56, %v3711_v11  ;;  %v3315_v50 = vsel %vm927_vm2, %v3265_v8, %v3266_v61  ;;  %v3442_v51 = vsel %vm942_vm3, %v3394_v32, %v9848_v43  ;;  %v3136_v56 = vmax.bf16 %v8922_v49, %v3102_v30  ;;  %v9933_v43 = vld [vmem:[#allocation20_spill] sm:$0xff]  ;;  %2966 = vst.msk [vmem:[#allocation3 + $0xc] sm:$0xf] %vm2962_vm13, %v9022_v33 }
 0x30a   : > { %v3744_v55 = vmax.f32 %v3616_v58, %v3712_v46  ;;  %v3330_v28 = vsel %vm1290_vm15, %v3315_v50, -inf  ;;  %v3571_v10 = vsel %vm957_vm4, %v3521_v5, %v3522_v0  ;;  %v3458_v41 = vsel %vm1428_vm0, %v3442_v51, -inf  ;;  %2965 = vst.msk [vmem:[#allocation3 + $0x8] sm:$0xf] %vm2962_vm13, %v9024_v45 }
 0x30b   : > { %v4928_v11 = vpack.c.bf16 %v3743_v53, %v3743_v53  ;;  %v3362_v44 = vmax.f32 %v8984_v3, %v3330_v28  ;;  %v3397_v35 = vrot.slane %v9933_v43, 1  ;;  %v3586_v8 = vsel %vm1566_vm5, %v3571_v10, -inf }
 0x30c   : > { %v4929_v46 = vpack.c.bf16 %v3744_v55, %v3744_v55  ;;  %v3329_v49 = vsel %vm1289_vm7, %v3316_v19, -inf  ;;  %v3443_v3 = vsel %vm942_vm3, %v3393_v34, %v3394_v32  ;;  %v9934_v58 = vrot.slane %v8986_v27, 2 }
 0x30d   : > { %3875 = vrot.lane.b32.xlu0 %v4928_v11, %s5398_s30  ;;  %v3490_v30 = vmax.f32 %v3362_v44, %v3458_v41  ;;  %v3361_v21 = vmax.f32 %v8933_v1, %v3329_v49  ;;  %v9935_v53 = vrot.slane %v8929_v57, 6  ;;  %v3457_v34 = vsel %vm1427_vm9, %v3443_v3, -inf  ;;  %v2877_v3 = vpop.permute.xlu1 %2876 }
 0x30e   : > { %v3698_v28 = vsel %vm972_vm8, %v3650_v13, %v9934_v58  ;;  %3877 = vrot.lane.b32.xlu1 %v4929_v46, %s5398_s30  ;;  %v9936_v32 = vrot.slane %v8933_v1, 2  ;;  %v3170_v41 = vmax.bf16 %v8948_v25, %v3136_v56  ;;  %v3267_v50 = vrot.slane %v8986_v27, 7  ;;  %v5383_v1 = vld [vmem:[#allocation2 + $0x44] sm:$0xf]  ;;  %2968 = vst.msk [vmem:[#allocation3 + $0x14] sm:$0xf] %vm2962_vm13, %v2877_v3 }
 0x30f   : > { %v3572_v10 = vsel %vm957_vm4, %v9935_v53, %v3521_v5  ;;  %v3618_v51 = vmax.f32 %v3490_v30, %v3586_v8  ;;  %v3489_v19 = vmax.f32 %v3361_v21, %v3457_v34  ;;  %v3523_v57 = vrot.slane %v8986_v27, 6  ;;  %v2875_v30 = vpop.permute.xlu0 %2874  ;;  %v9937_v21 = vld [vmem:[#allocation21_spill] sm:$0xff]  ;;  %v9946_v3 = vld [vmem:[#allocation26_spill] sm:$0xff] }
 0x310   : > { %v3699_v44 = vsel %vm972_vm8, %v9936_v32, %v3650_v13  ;;  %v3653_v5 = vrot.slane %v9933_v43, 2  ;;  %v3714_v55 = vsel %vm1704_vm6, %v3698_v28, -inf  ;;  %v3585_v11 = vsel %vm1565_vm10, %v3572_v10, -inf  ;;  %2967 = vst.msk [vmem:[#allocation3 + $0x10] sm:$0xf] %vm2962_vm13, %v2875_v30 }
 0x311   : > { %v3204_v46 = vmax.bf16 %v5383_v1, %v3170_v41  ;;  %v3314_v13 = vsel %vm927_vm2, %v3266_v61, %v3267_v50  ;;  %v3746_v25 = vmax.f32 %v3618_v51, %v3714_v55  ;;  %v3617_v56 = vmax.f32 %v3489_v19, %v3585_v11 }
 0x312   : > { %v3713_v8 = vsel %vm1703_vm11, %v3699_v44, -inf  ;;  %v9063_v49 = vsel %vm1289_vm7, %v3314_v13, -inf  ;;  %v3570_v28 = vsel %vm957_vm4, %v3522_v0, %v3523_v57  ;;  %v9938_v53 = vrot.slane %v9937_v21, 1 }
 0x313   : > { %v9065_v58 = vunpack.c.l.bf16 %v3204_v46  ;;  %v9939_v10 = vrot.slane %v9937_v21, 2  ;;  %v4931_v32 = vpack.c.bf16 %v3746_v25, %v3746_v25  ;;  %v3745_v44 = vmax.f32 %v3617_v56, %v3713_v8  ;;  %v9944_v56 = vld [vmem:[#allocation22_spill] sm:$0xff]  ;;  %v9945_v8 = vld [vmem:[#allocation23_spill] sm:$0xff] }
 0x314   : > { %v3439_v61 = vsel %vm942_vm3, %v3397_v35, %v9938_v53  ;;  %v3363_v41 = vmax.f32 %v8986_v27, %v9063_v49  ;;  %v3587_v37 = vsel %vm1565_vm10, %v3570_v28, -inf  ;;  %v9940_v14 = vrot.slane %v8986_v27, 1 }
 0x315   : > { %v3695_v34 = vsel %vm972_vm8, %v3653_v5, %v9939_v10  ;;  %v3268_v0 = vrot.slane %v9065_v58, 7  ;;  %v3396_v51 = vrot.slane %v9065_v58, 1  ;;  %v3524_v19 = vrot.slane %v9065_v58, 6  ;;  %3881 = vrot.lane.b32.xlu1 %v4931_v32, %s5398_s30 }
 0x316   : > { %v3652_v55 = vrot.slane %v9065_v58, 2  ;;  %v4930_v17 = vpack.c.bf16 %v3745_v44, %v3745_v44  ;;  %v3461_v26 = vsel %vm1427_vm9, %v3439_v61, -inf  ;;  %v3717_v42 = vsel %vm1703_vm11, %v3695_v34, -inf  ;;  %v3125_v61 = vld [vmem:[#allocation2 + $0x88] sm:$0xf]  ;;  %v9948_v34 = vld [vmem:[#allocation24_spill] sm:$0xff] }
 0x317   : > { %v3313_v33 = vsel %vm927_vm2, %v3267_v50, %v3268_v0  ;;  %v3440_v20 = vsel %vm942_vm3, %v3396_v51, %v3397_v35  ;;  %v3569_v16 = vsel %vm957_vm4, %v3523_v57, %v3524_v19  ;;  %v3441_v7 = vsel %vm942_vm3, %v9940_v14, %v3396_v51  ;;  %v9949_v44 = vld [vmem:[#allocation25_spill] sm:$0xff] }
 0x318   : > { %3879 = vrot.lane.b32.xlu0 %v4930_v17, %s5398_s30  ;;  %v3332_v62 = vsel %vm1290_vm15, %v3313_v33, -inf  ;;  %v3696_v48 = vsel %vm972_vm8, %v3652_v55, %v3653_v5  ;;  %v3460_v22 = vsel %vm1428_vm0, %v3440_v20, -inf  ;;  %v9941_v23 = vrot.slane %v9933_v43, 7 }
 0x319   : > { %v3364_v35 = vmax.f32 %v9065_v58, %v3332_v62  ;;  %v3588_v29 = vsel %vm1566_vm5, %v3569_v16, -inf  ;;  %v3459_v6 = vsel %vm1427_vm9, %v3441_v7, -inf  ;;  %v9942_v45 = vrot.slane %v8986_v27, 2 }
 0x31a   : > { %v3312_v40 = vsel %vm927_vm2, %v3268_v0, %v9941_v23  ;;  %v3491_v11 = vmax.f32 %v3363_v41, %v3459_v6  ;;  %v9943_v46 = vrot.slane %v9933_v43, 6  ;;  %v3716_v25 = vsel %vm1704_vm6, %v3696_v48, -inf }
 0x31b   : > { %v3697_v50 = vsel %vm972_vm8, %v9942_v45, %v3652_v55  ;;  %v3333_v57 = vsel %vm1289_vm7, %v3312_v40, -inf  ;;  %v3492_v5 = vmax.f32 %v3364_v35, %v3460_v22  ;;  %v3152_v27 = vmax.bf16 %v3118_v39, %v9944_v56 }
 0x31c   : > { %v3365_v1 = vmax.f32 %v9933_v43, %v3333_v57  ;;  %v3568_v13 = vsel %vm957_vm4, %v3524_v19, %v9943_v46  ;;  %v3153_v49 = vmax.bf16 %v3119_v9, %v9945_v8  ;;  %v9947_v30 = vrot.slane %v9946_v3, 7 }
 0x31d   : > { %v3620_v28 = vmax.f32 %v3492_v5, %v3588_v29  ;;  %v3619_v21 = vmax.f32 %v3491_v11, %v3587_v37  ;;  %v3715_v43 = vsel %vm1703_vm11, %v3697_v50, -inf  ;;  %v3589_v10 = vsel %vm1565_vm10, %v3568_v13, -inf  ;;  %v9950_v37 = vld [vmem:[#allocation27_spill] sm:$0xff] }
 0x31e   : > { %v3298_v58 = vsel %vm927_vm2, %v9947_v30, %v3283_v36  ;;  %v3493_v53 = vmax.f32 %v3365_v1, %v3461_v26  ;;  %v3186_v32 = vmax.bf16 %v3152_v27, %v9948_v34  ;;  %v3187_v41 = vmax.bf16 %v3153_v49, %v9949_v44 }
 0x31f   : > { %v3347_v0 = vsel %vm1289_vm7, %v3298_v58, -inf  ;;  %v3748_v51 = vmax.f32 %v3620_v28, %v3716_v25  ;;  %v3747_v19 = vmax.f32 %v3619_v21, %v3715_v43  ;;  %v3539_v17 = vrot.slane %v8659_v12, 6  ;;  %v9953_v25 = vld [vmem:[#allocation5_spill] sm:$0xff] }
 0x320   : > { %v3621_v55 = vmax.f32 %v3493_v53, %v3589_v10  ;;  %v3220_v33 = vmax.bf16 %v3186_v32, %v9950_v37  ;;  %v3221_v20 = vmax.bf16 %v3187_v41, %v3125_v61  ;;  %v3120_v26 = vmax.bf16 %v9944_v56, %v8488_v63  ;;  %v9955_v32 = vld [vmem:[#allocation28_spill] sm:$0xff] }
 0x321   : > { %v3121_v16 = vmax.bf16 %v9945_v8, %v8512_v2  ;;  %v4933_v18 = vpack.c.bf16 %v3748_v51, %v3748_v51  ;;  %v4932_v39 = vpack.c.bf16 %v3747_v19, %v3747_v19  ;;  %v3379_v48 = vmax.f32 %v8659_v12, %v3347_v0  ;;  %v9956_v19 = vld [vmem:[#allocation10_spill] sm:$0xff] }
 0x322   : > { %v3749_v62 = vmax.f32 %v3621_v55, %v3717_v42  ;;  %v9203_v47 = vunpack.c.l.bf16 %v3220_v33  ;;  %v9205_v9 = vunpack.c.l.bf16 %v3221_v20  ;;  %v3154_v35 = vmax.bf16 %v3120_v26, %v9948_v34  ;;  %v9274_v20 = vpop.permute.xlu1 %3889 }
 0x323   : > { %v3155_v22 = vmax.bf16 %v3121_v16, %v9949_v44  ;;  %3885 = vrot.lane.b32.xlu1 %v4933_v18, %s5398_s30  ;;  %3883 = vrot.lane.b32.xlu0 %v4932_v39, %s5398_s30  ;;  %v9951_v2 = vrot.slane %v9946_v3, 6  ;;  %v3123_v14 = vmax.bf16 %v9949_v44, %v9945_v8  ;;  %v9952_v46 = vrot.slane %v8659_v12, 1  ;;  %v3159_v3 = vld [vmem:[#allocation2 + $0x90] sm:$0xf] }
 0x324   : > { %v4934_v63 = vpack.c.bf16 %v3749_v62, %v3749_v62  ;;  %v3284_v7 = vrot.slane %v9203_v47, 7  ;;  %v3412_v23 = vrot.slane %v9203_v47, 1  ;;  %v3413_v40 = vrot.slane %v9205_v9, 1 }
 0x325   : > { %v3554_v42 = vsel %vm957_vm4, %v9951_v2, %v3539_v17  ;;  %v3540_v29 = vrot.slane %v9203_v47, 6  ;;  %v3668_v6 = vrot.slane %v9203_v47, 2  ;;  %v3669_v45 = vrot.slane %v9205_v9, 2 }
 0x326   : > { %v3188_v50 = vmax.bf16 %v3154_v35, %v9950_v37  ;;  %v3189_v57 = vmax.bf16 %v3155_v22, %v3125_v61  ;;  %v3297_v5 = vsel %vm927_vm2, %v3283_v36, %v3284_v7  ;;  %v3424_v11 = vsel %vm942_vm3, %v3412_v23, %v3413_v40 }
 0x327   : > { %v3553_v1 = vsel %vm957_vm4, %v3539_v17, %v3540_v29  ;;  %v3425_v13 = vsel %vm942_vm3, %v9952_v46, %v3412_v23  ;;  %1919 = vrot.lane.b32.xlu1 %v9953_v25, %s5396_s28  ;;  %3887 = vrot.lane.b32.xlu0 %v4934_v63, %s5398_s30  ;;  %v3348_v36 = vsel %vm1290_vm15, %v3297_v5, -inf  ;;  %v3680_v27 = vsel %vm972_vm8, %v3668_v6, %v3669_v45  ;;  %v3193_v63 = vld [vmem:[#allocation2 + $0x98] sm:$0xf] }
 0x328   : > { %v3603_v8 = vsel %vm1565_vm10, %v3554_v42, -inf  ;;  %v3157_v49 = vmax.bf16 %v3125_v61, %v3123_v14  ;;  %v3380_v30 = vmax.f32 %v9203_v47, %v3348_v36  ;;  %v3475_v58 = vsel %vm1427_vm9, %v3425_v13, -inf }
 0x329   : > { %v9954_v28 = vrot.slane %v8659_v12, 2  ;;  %v3122_v43 = vmax.bf16 %v9948_v34, %v9944_v56  ;;  %v3476_v53 = vsel %vm1428_vm0, %v3424_v11, -inf  ;;  %v3604_v61 = vsel %vm1566_vm5, %v3553_v1, -inf  ;;  %v9957_v56 = vld [vmem:[#allocation9_spill] sm:$0xff] }
 0x32a   : > { %v3507_v10 = vmax.f32 %v3379_v48, %v3475_v58  ;;  %v3222_v44 = vmax.bf16 %v3188_v50, %v9955_v32  ;;  %v3508_v41 = vmax.f32 %v3380_v30, %v3476_v53  ;;  %v3732_v0 = vsel %vm1704_vm6, %v3680_v27, -inf }
 0x32b   : > { %v3681_v21 = vsel %vm972_vm8, %v9954_v28, %v3668_v6  ;;  %v3223_v12 = vmax.bf16 %v3189_v57, %v3159_v3  ;;  %v3285_v51 = vrot.slane %v9205_v9, 7  ;;  %2916 = vrot.lane.b32.xlu1 %v9956_v19, %s5397_s29  ;;  %2914 = vrot.lane.b32.xlu0 %v9957_v56, %s5397_s29  ;;  %v3191_v17 = vmax.bf16 %v3159_v3, %v3157_v49  ;;  %v9958_v6 = vld [vmem:[#allocation12_spill] sm:$0xff]  ;;  %v9320_v28 = vpop.permute.xlu0 %3891 }
 0x32c   : > { %v3635_v34 = vmax.f32 %v3507_v10, %v3603_v8  ;;  %v3731_v55 = vsel %vm1703_vm11, %v3681_v21, -inf  ;;  %v9272_v33 = vunpack.c.l.bf16 %v3222_v44  ;;  %v3636_v26 = vmax.f32 %v3508_v41, %v3604_v61  ;;  %v9306_v8 = vpop.permute.xlu1 %3893 }
 0x32d   : > { %v9276_v16 = vunpack.c.l.bf16 %v3223_v12  ;;  %v3541_v18 = vrot.slane %v9205_v9, 6  ;;  %v3296_v39 = vsel %vm927_vm2, %v3284_v7, %v3285_v51  ;;  %v3156_v23 = vmax.bf16 %v3122_v43, %v9950_v37  ;;  %v9959_v7 = vld [vmem:[#allocation11_spill] sm:$0xff] }
 0x32e   : > { %v3763_v62 = vmax.f32 %v3635_v34, %v3731_v55  ;;  %v3286_v48 = vrot.slane %v9272_v33, 7  ;;  %v3414_v35 = vrot.slane %v9272_v33, 1  ;;  %v3542_v22 = vrot.slane %v9272_v33, 6 }
 0x32f   : > { %v3764_v2 = vmax.f32 %v3636_v26, %v3732_v0  ;;  %v3415_v42 = vrot.slane %v9276_v16, 1  ;;  %v3670_v14 = vrot.slane %v9272_v33, 2  ;;  %2920 = vrot.lane.b32.xlu1 %v9958_v6, %s5397_s29  ;;  %2918 = vrot.lane.b32.xlu0 %v9959_v7, %s5397_s29  ;;  %v3671_v5 = vrot.slane %v9276_v16, 2  ;;  %v9960_v0 = vld [vmem:[#allocation29_spill] sm:$0xff]  ;;  %v3896_v26 = vpop.permute.xlu0 %3895 }
 0x330   : > { %v3295_v50 = vsel %vm927_vm2, %v3285_v51, %v3286_v48  ;;  %v3551_v57 = vsel %vm957_vm4, %v3541_v18, %v3542_v22  ;;  %v3349_v11 = vsel %vm1289_vm7, %v3296_v39, -inf  ;;  %v3225_v46 = vmax.bf16 %v3193_v63, %v3191_v17 }
 0x331   : > { %v3350_v37 = vsel %vm1290_vm15, %v3295_v50, -inf  ;;  %v3422_v1 = vsel %vm942_vm3, %v3414_v35, %v3415_v42  ;;  %v4949_v13 = vpack.c.bf16 %v3764_v2, %v3764_v2  ;;  %v4948_v25 = vpack.c.bf16 %v3763_v62, %v3763_v62 }
 0x332   : > { %v3382_v36 = vmax.f32 %v9272_v33, %v3350_v37  ;;  %v3381_v27 = vmax.f32 %v9205_v9, %v3349_v11  ;;  %v3478_v49 = vsel %vm1428_vm0, %v3422_v1, -inf  ;;  %v3606_v3 = vsel %vm1566_vm5, %v3551_v57, -inf }
 0x333   : > { %v3423_v30 = vsel %vm942_vm3, %v3413_v40, %v3414_v35  ;;  %v3552_v58 = vsel %vm957_vm4, %v3540_v29, %v3541_v18  ;;  %3917 = vrot.lane.b32.xlu1 %v4949_v13, %s5398_s30  ;;  %3915 = vrot.lane.b32.xlu0 %v4948_v25, %s5398_s30  ;;  %v3678_v43 = vsel %vm972_vm8, %v3670_v14, %v3671_v5  ;;  %v9335_v61 = vunpack.c.l.bf16 %v3225_v46 }
 0x334   : > { %v3510_v21 = vmax.f32 %v3382_v36, %v3478_v49  ;;  %v3477_v40 = vsel %vm1427_vm9, %v3423_v30, -inf  ;;  %v3190_v47 = vmax.bf16 %v3156_v23, %v9955_v32  ;;  %v3679_v29 = vsel %vm972_vm8, %v3669_v45, %v3670_v14  ;;  %v3898_v45 = vpop.permute.xlu1 %3897  ;;  %v9961_v23 = vld [vmem:[#allocation19_spill] sm:$0xff]  ;;  %v9963_v49 = vld [vmem:[#allocation4_spill] sm:$0xff] }
 0x335   : > { %v3509_v53 = vmax.f32 %v3381_v27, %v3477_v40  ;;  %v3287_v10 = vrot.slane %v9276_v16, 7  ;;  %v3605_v41 = vsel %vm1565_vm10, %v3552_v58, -inf  ;;  %v3734_v51 = vsel %vm1704_vm6, %v3678_v43, -inf  ;;  %v9966_v43 = vld [vmem:[#allocation6_spill] sm:$0xff] }
 0x336   : > { %v3638_v44 = vmax.f32 %v3510_v21, %v3606_v3  ;;  %v3224_v12 = vmax.bf16 %v3190_v47, %v9960_v0  ;;  %v3733_v9 = vsel %vm1703_vm11, %v3679_v29, -inf  ;;  %v3417_v55 = vrot.slane %v9335_v61, 1  ;;  %v9964_v3 = vld [vmem:[#allocation17_spill] sm:$0xff] }
 0x337   : > { %v3637_v32 = vmax.f32 %v3509_v53, %v3605_v41  ;;  %v3294_v17 = vsel %vm927_vm2, %v3286_v48, %v3287_v10  ;;  %v3289_v35 = vrot.slane %v9335_v61, 7  ;;  %v9962_v6 = vrot.slane %v9961_v23, 7  ;;  %v3900_v27 = vpop.permute.xlu0 %3899 }
 0x338   : > { %v3766_v19 = vmax.f32 %v3638_v44, %v3734_v51  ;;  %v9345_v56 = vunpack.c.l.bf16 %v3224_v12  ;;  %v3351_v14 = vsel %vm1289_vm7, %v3294_v17, -inf  ;;  %v3418_v7 = vrot.slane %v9961_v23, 1  ;;  %v3902_v13 = vpop.permute.xlu1 %3901 }
 0x339   : > { %v3765_v34 = vmax.f32 %v3637_v32, %v3733_v9  ;;  %v3291_v48 = vsel %vm927_vm2, %v3289_v35, %v9962_v6  ;;  %v3543_v57 = vrot.slane %v9276_v16, 6  ;;  %v3383_v25 = vmax.f32 %v9276_v16, %v3351_v14  ;;  %v9968_v9 = vld [vmem:[#allocation7_spill] sm:$0xff] }
 0x33a   : > { %v4951_v18 = vpack.c.bf16 %v3766_v19, %v3766_v19  ;;  %v3288_v39 = vrot.slane %v9345_v56, 7  ;;  %v3416_v62 = vrot.slane %v9345_v56, 1  ;;  %v3544_v46 = vrot.slane %v9345_v56, 6 }
 0x33b   : > { %v4950_v63 = vpack.c.bf16 %v3765_v34, %v3765_v34  ;;  %v3354_v36 = vsel %vm1290_vm15, %v3291_v48, -inf  ;;  %v9965_v30 = vrot.slane %v9964_v3, 1  ;;  %v3673_v40 = vrot.slane %v9335_v61, 2 }
 0x33c   : > { %3921 = vrot.lane.b32.xlu1 %v4951_v18, %s5398_s30  ;;  %v3293_v2 = vsel %vm927_vm2, %v3287_v10, %v3288_v39  ;;  %v3421_v11 = vsel %vm942_vm3, %v3415_v42, %v3416_v62  ;;  %v3420_v1 = vsel %vm942_vm3, %v3416_v62, %v3417_v55  ;;  %v3292_v21 = vsel %vm927_vm2, %v3288_v39, %v3289_v35 }
 0x33d   : > { %3919 = vrot.lane.b32.xlu0 %v4950_v63, %s5398_s30  ;;  %v3352_v50 = vsel %vm1290_vm15, %v3293_v2, -inf  ;;  %v3479_v42 = vsel %vm1427_vm9, %v3421_v11, -inf  ;;  %v3450_v58 = vsel %vm942_vm3, %v3418_v7, %v9965_v30  ;;  %v3480_v52 = vsel %vm1428_vm0, %v3420_v1, -inf  ;;  %v9974_v11 = vld [vmem:[#allocation15_spill] sm:$0xff] }
 0x33e   : > { %v3384_v37 = vmax.f32 %v9345_v56, %v3352_v50  ;;  %v3550_v47 = vsel %vm957_vm4, %v3542_v22, %v3543_v57  ;;  %v3353_v53 = vsel %vm1289_vm7, %v3292_v21, -inf  ;;  %v3549_v10 = vsel %vm957_vm4, %v3543_v57, %v3544_v46  ;;  %v9967_v22 = vld [vmem:[#allocation8_spill] sm:$0xff] }
 0x33f   : > { %v3672_v44 = vrot.slane %v9345_v56, 2  ;;  %v3386_v41 = vmax.f32 %v9961_v23, %v3354_v36  ;;  %v3511_v0 = vmax.f32 %v3383_v25, %v3479_v42  ;;  %v3545_v12 = vrot.slane %v9335_v61, 6 }
 0x340   : > { %1923 = vrot.lane.b32.xlu1 %v9963_v49, %s5396_s28  ;;  %v3512_v29 = vmax.f32 %v3384_v37, %v3480_v52  ;;  %v3385_v51 = vmax.f32 %v9335_v61, %v3353_v53  ;;  %v3419_v33 = vsel %vm942_vm3, %v3417_v55, %v3418_v7  ;;  %v3674_v24 = vrot.slane %v9961_v23, 2 }
 0x341   : > { %1921 = vrot.lane.b32.xlu0 %v9966_v43, %s5396_s28  ;;  %v3481_v32 = vsel %vm1427_vm9, %v3419_v33, -inf  ;;  %v3906_v19 = vpop.permute.xlu1 %3905  ;;  %v3608_v56 = vsel %vm1566_vm5, %v3549_v10, -inf  ;;  %v3607_v61 = vsel %vm1565_vm10, %v3550_v47, -inf  ;;  %v3482_v34 = vsel %vm1428_vm0, %v3450_v58, -inf }
 0x342   : > { %vm3963_vm2 = vcmask 126048   ;;  %v3904_v55 = vpop.permute.xlu0 %3903  ;;  %v3640_v17 = vmax.f32 %v3512_v29, %v3608_v56  ;;  %v3676_v54 = vsel %vm972_vm8, %v3672_v44, %v3673_v40  ;;  %v3514_v18 = vmax.f32 %v3386_v41, %v3482_v34 }
 0x343   : > { %v9969_v39 = vrot.slane %v9961_v23, 6  ;;  %3975 = vst.msk [vmem:[#allocation3 + $0x2c] sm:$0xf] %vm3963_vm2, %v9274_v20  ;;  %3977 = vst.msk [vmem:[#allocation3 + $0x34] sm:$0xf] %vm3963_vm2, %v9306_v8  ;;  %v3639_v31 = vmax.f32 %v3511_v0, %v3607_v61  ;;  %v3677_v20 = vsel %vm972_vm8, %v3671_v5, %v3672_v44  ;;  %v3513_v8 = vmax.f32 %v3385_v51, %v3481_v32 }
 0x344   : > { %1927 = vrot.lane.b32.xlu1 %v9967_v22, %s5396_s28  ;;  %3976 = vst.msk [vmem:[#allocation3 + $0x30] sm:$0xf] %vm3963_vm2, %v9320_v28  ;;  %3979 = vst.msk [vmem:[#allocation3 + $0x3c] sm:$0xf] %vm3963_vm2, %v3898_v45  ;;  %v3548_v28 = vsel %vm957_vm4, %v3544_v46, %v3545_v12  ;;  %v9970_v45 = vld [vmem:[#allocation14_spill] sm:$0xff]  ;;  %v3736_v35 = vsel %vm1704_vm6, %v3676_v54, -inf  ;;  %v3675_v50 = vsel %vm972_vm8, %v3673_v40, %v3674_v24 }
 0x345   : > { %1925 = vrot.lane.b32.xlu0 %v9968_v9, %s5396_s28  ;;  %v3547_v62 = vsel %vm957_vm4, %v3545_v12, %v9969_v39  ;;  %3978 = vst.msk [vmem:[#allocation3 + $0x38] sm:$0xf] %vm3963_vm2, %v3896_v26  ;;  %3981 = vst.msk [vmem:[#allocation3 + $0x44] sm:$0xf] %vm3963_vm2, %v3902_v13  ;;  %v9971_v26 = vld [vmem:[#allocation13_spill] sm:$0xff]  ;;  %v9972_v16 = vrot.slane %v9964_v3, 2  ;;  %v3768_v2 = vmax.f32 %v3640_v17, %v3736_v35 }
 0x346   : > { %3980 = vst.msk [vmem:[#allocation3 + $0x40] sm:$0xf] %vm3963_vm2, %v3900_v27  ;;  %3983 = vst.msk [vmem:[#allocation3 + $0x4c] sm:$0xf] %vm3963_vm2, %v3906_v19  ;;  %v3610_v63 = vsel %vm1566_vm5, %v3547_v62, -inf  ;;  %v3735_v14 = vsel %vm1703_vm11, %v3677_v20, -inf }
 0x347   : > { %3982 = vst.msk [vmem:[#allocation3 + $0x48] sm:$0xf] %vm3963_vm2, %v3904_v55  ;;  %v3706_v5 = vsel %vm972_vm8, %v3674_v24, %v9972_v16  ;;  %v3642_v23 = vmax.f32 %v3514_v18, %v3610_v63  ;;  %v3609_v6 = vsel %vm1565_vm10, %v3548_v28, -inf  ;;  %v3767_v48 = vmax.f32 %v3639_v31, %v3735_v14 }
 0x348   : > { %2924 = vrot.lane.b32.xlu1 %v9970_v45, %s5397_s29  ;;  %v3641_v7 = vmax.f32 %v3513_v8, %v3609_v6  ;;  %v3738_v57 = vsel %vm1704_vm6, %v3706_v5, -inf  ;;  %v4953_v37 = vpack.c.bf16 %v3768_v2, %v3768_v2  ;;  %v3737_v59 = vsel %vm1703_vm11, %v3675_v50, -inf }
 0x349   : > { %2922 = vrot.lane.b32.xlu0 %v9971_v26, %s5397_s29  ;;  %v3770_v1 = vmax.f32 %v3642_v23, %v3738_v57  ;;  %v4952_v46 = vpack.c.bf16 %v3767_v48, %v3767_v48  ;;  %vm4123_vm3 = vcmask 130048  }
 0x34a   : > { %v3769_v13 = vmax.f32 %v3641_v7, %v3737_v59  ;;  %v9527_v7 = vld [vmem:[%s9750_s4] ss:$0 sm:$0xff] }
 0x34b   : > { %v4955_v60 = vpack.c.bf16 %v3770_v1, %v3770_v1  ;;  %v5097_v19 = vld [vmem:[#allocation3 + $0x30] sm:$0xff]  }
 0x34c   : > { %2928 = vrot.lane.b32.xlu1 %v9973_v15, %s5397_s29  ;;  %v4954_v36 = vpack.c.bf16 %v3769_v13, %v3769_v13  ;;  %v5098_v61 = vld [vmem:[#allocation3 + $0x38] sm:$0xff]  }
 0x34d   : > { %2926 = vrot.lane.b32.xlu0 %v9974_v11, %s5397_s29  ;;  %v3908_v4 = vpop.permute.xlu0 %3907  ;;  %v5099_v34 = vld [vmem:[#allocation3 + $0x40] sm:$0xff]  }
 0x34e   : > { %v3910_v25 = vpop.permute.xlu1 %3909  ;;  %3984 = vst.msk [vmem:[#allocation3 + $0x50] sm:$0xf] %vm3963_vm2, %v3908_v4  ;;  %v5100_v18 = vld [vmem:[#allocation3 + $0x48] sm:$0xff]  }
 0x34f   : > { %3985 = vst.msk [vmem:[#allocation3 + $0x54] sm:$0xf] %vm3963_vm2, %v3910_v25 }
 0x350   : > { %3925 = vrot.lane.b32.xlu1 %v4953_v37, %s5398_s30 }
 0x351   : > { %3923 = vrot.lane.b32.xlu0 %v4952_v46, %s5398_s30 }
 0x354   : > { %3929 = vrot.lane.b32.xlu1 %v4955_v60, %s5398_s30 }
 0x355   : > { %3927 = vrot.lane.b32.xlu0 %v4954_v36, %s5398_s30 }
 0x356   : > { %v5101_v62 = vld [vmem:[#allocation3 + $0x50] sm:$0xff]  }
 0x357   : > { %v3914_v38 = vpop.permute.xlu1 %3913 }
 0x358   : > { %3987 = vst.msk [vmem:[#allocation3 + $0x5c] sm:$0xf] %vm3963_vm2, %v3914_v38  ;;  %v3912_v27 = vpop.permute.xlu0 %3911 }
 0x359   : > { %3986 = vst.msk [vmem:[#allocation3 + $0x58] sm:$0xf] %vm3963_vm2, %v3912_v27 }
 0x360   : > { %v5102_v28 = vld [vmem:[#allocation3 + $0x58] sm:$0xff]  }
 0x366   : > { %v3870_v49 = vpop.permute.xlu1 %3869 }
 0x367   : > { %3965 = vst.msk [vmem:[#allocation3 + $0x4] sm:$0xf] %vm3963_vm2, %v3870_v49 }
 0x36b   : > { %v3868_v42 = vpop.permute.xlu0 %3867 }
 0x36c   : > { %3964 = vst.msk [vmem:[#allocation3] sm:$0xf] %vm3963_vm2, %v3868_v42 }
 0x36e   : > { %v3874_v3 = vpop.permute.xlu1 %3873 }
 0x36f   : > { %3967 = vst.msk [vmem:[#allocation3 + $0xc] sm:$0xf] %vm3963_vm2, %v3874_v3 }
 0x371   : > { %v3872_v30 = vpop.permute.xlu0 %3871 }
 0x372   : > { %3966 = vst.msk [vmem:[#allocation3 + $0x8] sm:$0xf] %vm3963_vm2, %v3872_v30 }
 0x373   : > { %v5091_v58 = vld [vmem:[#allocation3] sm:$0xff]  }
 0x374   : > { %5026 = vmatprep.mubr.msk.bf16.mxu1 %vm4123_vm3, %v5091_v58 }
 0x379   : > { %v5092_v21 = vld [vmem:[#allocation3 + $0x8] sm:$0xff]  }
 0x37a   : > { %5027 = vmatmul.mubr.msk.bf16.vlgmr.msra.gmra.mxu1 %vm4123_vm3, %v5092_v21 }
 0x37f   : > { %v3876_v43 = vpop.permute.xlu0 %3875 }
 0x380   : > { %v3878_v52 = vpop.permute.xlu1 %3877  ;;  %3968 = vst.msk [vmem:[#allocation3 + $0x10] sm:$0xf] %vm3963_vm2, %v3876_v43 }
 0x381   : > { %3969 = vst.msk [vmem:[#allocation3 + $0x14] sm:$0xf] %vm3963_vm2, %v3878_v52 }
 0x387   : > { %v3882_v40 = vpop.permute.xlu1 %3881 }
 0x388   : > { %3971 = vst.msk [vmem:[#allocation3 + $0x1c] sm:$0xf] %vm3963_vm2, %v3882_v40  ;;  %v5093_v47 = vld [vmem:[#allocation3 + $0x10] sm:$0xff]  }
 0x389   : > { %5030 = vmatprep.mubr.msk.bf16.mxu1 %vm4123_vm3, %v5093_v47 }
 0x38a   : > { %v3880_v53 = vpop.permute.xlu0 %3879 }
 0x38b   : > { %3970 = vst.msk [vmem:[#allocation3 + $0x18] sm:$0xf] %vm3963_vm2, %v3880_v53 }
 0x392   : > { %v5094_v29 = vld [vmem:[#allocation3 + $0x18] sm:$0xff]  }
 0x393   : > { %5031 = vmatmul.mubr.msk.bf16.gmra.mxu1 %vm4123_vm3, %v5094_v29 }
 0x395   : > { %v3886_v10 = vpop.permute.xlu1 %3885  ;;  %v3884_v44 = vpop.permute.xlu0 %3883 }
 0x396   : > { %3973 = vst.msk [vmem:[#allocation3 + $0x24] sm:$0xf] %vm3963_vm2, %v3886_v10  ;;  %3972 = vst.msk [vmem:[#allocation3 + $0x20] sm:$0xf] %vm3963_vm2, %v3884_v44 }
 0x399   : > { %v1920_v41 = vpop.permute.xlu1 %1919  ;;  %v3888_v0 = vpop.permute.xlu0 %3887 }
 0x39a   : > { %1989 = vst.msk [vmem:[#allocation3 + $0x6c] sm:$0xf] %vm1961_vm12, %v1920_v41 }
 0x39b   : > { %3974 = vst.msk [vmem:[#allocation3 + $0x28] sm:$0xf] %vm3963_vm2, %v3888_v0 }
 0x39d   : > { %v2917_v12 = vpop.permute.xlu1 %2916  ;;  %v2915_v51 = vpop.permute.xlu0 %2914  ;;  %v5095_v33 = vld [vmem:[#allocation3 + $0x20] sm:$0xff]  }
 0x39e   : > { %2988 = vst.msk [vmem:[#allocation3 + $0x64] sm:$0xf] %vm2962_vm13, %v2917_v12  ;;  %2987 = vst.msk [vmem:[#allocation3 + $0x60] sm:$0xf] %vm2962_vm13, %v2915_v51  ;;  %5034 = vmatprep.mubr.msk.bf16.mxu1 %vm4123_vm3, %v5095_v33 }
 0x3a1   : > { %v2921_v22 = vpop.permute.xlu1 %2920  ;;  %v2919_v24 = vpop.permute.xlu0 %2918 }
 0x3a2   : > { %v5096_v32 = vld [vmem:[#allocation3 + $0x28] sm:$0xff]   ;;  %2990 = vst.msk [vmem:[#allocation3 + $0x6c] sm:$0xf] %vm2962_vm13, %v2921_v22  ;;  %2989 = vst.msk [vmem:[#allocation3 + $0x68] sm:$0xf] %vm2962_vm13, %v2919_v24 }
 0x3a3   : > { %5035 = vmatmul.mubr.msk.bf16.gmra.mxu1 %vm4123_vm3, %v5096_v32 }
 0x3a4   : > { %5038 = vmatprep.mubr.msk.bf16.mxu1 %vm4123_vm3, %v5097_v19 }
 0x3a5   : > { %v3918_v9 = vpop.permute.xlu1 %3917  ;;  %v3916_v56 = vpop.permute.xlu0 %3915 }
 0x3a6   : > { %3989 = vst.msk [vmem:[#allocation3 + $0x64] sm:$0xf] %vm3963_vm2, %v3918_v9  ;;  %3988 = vst.msk [vmem:[#allocation3 + $0x60] sm:$0xf] %vm3963_vm2, %v3916_v56 }
 0x3ab   : > { %5039 = vmatmul.mubr.msk.bf16.gmra.mxu1 %vm4123_vm3, %v5098_v61 }
 0x3ac   : > { %5042 = vmatprep.mubr.msk.bf16.mxu1 %vm4123_vm3, %v5099_v34 }
 0x3ad   : > { %v5103_v26 = vld [vmem:[#allocation3 + $0x60] sm:$0xff]  }
 0x3ae   : > { %v3922_v55 = vpop.permute.xlu1 %3921 }
 0x3af   : > { %3991 = vst.msk [vmem:[#allocation3 + $0x6c] sm:$0xf] %vm3963_vm2, %v3922_v55  ;;  %v3920_v17 = vpop.permute.xlu0 %3919 }
 0x3b0   : > { %3990 = vst.msk [vmem:[#allocation3 + $0x68] sm:$0xf] %vm3963_vm2, %v3920_v17 }
 0x3b2   : > { %v1924_v54 = vpop.permute.xlu1 %1923 }
 0x3b3   : > { %1991 = vst.msk [vmem:[#allocation3 + $0x74] sm:$0xf] %vm1961_vm12, %v1924_v54  ;;  %v1922_v39 = vpop.permute.xlu0 %1921  ;;  %5043 = vmatmul.mubr.msk.bf16.gmra.mxu1 %vm4123_vm3, %v5100_v18 }
 0x3b4   : > { %1990 = vst.msk [vmem:[#allocation3 + $0x70] sm:$0xf] %vm1961_vm12, %v1922_v39  ;;  %5046 = vmatprep.mubr.msk.bf16.mxu1 %vm4123_vm3, %v5101_v62 }
 0x3b6   : > { %v1928_v31 = vpop.permute.xlu1 %1927 }
 0x3b7   : > { %1993 = vst.msk [vmem:[#allocation3 + $0x7c] sm:$0xf] %vm1961_vm12, %v1928_v31  ;;  %v1926_v20 = vpop.permute.xlu0 %1925  ;;  %v5104_v5 = vld [vmem:[#allocation3 + $0x68] sm:$0xff]  }
 0x3b8   : > { %1992 = vst.msk [vmem:[#allocation3 + $0x78] sm:$0xf] %vm1961_vm12, %v1926_v20 }
 0x3ba   : > { %v2925_v8 = vpop.permute.xlu1 %2924 }
 0x3bb   : > { %2992 = vst.msk [vmem:[#allocation3 + $0x74] sm:$0xf] %vm2962_vm13, %v2925_v8  ;;  %v2923_v45 = vpop.permute.xlu0 %2922  ;;  %5047 = vmatmul.mubr.msk.bf16.gmra.mxu1 %vm4123_vm3, %v5102_v28 }
 0x3bc   : > { %2991 = vst.msk [vmem:[#allocation3 + $0x70] sm:$0xf] %vm2962_vm13, %v2923_v45  ;;  %5050 = vmatprep.mubr.msk.bf16.mxu1 %vm4123_vm3, %v5103_v26 }
 0x3be   : > { %v2929_v35 = vpop.permute.xlu1 %2928 }
 0x3bf   : > { %2994 = vst.msk [vmem:[#allocation3 + $0x7c] sm:$0xf] %vm2962_vm13, %v2929_v35  ;;  %v2927_v63 = vpop.permute.xlu0 %2926 }
 0x3c0   : > { %2993 = vst.msk [vmem:[#allocation3 + $0x78] sm:$0xf] %vm2962_vm13, %v2927_v63 }
 0x3c2   : > { %v3926_v16 = vpop.permute.xlu1 %3925 }
 0x3c3   : > { %3993 = vst.msk [vmem:[#allocation3 + $0x74] sm:$0xf] %vm3963_vm2, %v3926_v16  ;;  %v3924_v2 = vpop.permute.xlu0 %3923  ;;  %5051 = vmatmul.mubr.msk.bf16.gmra.mxu1 %vm4123_vm3, %v5104_v5 }
 0x3c4   : > { %3992 = vst.msk [vmem:[#allocation3 + $0x70] sm:$0xf] %vm3963_vm2, %v3924_v2 }
 0x3c6   : > { %v3930_v14 = vpop.permute.xlu1 %3929 }
 0x3c7   : > { %3995 = vst.msk [vmem:[#allocation3 + $0x7c] sm:$0xf] %vm3963_vm2, %v3930_v14  ;;  %v3928_v23 = vpop.permute.xlu0 %3927 }
 0x3c8   : > { %3994 = vst.msk [vmem:[#allocation3 + $0x78] sm:$0xf] %vm3963_vm2, %v3928_v23 }
 0x3cb   : > { %v5105_v6 = vld [vmem:[#allocation3 + $0x70] sm:$0xff]  }
 0x3cc   : > { %5054 = vmatprep.mubr.msk.bf16.mxu1 %vm4123_vm3, %v5105_v6 }
 0x3cf   : > { %v5106_v48 = vld [vmem:[#allocation3 + $0x78] sm:$0xff]  }
 0x3d0   : > { %5055 = vmatmul.mubr.msk.bf16.gmra.mxu1 %vm4123_vm3, %v5106_v48 }
 0x43a   : > { %v5028_v50 = vpop.f32.mrf.mxu1 }
 0x43b   : > { %v4215_v15 = vadd.f32 %v5028_v50, %v9527_v7 }
 0x43c   : > { %v4206_v57 = vpop.f32.mrf.mxu1 }
 0x43d   : > { %v4335_v11 = vsub.f32 0.0, %v4215_v15  ;;  %v4207_v37 = vadd.f32 %v9527_v7, %v4206_v57 }
 0x43e   : > { %v5029_v1 = vpop.f32.mrf.mxu1 }
 0x43f   : > { %v4369_v59 = vmul.f32 1.442695, %v4335_v11  ;;  %v4333_v46 = vsub.f32 0.0, %v4207_v37  ;;  %v4218_v13 = vadd.f32 %v5029_v1, %v9527_v7 }
 0x440   : > { %v4209_v4 = vpop.f32.mrf.mxu1 }
 0x441   : > { %5235 = vpow2.f32 %v4369_v59  ;;  %v4365_v25 = vmul.f32 1.442695, %v4333_v46  ;;  %v4336_v60 = vsub.f32 0.0, %v4218_v13  ;;  %v4210_v36 = vadd.f32 %v9527_v7, %v4209_v4 }
 0x443   : > { %5237 = vpow2.f32 %v4365_v25  ;;  %v4371_v38 = vmul.f32 1.442695, %v4336_v60  ;;  %v4334_v27 = vsub.f32 0.0, %v4210_v36 }
 0x445   : > { %5239 = vpow2.f32 %v4371_v38  ;;  %v4367_v49 = vmul.f32 1.442695, %v4334_v27 }
 0x447   : > { %5241 = vpow2.f32 %v4367_v49 }
 0x44e   : > { %v5236_v42 = vpop.eup %5235 }
 0x44f   : > { %v4431_v3 = vadd.f32 1.0, %v5236_v42 }
 0x450   : > { %v5238_v30 = vpop.eup %5237 }
 0x451   : > { %5243 = vrcp.f32 %v4431_v3  ;;  %v4429_v58 = vadd.f32 1.0, %v5238_v30 }
 0x452   : > { %v5240_v43 = vpop.eup %5239 }
 0x453   : > { %v5032_v21 = vpop.f32.mrf.mxu1  ;;  %5245 = vrcp.f32 %v4429_v58  ;;  %v4432_v40 = vadd.f32 1.0, %v5240_v43 }
 0x454   : > { %v9534_v52 = vadd.f32 %v5032_v21, %v9527_v7  ;;  %v5242_v53 = vpop.eup %5241 }
 0x455   : > { %v4222_v47 = vpop.f32.mrf.mxu1  ;;  %5247 = vrcp.f32 %v4432_v40  ;;  %v4430_v44 = vadd.f32 1.0, %v5242_v53 }
 0x456   : > { %v4339_v29 = vsub.f32 0.0, %v9534_v52  ;;  %v9538_v10 = vadd.f32 %v9527_v7, %v4222_v47 }
 0x457   : > { %v5033_v41 = vpop.f32.mrf.mxu1  ;;  %5249 = vrcp.f32 %v4430_v44 }
 0x458   : > { %v4377_v0 = vmul.f32 1.442695, %v4339_v29  ;;  %v4337_v12 = vsub.f32 0.0, %v9538_v10  ;;  %v9542_v51 = vadd.f32 %v5033_v41, %v9527_v7 }
 0x459   : > { %v4225_v33 = vpop.f32.mrf.mxu1 }
 0x45a   : > { %5251 = vpow2.f32 %v4377_v0  ;;  %v4373_v22 = vmul.f32 1.442695, %v4337_v12  ;;  %v4340_v24 = vsub.f32 0.0, %v9542_v51  ;;  %v9546_v32 = vadd.f32 %v9527_v7, %v4225_v33 }
 0x45c   : > { %5253 = vpow2.f32 %v4373_v22  ;;  %v4379_v19 = vmul.f32 1.442695, %v4340_v24  ;;  %v4338_v9 = vsub.f32 0.0, %v9546_v32 }
 0x45e   : > { %5255 = vpow2.f32 %v4379_v19  ;;  %v4375_v56 = vmul.f32 1.442695, %v4338_v9  ;;  %v5244_v61 = vpop.eup %5243 }
 0x45f   : > { %v4495_v34 = vmul.f32 %v5244_v61, %v4215_v15 }
 0x460   : > { %5257 = vpow2.f32 %v4375_v56  ;;  %v5246_v55 = vpop.eup %5245 }
 0x461   : > { %4527 = vst.msk [vmem:[%s9553_s13 + $0x10] sm:$0xff] %vm347_vm1, %v4495_v34  ;;  %v4493_v54 = vmul.f32 %v5246_v55, %v4207_v37 }
 0x462   : > { %v5248_v39 = vpop.eup %5247 }
 0x463   : > { %v5036_v17 = vpop.f32.mrf.mxu1  ;;  %4525 = vst.msk [vmem:[%s9553_s13] sm:$0xff] %vm347_vm1, %v4493_v54  ;;  %v4496_v31 = vmul.f32 %v5248_v39, %v4218_v13 }
 0x464   : > { %v9558_v18 = vadd.f32 %v5036_v17, %v9527_v7  ;;  %v5250_v28 = vpop.eup %5249 }
 0x465   : > { %v4238_v62 = vpop.f32.mrf.mxu1  ;;  %4528 = vst.msk [vmem:[%s9553_s13 + $0x18] sm:$0xff] %vm347_vm1, %v4496_v31  ;;  %v4494_v35 = vmul.f32 %v5250_v28, %v4210_v36 }
 0x466   : > { %v4343_v20 = vsub.f32 0.0, %v9558_v18  ;;  %v9564_v8 = vadd.f32 %v9527_v7, %v4238_v62 }
 0x467   : > { %v5037_v45 = vpop.f32.mrf.mxu1  ;;  %v5252_v26 = vpop.eup %5251  ;;  %4526 = vst.msk [vmem:[%s9553_s13 + $0x8] sm:$0xff] %vm347_vm1, %v4494_v35 }
 0x468   : > { %v4385_v63 = vmul.f32 1.442695, %v4343_v20  ;;  %v4341_v16 = vsub.f32 0.0, %v9564_v8  ;;  %v9570_v5 = vadd.f32 %v5037_v45, %v9527_v7  ;;  %v4435_v2 = vadd.f32 1.0, %v5252_v26 }
 0x469   : > { %v4241_v14 = vpop.f32.mrf.mxu1  ;;  %v5254_v23 = vpop.eup %5253 }
 0x46a   : > { %5259 = vpow2.f32 %v4385_v63  ;;  %v4381_v6 = vmul.f32 1.442695, %v4341_v16  ;;  %v4344_v48 = vsub.f32 0.0, %v9570_v5  ;;  %v9576_v50 = vadd.f32 %v9527_v7, %v4241_v14 }
 0x46b   : > { %5261 = vrcp.f32 %v4435_v2  ;;  %v4433_v15 = vadd.f32 1.0, %v5254_v23  ;;  %v5040_v57 = vpop.f32.mrf.mxu1  ;;  %v5256_v11 = vpop.eup %5255 }
 0x46c   : > { %5263 = vpow2.f32 %v4381_v6  ;;  %v4387_v37 = vmul.f32 1.442695, %v4344_v48  ;;  %v4342_v1 = vsub.f32 0.0, %v9576_v50  ;;  %v9580_v59 = vadd.f32 %v5040_v57, %v9527_v7 }
 0x46d   : > { %5265 = vrcp.f32 %v4433_v15  ;;  %v4436_v46 = vadd.f32 1.0, %v5256_v11  ;;  %v4254_v13 = vpop.f32.mrf.mxu1  ;;  %v5258_v4 = vpop.eup %5257 }
 0x46e   : > { %5267 = vpow2.f32 %v4387_v37  ;;  %v4383_v25 = vmul.f32 1.442695, %v4342_v1  ;;  %v4347_v60 = vsub.f32 0.0, %v9580_v59  ;;  %v9584_v36 = vadd.f32 %v9527_v7, %v4254_v13 }
 0x46f   : > { %5269 = vrcp.f32 %v4436_v46  ;;  %v4434_v38 = vadd.f32 1.0, %v5258_v4  ;;  %v5041_v27 = vpop.f32.mrf.mxu1 }
 0x470   : > { %5271 = vpow2.f32 %v4383_v25  ;;  %v4393_v49 = vmul.f32 1.442695, %v4347_v60  ;;  %v4345_v42 = vsub.f32 0.0, %v9584_v36  ;;  %v9588_v3 = vadd.f32 %v5041_v27, %v9527_v7 }
 0x471   : > { %5273 = vrcp.f32 %v4434_v38  ;;  %v4257_v30 = vpop.f32.mrf.mxu1 }
 0x472   : > { %5275 = vpow2.f32 %v4393_v49  ;;  %v4389_v58 = vmul.f32 1.442695, %v4345_v42  ;;  %v4348_v21 = vsub.f32 0.0, %v9588_v3  ;;  %v9592_v43 = vadd.f32 %v9527_v7, %v4257_v30 }
 0x473   : > { %v5044_v40 = vpop.f32.mrf.mxu1 }
 0x474   : > { %5277 = vpow2.f32 %v4389_v58  ;;  %v4395_v47 = vmul.f32 1.442695, %v4348_v21  ;;  %v4346_v53 = vsub.f32 0.0, %v9592_v43  ;;  %v9596_v29 = vadd.f32 %v5044_v40, %v9527_v7 }
 0x475   : > { %v4270_v44 = vpop.f32.mrf.mxu1 }
 0x476   : > { %5279 = vpow2.f32 %v4395_v47  ;;  %v4391_v41 = vmul.f32 1.442695, %v4346_v53  ;;  %v4351_v0 = vsub.f32 0.0, %v9596_v29  ;;  %v9600_v12 = vadd.f32 %v9527_v7, %v4270_v44 }
 0x477   : > { %v5260_v33 = vpop.eup %5259  ;;  %v5045_v22 = vpop.f32.mrf.mxu1 }
 0x478   : > { %v5262_v24 = vpop.eup %5261  ;;  %v4439_v19 = vadd.f32 1.0, %v5260_v33  ;;  %5281 = vpow2.f32 %v4391_v41  ;;  %v4401_v9 = vmul.f32 1.442695, %v4351_v0  ;;  %v4349_v56 = vsub.f32 0.0, %v9600_v12 }
 0x479   : > { %v5264_v61 = vpop.eup %5263  ;;  %v4499_v34 = vmul.f32 %v5262_v24, %v9534_v52  ;;  %v9605_v55 = vadd.f32 %v5045_v22, %v9527_v7  ;;  %v4273_v17 = vpop.f32.mrf.mxu1 }
 0x47a   : > { %v5266_v54 = vpop.eup %5265  ;;  %5283 = vrcp.f32 %v4439_v19  ;;  %v4437_v39 = vadd.f32 1.0, %v5264_v61  ;;  %v4397_v62 = vmul.f32 1.442695, %v4349_v56  ;;  %v9608_v31 = vadd.f32 %v9527_v7, %v4273_v17 }
 0x47b   : > { %v5268_v20 = vpop.eup %5267  ;;  %4531 = vst.msk [vmem:[%s9553_s13 + $0x30] sm:$0xff] %vm347_vm1, %v4499_v34  ;;  %v4497_v28 = vmul.f32 %v5266_v54, %v9538_v10  ;;  %5285 = vpow2.f32 %v4401_v9  ;;  %v4352_v52 = vsub.f32 0.0, %v9605_v55  ;;  %v5048_v45 = vpop.f32.mrf.mxu1 }
 0x47c   : > { %v5270_v26 = vpop.eup %5269  ;;  %5287 = vrcp.f32 %v4437_v39  ;;  %v4440_v35 = vadd.f32 1.0, %v5268_v20  ;;  %v4350_v63 = vsub.f32 0.0, %v9608_v31  ;;  %v9616_v16 = vadd.f32 %v5048_v45, %v9527_v7 }
 0x47d   : > { %v5272_v2 = vpop.eup %5271  ;;  %4529 = vst.msk [vmem:[%s9553_s13 + $0x20] sm:$0xff] %vm347_vm1, %v4497_v28  ;;  %v4500_v14 = vmul.f32 %v5270_v26, %v9542_v51  ;;  %5289 = vpow2.f32 %v4397_v62  ;;  %v4403_v10 = vmul.f32 1.442695, %v4352_v52  ;;  %v4286_v23 = vpop.f32.mrf.mxu1 }
 0x47e   : > { %v5274_v6 = vpop.eup %5273  ;;  %5291 = vrcp.f32 %v4440_v35  ;;  %v4438_v48 = vadd.f32 1.0, %v5272_v2  ;;  %v4399_v15 = vmul.f32 1.442695, %v4350_v63  ;;  %v4355_v57 = vsub.f32 0.0, %v9616_v16 }
 0x47f   : > { %v5276_v11 = vpop.eup %5275  ;;  %4532 = vst.msk [vmem:[%s9553_s13 + $0x38] sm:$0xff] %vm347_vm1, %v4500_v14  ;;  %v4498_v37 = vmul.f32 %v5274_v6, %v9546_v32  ;;  %5293 = vpow2.f32 %v4403_v10  ;;  %v9626_v1 = vadd.f32 %v9527_v7, %v4286_v23  ;;  %v5049_v51 = vpop.f32.mrf.mxu1 }
 0x480   : > { %5295 = vrcp.f32 %v4438_v48  ;;  %v4443_v46 = vadd.f32 1.0, %v5276_v11  ;;  %v4409_v13 = vmul.f32 1.442695, %v4355_v57  ;;  %v9629_v4 = vadd.f32 %v5049_v51, %v9527_v7 }
 0x481   : > { %v5278_v25 = vpop.eup %5277  ;;  %4530 = vst.msk [vmem:[%s9553_s13 + $0x28] sm:$0xff] %vm347_vm1, %v4498_v37  ;;  %5297 = vpow2.f32 %v4399_v15  ;;  %v4353_v60 = vsub.f32 0.0, %v9626_v1  ;;  %v4289_v38 = vpop.f32.mrf.mxu1 }
 0x482   : > { %5299 = vrcp.f32 %v4443_v46  ;;  %v4441_v32 = vadd.f32 1.0, %v5278_v25  ;;  %v4356_v27 = vsub.f32 0.0, %v9629_v4  ;;  %v9636_v49 = vadd.f32 %v9527_v7, %v4289_v38 }
 0x483   : > { %v5280_v42 = vpop.eup %5279  ;;  %5301 = vpow2.f32 %v4409_v13  ;;  %v4405_v30 = vmul.f32 1.442695, %v4353_v60  ;;  %v5052_v58 = vpop.f32.mrf.mxu1 }
 0x484   : > { %5303 = vrcp.f32 %v4441_v32  ;;  %v4444_v21 = vadd.f32 1.0, %v5280_v42  ;;  %v4411_v40 = vmul.f32 1.442695, %v4356_v27  ;;  %v4354_v47 = vsub.f32 0.0, %v9636_v49 }
 0x485   : > { %v5282_v53 = vpop.eup %5281  ;;  %5305 = vpow2.f32 %v4405_v30  ;;  %v9640_v44 = vadd.f32 %v5052_v58, %v9527_v7  ;;  %v4302_v41 = vpop.f32.mrf.mxu1 }
 0x486   : > { %5307 = vrcp.f32 %v4444_v21  ;;  %v4442_v0 = vadd.f32 1.0, %v5282_v53  ;;  %v4407_v33 = vmul.f32 1.442695, %v4354_v47  ;;  %v9643_v22 = vadd.f32 %v9527_v7, %v4302_v41 }
 0x487   : > { %v5284_v24 = vpop.eup %5283  ;;  %5309 = vpow2.f32 %v4411_v40  ;;  %v4359_v19 = vsub.f32 0.0, %v9640_v44  ;;  %v5053_v9 = vpop.f32.mrf.mxu1 }
 0x488   : > { %v5286_v56 = vpop.eup %5285  ;;  %v4503_v61 = vmul.f32 %v5284_v24, %v9558_v18  ;;  %5311 = vrcp.f32 %v4442_v0  ;;  %v4357_v34 = vsub.f32 0.0, %v9643_v22  ;;  %v9649_v17 = vadd.f32 %v5053_v9, %v9527_v7 }
 0x489   : > { %v5288_v54 = vpop.eup %5287  ;;  %v4447_v39 = vadd.f32 1.0, %v5286_v56  ;;  %5313 = vpow2.f32 %v4407_v33  ;;  %v4417_v62 = vmul.f32 1.442695, %v4359_v19  ;;  %v4305_v20 = vpop.f32.mrf.mxu1 }
 0x48a   : > { %v5290_v28 = vpop.eup %5289  ;;  %4535 = vst.msk [vmem:[%s9553_s13 + $0x50] sm:$0xff] %vm347_vm1, %v4503_v61  ;;  %v4501_v52 = vmul.f32 %v5288_v54, %v9564_v8  ;;  %v4413_v45 = vmul.f32 1.442695, %v4357_v34  ;;  %v4360_v18 = vsub.f32 0.0, %v9649_v17  ;;  %v9656_v26 = vadd.f32 %v9527_v7, %v4305_v20 }
 0x48b   : > { %v5292_v35 = vpop.eup %5291  ;;  %5315 = vrcp.f32 %v4447_v39  ;;  %v4445_v63 = vadd.f32 1.0, %v5290_v28 }
 0x48c   : > { %v5294_v2 = vpop.eup %5293  ;;  %4533 = vst.msk [vmem:[%s9553_s13 + $0x40] sm:$0xff] %vm347_vm1, %v4501_v52  ;;  %v4504_v14 = vmul.f32 %v5292_v35, %v9570_v5  ;;  %5317 = vpow2.f32 %v4417_v62  ;;  %v4419_v10 = vmul.f32 1.442695, %v4360_v18  ;;  %v4358_v8 = vsub.f32 0.0, %v9656_v26 }
 0x48d   : > { %v5296_v23 = vpop.eup %5295  ;;  %5319 = vrcp.f32 %v4445_v63  ;;  %v4448_v6 = vadd.f32 1.0, %v5294_v2 }
 0x48e   : > { %v5298_v48 = vpop.eup %5297  ;;  %4536 = vst.msk [vmem:[%s9553_s13 + $0x58] sm:$0xff] %vm347_vm1, %v4504_v14  ;;  %v4502_v15 = vmul.f32 %v5296_v23, %v9576_v50  ;;  %5321 = vpow2.f32 %v4413_v45  ;;  %v4415_v57 = vmul.f32 1.442695, %v4358_v8 }
 0x48f   : > { %v5300_v11 = vpop.eup %5299  ;;  %5323 = vrcp.f32 %v4448_v6  ;;  %v4446_v37 = vadd.f32 1.0, %v5298_v48 }
 0x490   : > { %v5302_v5 = vpop.eup %5301  ;;  %4534 = vst.msk [vmem:[%s9553_s13 + $0x48] sm:$0xff] %vm347_vm1, %v4502_v15  ;;  %v4507_v51 = vmul.f32 %v5300_v11, %v9580_v59  ;;  %5325 = vpow2.f32 %v4419_v10  ;;  %v5056_v46 = vpop.f32.mrf.mxu1 }
 0x491   : > { %v5304_v13 = vpop.eup %5303  ;;  %5327 = vrcp.f32 %v4446_v37  ;;  %v4451_v25 = vadd.f32 1.0, %v5302_v5  ;;  %v9669_v60 = vadd.f32 %v5056_v46, %v9527_v7 }
 0x492   : > { %v5306_v50 = vpop.eup %5305  ;;  %4539 = vst.msk [vmem:[%s9553_s13 + $0x70] sm:$0xff] %vm347_vm1, %v4507_v51  ;;  %v4505_v38 = vmul.f32 %v5304_v13, %v9584_v36  ;;  %5329 = vpow2.f32 %v4415_v57  ;;  %v4318_v32 = vpop.f32.mrf.mxu1 }
 0x493   : > { %v5308_v27 = vpop.eup %5307  ;;  %5331 = vrcp.f32 %v4451_v25  ;;  %v4449_v59 = vadd.f32 1.0, %v5306_v50  ;;  %v4363_v42 = vsub.f32 0.0, %v9669_v60  ;;  %v9676_v30 = vadd.f32 %v9527_v7, %v4318_v32 }
 0x494   : > { %v5310_v58 = vpop.eup %5309  ;;  %4537 = vst.msk [vmem:[%s9553_s13 + $0x60] sm:$0xff] %vm347_vm1, %v4505_v38  ;;  %v4508_v21 = vmul.f32 %v5308_v27, %v9588_v3  ;;  %v5057_v40 = vpop.f32.mrf.mxu1 }
 0x495   : > { %v5312_v47 = vpop.eup %5311  ;;  %5333 = vrcp.f32 %v4449_v59  ;;  %v4452_v36 = vadd.f32 1.0, %v5310_v58  ;;  %v4425_v53 = vmul.f32 1.442695, %v4363_v42  ;;  %v4361_v41 = vsub.f32 0.0, %v9676_v30 }
 0x496   : > { %v5314_v0 = vpop.eup %5313  ;;  %4540 = vst.msk [vmem:[%s9553_s13 + $0x78] sm:$0xff] %vm347_vm1, %v4508_v21  ;;  %v4506_v33 = vmul.f32 %v5312_v47, %v9592_v43  ;;  %v9686_v24 = vadd.f32 %v5057_v40, %v9527_v7  ;;  %v4321_v19 = vpop.f32.mrf.mxu1 }
 0x497   : > { %5335 = vrcp.f32 %v4452_v36  ;;  %v4450_v9 = vadd.f32 1.0, %v5314_v0  ;;  %v4421_v3 = vmul.f32 1.442695, %v4361_v41  ;;  %v9689_v56 = vadd.f32 %v9527_v7, %v4321_v19 }
 0x498   : > { %v5316_v61 = vpop.eup %5315  ;;  %4538 = vst.msk [vmem:[%s9553_s13 + $0x68] sm:$0xff] %vm347_vm1, %v4506_v33  ;;  %5337 = vpow2.f32 %v4425_v53  ;;  %v4364_v34 = vsub.f32 0.0, %v9686_v24 }
 0x499   : > { %v5318_v54 = vpop.eup %5317  ;;  %v4511_v43 = vmul.f32 %v5316_v61, %v9596_v29  ;;  %5339 = vrcp.f32 %v4450_v9  ;;  %v4362_v39 = vsub.f32 0.0, %v9689_v56 }
 0x49a   : > { %v5320_v62 = vpop.eup %5319  ;;  %v4455_v20 = vadd.f32 1.0, %v5318_v54  ;;  %5341 = vpow2.f32 %v4421_v3  ;;  %v4427_v28 = vmul.f32 1.442695, %v4364_v34 }
 0x49b   : > { %v5322_v7 = vpop.eup %5321  ;;  %4543 = vst.msk [vmem:[%s9553_s13 + $0x90] sm:$0xff] %vm347_vm1, %v4511_v43  ;;  %v4509_v52 = vmul.f32 %v5320_v62, %v9600_v12  ;;  %v4423_v45 = vmul.f32 1.442695, %v4362_v39 }
 0x49c   : > { %v5324_v18 = vpop.eup %5323  ;;  %5343 = vrcp.f32 %v4455_v20  ;;  %v4453_v35 = vadd.f32 1.0, %v5322_v7 }
 0x49d   : > { %v5326_v63 = vpop.eup %5325  ;;  %4541 = vst.msk [vmem:[%s9553_s13 + $0x80] sm:$0xff] %vm347_vm1, %v4509_v52  ;;  %v4512_v29 = vmul.f32 %v5324_v18, %v9605_v55  ;;  %5345 = vpow2.f32 %v4427_v28 }
 0x49e   : > { %v5328_v2 = vpop.eup %5327  ;;  %5347 = vrcp.f32 %v4453_v35  ;;  %v4456_v14 = vadd.f32 1.0, %v5326_v63 }
 0x49f   : > { %v5330_v10 = vpop.eup %5329  ;;  %4544 = vst.msk [vmem:[%s9553_s13 + $0x98] sm:$0xff] %vm347_vm1, %v4512_v29  ;;  %v4510_v12 = vmul.f32 %v5328_v2, %v9608_v31  ;;  %5349 = vpow2.f32 %v4423_v45 }
 0x4a0   : > { %v5332_v8 = vpop.eup %5331  ;;  %5351 = vrcp.f32 %v4456_v14  ;;  %v4454_v23 = vadd.f32 1.0, %v5330_v10 }
 0x4a1   : > { %4542 = vst.msk [vmem:[%s9553_s13 + $0x88] sm:$0xff] %vm347_vm1, %v4510_v12  ;;  %v4515_v55 = vmul.f32 %v5332_v8, %v9616_v16 }
 0x4a2   : > { %v5334_v6 = vpop.eup %5333  ;;  %5353 = vrcp.f32 %v4454_v23 }
 0x4a3   : > { %4547 = vst.msk [vmem:[%s9553_s13 + $0xb0] sm:$0xff] %vm347_vm1, %v4515_v55  ;;  %v4513_v48 = vmul.f32 %v5334_v6, %v9626_v1 }
 0x4a4   : > { %v5336_v15 = vpop.eup %5335 }
 0x4a5   : > { %v5338_v57 = vpop.eup %5337  ;;  %4545 = vst.msk [vmem:[%s9553_s13 + $0xa0] sm:$0xff] %vm347_vm1, %v4513_v48  ;;  %v4516_v31 = vmul.f32 %v5336_v15, %v9629_v4 }
 0x4a6   : > { %v5340_v11 = vpop.eup %5339  ;;  %v4459_v37 = vadd.f32 1.0, %v5338_v57 }
 0x4a7   : > { %v5342_v5 = vpop.eup %5341  ;;  %4548 = vst.msk [vmem:[%s9553_s13 + $0xb8] sm:$0xff] %vm347_vm1, %v4516_v31  ;;  %v4514_v16 = vmul.f32 %v5340_v11, %v9636_v49 }
 0x4a8   : > { %5355 = vrcp.f32 %v4459_v37  ;;  %v4457_v51 = vadd.f32 1.0, %v5342_v5 }
 0x4a9   : > { %v5344_v46 = vpop.eup %5343  ;;  %4546 = vst.msk [vmem:[%s9553_s13 + $0xa8] sm:$0xff] %vm347_vm1, %v4514_v16 }
 0x4aa   : > { %v5346_v1 = vpop.eup %5345  ;;  %v4519_v13 = vmul.f32 %v5344_v46, %v9640_v44  ;;  %5357 = vrcp.f32 %v4457_v51 }
 0x4ab   : > { %v5348_v4 = vpop.eup %5347  ;;  %v4460_v25 = vadd.f32 1.0, %v5346_v1 }
 0x4ac   : > { %v5350_v50 = vpop.eup %5349  ;;  %4551 = vst.msk [vmem:[%s9553_s13 + $0xd0] sm:$0xff] %vm347_vm1, %v4519_v13  ;;  %v4517_v49 = vmul.f32 %v5348_v4, %v9643_v22 }
 0x4ad   : > { %v5352_v38 = vpop.eup %5351  ;;  %5359 = vrcp.f32 %v4460_v25  ;;  %v4458_v32 = vadd.f32 1.0, %v5350_v50 }
 0x4ae   : > { %4549 = vst.msk [vmem:[%s9553_s13 + $0xc0] sm:$0xff] %vm347_vm1, %v4517_v49  ;;  %v4520_v27 = vmul.f32 %v5352_v38, %v9649_v17 }
 0x4af   : > { %v5354_v44 = vpop.eup %5353  ;;  %5361 = vrcp.f32 %v4458_v32 }
 0x4b0   : > { %4552 = vst.msk [vmem:[%s9553_s13 + $0xd8] sm:$0xff] %vm347_vm1, %v4520_v27  ;;  %v4518_v59 = vmul.f32 %v5354_v44, %v9656_v26 }
 0x4b2   : > { %4550 = vst.msk [vmem:[%s9553_s13 + $0xc8] sm:$0xff] %vm347_vm1, %v4518_v59 }
 0x4b5   : > { %v5356_v42 = vpop.eup %5355 }
 0x4b6   : > { %v4523_v22 = vmul.f32 %v5356_v42, %v9669_v60 }
 0x4b7   : > { %v5358_v58 = vpop.eup %5357 }
 0x4b8   : > { %4555 = vst.msk [vmem:[%s9553_s13 + $0xf0] sm:$0xff] %vm347_vm1, %v4523_v22  ;;  %v4521_v21 = vmul.f32 %v5358_v58, %v9676_v30 }
 0x4ba   : > { %v5360_v40 = vpop.eup %5359  ;;  %4553 = vst.msk [vmem:[%s9553_s13 + $0xe0] sm:$0xff] %vm347_vm1, %v4521_v21 }
 0x4bb   : > { %v4524_v17 = vmul.f32 %v5360_v40, %v9686_v24 }
 0x4bc   : > { %v5362_v47 = vpop.eup %5361 }
 0x4bd   : > { %4556 = vst.msk [vmem:[%s9553_s13 + $0xf8] sm:$0xff] %vm347_vm1, %v4524_v17  ;;  %v4522_v26 = vmul.f32 %v5362_v47, %v9689_v56 }
 0x4bf   : > { %4554 = vst.msk [vmem:[%s9553_s13 + $0xe8] sm:$0xff] %vm347_vm1, %v4522_v26 }
 0x4c0 PF: > { %s15_s18 = sadd.s32 1, %s5392_s18  }
 0x4c1   : > { %p12_p4 = scmp.ge.s32.totalorder %s15_s18, 4  }
 0x4c3   :  { %14 = sbr.rel (!%p12_p4) target bundleno = 1 (0x1), region = 70 }

</bundles_post_ra>
